<compile_context>
chip_gen: v5e
topology: v5e:2x2
jax: 0.10.0
libtpu: 0.0.40
codegen_flags: <defaults>
</compile_context>

<pallas_src>
import jax
import jax.numpy as jnp
from jax.experimental import pallas as pl
from jax.experimental.pallas import tpu as pltpu

NEG_SLOPE = 0.01  # torch.nn.LeakyReLU() default negative slope


# ----------------------------------------------------------------------------
# Pallas kernel: fully fused MLP (all Linear + LeakyReLU layers in one kernel)
# ----------------------------------------------------------------------------
def _fused_mlp_kernel(*refs):
    # refs = (x_ref, w0, b0, w1, b1, ..., w_{L-1}, b_{L-1}, o_ref)
    x_ref = refs[0]
    o_ref = refs[-1]
    wb_refs = refs[1:-1]
    n_layers = len(wb_refs) // 2

    out = x_ref[...]
    for i in range(n_layers):                      # static unroll: 12 MXU matmuls
        w = wb_refs[2 * i][...]
        b = wb_refs[2 * i + 1][...]
        y = jnp.dot(out, w, preferred_element_type=jnp.float32) + b
        out = jnp.where(y >= 0, y, NEG_SLOPE * y)  # LeakyReLU
    o_ref[...] = out


def q_layer_forward(layer_params, n_joint, motor_control):
    """Fused q_layer: motor_control (B, inputdim) -> q_value (B, n_joint, 2)."""
    B = motor_control.shape[0]
    ws = [w for w, _ in layer_params]
    bs = [b for _, b in layer_params]

    # Pad the final layer to a lane-dense (multiple of 128) output width; extra
    # columns are zeros and are sliced off after the kernel.
    dout_last = ws[-1].shape[1]
    pad = (-dout_last) % 128
    if pad:
        ws[-1] = jnp.pad(ws[-1], ((0, 0), (0, pad)))
        bs[-1] = jnp.pad(bs[-1], ((0, 0), (0, pad)))
    dout_pad = dout_last + pad

    flat_inputs = [motor_control]
    for w, b in zip(ws, bs):
        # NOTE: on v6e/v7x weights could be cast to bf16 here (f32 accumulation is
        # kept via preferred_element_type); left in f32 to match torch semantics.
        flat_inputs.append(w)
        flat_inputs.append(b)

    vmem_spec = pl.BlockSpec(memory_space=pltpu.MemorySpace.VMEM)
    out = pl.pallas_call(
        _fused_mlp_kernel,
        out_shape=jax.ShapeDtypeStruct((B, dout_pad), jnp.float32),
        in_specs=[vmem_spec] * len(flat_inputs),
        out_specs=vmem_spec,
        compiler_params=pltpu.CompilerParams(
            vmem_limit_bytes=32 * 1024 * 1024,  # explicit: safe on v5e default 16 MiB
        ),
    )(*flat_inputs)

    return out[:, :dout_last].reshape(-1, n_joint, 2)


# ----------------------------------------------------------------------------
# Kinematics helpers (plain JAX glue, compiled inside the same jit).
# TODO(synk): t2x / inv_x / srodrigues / rpy2r / pr2t are not defined in the
# reference source; standard product-of-exponentials (Modern Robotics)
# conventions are used here.
# ----------------------------------------------------------------------------
def skew(w):
    x, y, z = w[..., 0], w[..., 1], w[..., 2]
    zero = jnp.zeros_like(x)
    return jnp.stack(
        [
            jnp.stack([zero, -z, y], -1),
            jnp.stack([z, zero, -x], -1),
            jnp.stack([-y, x, zero], -1),
        ],
        -2,
    )


def adj_inv_apply(T, tw):
    """Closed-form Ad(T)^{-1} @ tw  (== inv(t2x(T)) @ tw, but no 6x6 LU).

    T: (B,4,4) SE(3), tw: (6,) = [w, v]  ->  (B,6)
    Ad(T)^{-1} = [[R^T, 0], [-R^T [p]x, R^T]]
    """
    R = T[:, :3, :3]
    p = T[:, :3, 3]
    w, v = tw[:3], tw[3:]
    Rt = jnp.swapaxes(R, -1, -2)
    top = Rt @ w                                            # R^T w           (B,3)
    pxw = jnp.cross(p, jnp.broadcast_to(w, p.shape))        # p x w           (B,3)
    bot = jnp.einsum("bij,bj->bi", Rt, v[None, :] - pxw)    # R^T (v - p x w) (B,3)
    return jnp.concatenate([top, bot], axis=-1)


def srodrigues(tw, q):
    # tw: (6,) general (non-unit) twist [w, v]; q: (B,) -> exp([tw]*q) : (B,4,4)
    w, v = tw[:3], tw[3:]
    wn = jnp.linalg.norm(w)
    eps = 1e-8
    wn_safe = jnp.maximum(wn, eps)
    theta = q * wn                                   # (B,)
    what = skew(w / wn_safe)
    what2 = what @ what
    s = jnp.sin(theta)[:, None, None]
    c = jnp.cos(theta)[:, None, None]
    th = theta[:, None, None]
    I3 = jnp.eye(3, dtype=tw.dtype)
    R = I3[None] + s * what[None] + (1.0 - c) * what2[None]
    G = (
        I3[None] * q[:, None, None]
        + ((1.0 - c) / wn_safe) * what[None]
        + ((th - s) / wn_safe) * what2[None]
    )
    p = jnp.einsum("bij,j->bi", G, v)
    # pure translation if the angular part is ~0
    R = jnp.where(wn < eps, jnp.broadcast_to(I3, R.shape), R)
    p = jnp.where(wn < eps, q[:, None] * v[None, :], p)
    bottom = jnp.broadcast_to(
        jnp.array([[[0.0, 0.0, 0.0, 1.0]]], dtype=tw.dtype), (R.shape[0], 1, 4)
    )
    return jnp.concatenate([jnp.concatenate([R, p[..., None]], -1), bottom], -2)


def rpy2r(rpy):
    # rpy: (1,3) [roll, pitch, yaw] -> (1,3,3) with R = Rz(yaw) Ry(pitch) Rx(roll)
    r, p, y = rpy[:, 0], rpy[:, 1], rpy[:, 2]
    cr, sr = jnp.cos(r), jnp.sin(r)
    cp, sp = jnp.cos(p), jnp.sin(p)
    cy, sy = jnp.cos(y), jnp.sin(y)
    return jnp.stack(
        [
            jnp.stack([cy * cp, cy * sp * sr - sy * cr, cy * sp * cr + sy * sr], -1),
            jnp.stack([sy * cp, sy * sp * sr + cy * cr, sy * sp * cr - cy * sr], -1),
            jnp.stack([-sp, cp * sr, cp * cr], -1),
        ],
        -2,
    )


def pr2t(p, r):
    # p: (1,3), r: (1,3,3) -> (1,4,4)
    bottom = jnp.array([[[0.0, 0.0, 0.0, 1.0]]], dtype=p.dtype)
    return jnp.concatenate([jnp.concatenate([r, p[..., None]], -1), bottom], -2)


def make_revolute(tw):
    # TODO(synk): literal transcription of the reference expression (elementwise,
    # with its original precedence); the result does not feed the SE3 output.
    angular = tw[:, 0:3]
    linear = tw[:, 3:6]
    ortho = (1.0 - angular * linear / angular * angular) * linear
    return jnp.concatenate([angular, ortho], axis=1)


def make_prismatic(tw):
    return jnp.concatenate([jnp.zeros_like(tw[:, 0:3]), tw[:, 3:6]], axis=1)


# ----------------------------------------------------------------------------
# Module equivalents
# ----------------------------------------------------------------------------
def twist_forward(tp, out, q_single):
    rev, pri = tp["revolute"], tp["prismatic"]
    revTwist = make_revolute(adj_inv_apply(out, rev))
    out = out @ srodrigues(rev, q_single[:, 0])
    priTwist = make_prismatic(adj_inv_apply(out, pri))
    out = out @ srodrigues(pri, q_single[:, 1])
    return revTwist, priTwist, out


def poe_forward(twist_params, branchLs, q_value):
    B = q_value.shape[0]
    n_joint = len(branchLs)
    out = jnp.tile(jnp.eye(4, dtype=q_value.dtype), (B, 1, 1))
    rev_ls, pri_ls, outs = [], [], []
    for joint in range(n_joint):
        tp = twist_params[joint]
        revT, priT, out = twist_forward(tp, out, q_value[:, joint, :])
        rev_ls.append(revT[:, None])
        pri_ls.append(priT[:, None])
        if branchLs[joint]:
            out_temp = out @ pr2t(tp["position"], rpy2r(tp["orientation"]))
            outs.append(out_temp[:, None])
    outs = jnp.concatenate(outs, axis=1)
    return outs, jnp.concatenate(rev_ls, 1), jnp.concatenate(pri_ls, 1)


def model_forward(params, branchLs, motor_control):
    n_joint = len(branchLs)
    q_value = q_layer_forward(params["q_layers"], n_joint, motor_control)
    # TODO(synk): reference does `SE3, _ = self.poe_layer(out)` (unpacks a 3-tuple
    # into 2 names, which would raise); we return the first output (`outs`) as SE3.
    SE3, _rev, _pri = poe_forward(params["twists"], branchLs, q_value)
    return SE3


# ----------------------------------------------------------------------------
# Deterministic parameter initialization (mirrors the reference __init__ shapes)
# ----------------------------------------------------------------------------
def init_params(key, branchLs, inputdim, n_layers=7):
    n_joint = len(branchLs)
    dims = [inputdim]
    d = inputdim
    for _ in range(n_layers):
        d *= 2
        dims.append(d)
    for _ in range(n_layers - 3):
        d //= 2
        dims.append(d)
    dims.append(2 * n_joint)

    q_layers = []
    for i in range(len(dims) - 1):
        din, dout = dims[i], dims[i + 1]
        key, kw, kb = jax.random.split(key, 3)
        bound_w = (6.0 / (din + dout)) ** 0.5            # xavier_uniform
        w = jax.random.uniform(kw, (din, dout), jnp.float32, -bound_w, bound_w)
        bound_b = 1.0 / (din ** 0.5)                     # default torch Linear bias init
        b = jax.random.uniform(kb, (1, dout), jnp.float32, -bound_b, bound_b)
        q_layers.append((w, b))

    twists = []
    for _ in range(n_joint):
        key, k1, k2, k3, k4 = jax.random.split(key, 5)
        twists.append(
            {
                "revolute": jax.random.uniform(k1, (6,), jnp.float32, -1.0, 1.0),
                "prismatic": jax.random.uniform(k2, (6,), jnp.float32, -1.0, 1.0),
                "position": jax.random.uniform(k3, (1, 3), jnp.float32, -1.0, 1.0),
                "orientation": jax.random.uniform(k4, (1, 3), jnp.float32, -1.0, 1.0),
            }
        )
    return {"q_layers": q_layers, "twists": twists}


if __name__ == "__main__":
    branchLs = (True, False, True)   # n_joint = 3, two branch outputs
    inputdim = 8
    batch = 2

    key = jax.random.PRNGKey(0)
    key, kp, kx = jax.random.split(key, 3)
    params = init_params(kp, branchLs, inputdim)
    motor_control = jax.random.uniform(kx, (batch, inputdim), jnp.float32, -1.0, 1.0)

    # One jit over the whole forward: fused Pallas MLP + POE kinematics epilogue.
    fwd = jax.jit(model_forward, static_argnums=(1,))
    SE3 = fwd(params, branchLs, motor_control)
    SE3 = jax.block_until_ready(SE3)

    n_branch = sum(1 for b in branchLs if b)
    assert SE3.shape == (batch, n_branch, 4, 4), SE3.shape
    assert bool(jnp.all(jnp.isfinite(SE3)))
    print("KERNEL_OK")
</pallas_src>

<mosaic_0001>
module attributes {stable_mosaic.version = 11 : i64} {
  func.func @_fused_mlp_kernel(%arg0: memref<2x8xf32, #tpu.memory_space<vmem>>, %arg1: memref<8x16xf32, #tpu.memory_space<vmem>>, %arg2: memref<1x16xf32, #tpu.memory_space<vmem>>, %arg3: memref<16x32xf32, #tpu.memory_space<vmem>>, %arg4: memref<1x32xf32, #tpu.memory_space<vmem>>, %arg5: memref<32x64xf32, #tpu.memory_space<vmem>>, %arg6: memref<1x64xf32, #tpu.memory_space<vmem>>, %arg7: memref<64x128xf32, #tpu.memory_space<vmem>>, %arg8: memref<1x128xf32, #tpu.memory_space<vmem>>, %arg9: memref<128x256xf32, #tpu.memory_space<vmem>>, %arg10: memref<1x256xf32, #tpu.memory_space<vmem>>, %arg11: memref<256x512xf32, #tpu.memory_space<vmem>>, %arg12: memref<1x512xf32, #tpu.memory_space<vmem>>, %arg13: memref<512x1024xf32, #tpu.memory_space<vmem>>, %arg14: memref<1x1024xf32, #tpu.memory_space<vmem>>, %arg15: memref<1024x512xf32, #tpu.memory_space<vmem>>, %arg16: memref<1x512xf32, #tpu.memory_space<vmem>>, %arg17: memref<512x256xf32, #tpu.memory_space<vmem>>, %arg18: memref<1x256xf32, #tpu.memory_space<vmem>>, %arg19: memref<256x128xf32, #tpu.memory_space<vmem>>, %arg20: memref<1x128xf32, #tpu.memory_space<vmem>>, %arg21: memref<128x64xf32, #tpu.memory_space<vmem>>, %arg22: memref<1x64xf32, #tpu.memory_space<vmem>>, %arg23: memref<64x128xf32, #tpu.memory_space<vmem>>, %arg24: memref<1x128xf32, #tpu.memory_space<vmem>>, %arg25: memref<2x128xf32, #tpu.memory_space<vmem>>) attributes {dimension_semantics = [], scalar_prefetch = 0 : i64, scratch_operands = 0 : i64, tpu.core_type = #tpu.core_type<tc>} {
    %c0 = arith.constant 0 : index
    %c0_0 = arith.constant 0 : index
    %0 = vector.load %arg0[%c0, %c0_0] : memref<2x8xf32, #tpu.memory_space<vmem>>, vector<2x8xf32>
    %c0_1 = arith.constant 0 : index
    %c0_2 = arith.constant 0 : index
    %1 = vector.load %arg1[%c0_1, %c0_2] : memref<8x16xf32, #tpu.memory_space<vmem>>, vector<8x16xf32>
    %c0_3 = arith.constant 0 : index
    %c0_4 = arith.constant 0 : index
    %2 = vector.load %arg2[%c0_3, %c0_4] : memref<1x16xf32, #tpu.memory_space<vmem>>, vector<1x16xf32>
    %cst = arith.constant dense<0.000000e+00> : vector<2x16xf32>
    %3 = tpu.matmul %0, %1, %cst {dimension_numbers = #tpu.dot_dimension_numbers<[1], [0], [0], [1], [0, 0, 1, 1], [], []>} : vector<2x8xf32>, vector<8x16xf32>, vector<2x16xf32> -> vector<2x16xf32>
    %4 = vector.broadcast %2 : vector<1x16xf32> to vector<2x16xf32>
    %5 = arith.addf %3, %4 : vector<2x16xf32>
    %cst_5 = arith.constant 0.000000e+00 : f32
    %6 = vector.broadcast %cst_5 : f32 to vector<2x16xf32>
    %7 = arith.cmpf oge, %5, %6 : vector<2x16xf32>
    %cst_6 = arith.constant 0.00999999977 : f32
    %8 = vector.broadcast %cst_6 : f32 to vector<2x16xf32>
    %9 = arith.mulf %8, %5 : vector<2x16xf32>
    %10 = arith.select %7, %5, %9 : vector<2x16xi1>, vector<2x16xf32>
    %c0_7 = arith.constant 0 : index
    %c0_8 = arith.constant 0 : index
    %11 = vector.load %arg3[%c0_7, %c0_8] : memref<16x32xf32, #tpu.memory_space<vmem>>, vector<16x32xf32>
    %c0_9 = arith.constant 0 : index
    %c0_10 = arith.constant 0 : index
    %12 = vector.load %arg4[%c0_9, %c0_10] : memref<1x32xf32, #tpu.memory_space<vmem>>, vector<1x32xf32>
    %cst_11 = arith.constant dense<0.000000e+00> : vector<2x32xf32>
    %13 = tpu.matmul %10, %11, %cst_11 {dimension_numbers = #tpu.dot_dimension_numbers<[1], [0], [0], [1], [0, 0, 1, 1], [], []>} : vector<2x16xf32>, vector<16x32xf32>, vector<2x32xf32> -> vector<2x32xf32>
    %14 = vector.broadcast %12 : vector<1x32xf32> to vector<2x32xf32>
    %15 = arith.addf %13, %14 : vector<2x32xf32>
    %cst_12 = arith.constant 0.000000e+00 : f32
    %16 = vector.broadcast %cst_12 : f32 to vector<2x32xf32>
    %17 = arith.cmpf oge, %15, %16 : vector<2x32xf32>
    %cst_13 = arith.constant 0.00999999977 : f32
    %18 = vector.broadcast %cst_13 : f32 to vector<2x32xf32>
    %19 = arith.mulf %18, %15 : vector<2x32xf32>
    %20 = arith.select %17, %15, %19 : vector<2x32xi1>, vector<2x32xf32>
    %c0_14 = arith.constant 0 : index
    %c0_15 = arith.constant 0 : index
    %21 = vector.load %arg5[%c0_14, %c0_15] : memref<32x64xf32, #tpu.memory_space<vmem>>, vector<32x64xf32>
    %c0_16 = arith.constant 0 : index
    %c0_17 = arith.constant 0 : index
    %22 = vector.load %arg6[%c0_16, %c0_17] : memref<1x64xf32, #tpu.memory_space<vmem>>, vector<1x64xf32>
    %cst_18 = arith.constant dense<0.000000e+00> : vector<2x64xf32>
    %23 = tpu.matmul %20, %21, %cst_18 {dimension_numbers = #tpu.dot_dimension_numbers<[1], [0], [0], [1], [0, 0, 1, 1], [], []>} : vector<2x32xf32>, vector<32x64xf32>, vector<2x64xf32> -> vector<2x64xf32>
    %24 = vector.broadcast %22 : vector<1x64xf32> to vector<2x64xf32>
    %25 = arith.addf %23, %24 : vector<2x64xf32>
    %cst_19 = arith.constant 0.000000e+00 : f32
    %26 = vector.broadcast %cst_19 : f32 to vector<2x64xf32>
    %27 = arith.cmpf oge, %25, %26 : vector<2x64xf32>
    %cst_20 = arith.constant 0.00999999977 : f32
    %28 = vector.broadcast %cst_20 : f32 to vector<2x64xf32>
    %29 = arith.mulf %28, %25 : vector<2x64xf32>
    %30 = arith.select %27, %25, %29 : vector<2x64xi1>, vector<2x64xf32>
    %c0_21 = arith.constant 0 : index
    %c0_22 = arith.constant 0 : index
    %31 = vector.load %arg7[%c0_21, %c0_22] : memref<64x128xf32, #tpu.memory_space<vmem>>, vector<64x128xf32>
    %c0_23 = arith.constant 0 : index
    %c0_24 = arith.constant 0 : index
    %32 = vector.load %arg8[%c0_23, %c0_24] : memref<1x128xf32, #tpu.memory_space<vmem>>, vector<1x128xf32>
    %cst_25 = arith.constant dense<0.000000e+00> : vector<2x128xf32>
    %33 = tpu.matmul %30, %31, %cst_25 {dimension_numbers = #tpu.dot_dimension_numbers<[1], [0], [0], [1], [0, 0, 1, 1], [], []>} : vector<2x64xf32>, vector<64x128xf32>, vector<2x128xf32> -> vector<2x128xf32>
    %34 = vector.broadcast %32 : vector<1x128xf32> to vector<2x128xf32>
    %35 = arith.addf %33, %34 : vector<2x128xf32>
    %cst_26 = arith.constant 0.000000e+00 : f32
    %36 = vector.broadcast %cst_26 : f32 to vector<2x128xf32>
    %37 = arith.cmpf oge, %35, %36 : vector<2x128xf32>
    %cst_27 = arith.constant 0.00999999977 : f32
    %38 = vector.broadcast %cst_27 : f32 to vector<2x128xf32>
    %39 = arith.mulf %38, %35 : vector<2x128xf32>
    %40 = arith.select %37, %35, %39 : vector<2x128xi1>, vector<2x128xf32>
    %c0_28 = arith.constant 0 : index
    %c0_29 = arith.constant 0 : index
    %41 = vector.load %arg9[%c0_28, %c0_29] : memref<128x256xf32, #tpu.memory_space<vmem>>, vector<128x256xf32>
    %c0_30 = arith.constant 0 : index
    %c0_31 = arith.constant 0 : index
    %42 = vector.load %arg10[%c0_30, %c0_31] : memref<1x256xf32, #tpu.memory_space<vmem>>, vector<1x256xf32>
    %cst_32 = arith.constant dense<0.000000e+00> : vector<2x256xf32>
    %43 = tpu.matmul %40, %41, %cst_32 {dimension_numbers = #tpu.dot_dimension_numbers<[1], [0], [0], [1], [0, 0, 1, 1], [], []>} : vector<2x128xf32>, vector<128x256xf32>, vector<2x256xf32> -> vector<2x256xf32>
    %44 = vector.broadcast %42 : vector<1x256xf32> to vector<2x256xf32>
    %45 = arith.addf %43, %44 : vector<2x256xf32>
    %cst_33 = arith.constant 0.000000e+00 : f32
    %46 = vector.broadcast %cst_33 : f32 to vector<2x256xf32>
    %47 = arith.cmpf oge, %45, %46 : vector<2x256xf32>
    %cst_34 = arith.constant 0.00999999977 : f32
    %48 = vector.broadcast %cst_34 : f32 to vector<2x256xf32>
    %49 = arith.mulf %48, %45 : vector<2x256xf32>
    %50 = arith.select %47, %45, %49 : vector<2x256xi1>, vector<2x256xf32>
    %c0_35 = arith.constant 0 : index
    %c0_36 = arith.constant 0 : index
    %51 = vector.load %arg11[%c0_35, %c0_36] : memref<256x512xf32, #tpu.memory_space<vmem>>, vector<256x512xf32>
    %c0_37 = arith.constant 0 : index
    %c0_38 = arith.constant 0 : index
    %52 = vector.load %arg12[%c0_37, %c0_38] : memref<1x512xf32, #tpu.memory_space<vmem>>, vector<1x512xf32>
    %cst_39 = arith.constant dense<0.000000e+00> : vector<2x512xf32>
    %53 = tpu.matmul %50, %51, %cst_39 {dimension_numbers = #tpu.dot_dimension_numbers<[1], [0], [0], [1], [0, 0, 1, 1], [], []>} : vector<2x256xf32>, vector<256x512xf32>, vector<2x512xf32> -> vector<2x512xf32>
    %54 = vector.broadcast %52 : vector<1x512xf32> to vector<2x512xf32>
    %55 = arith.addf %53, %54 : vector<2x512xf32>
    %cst_40 = arith.constant 0.000000e+00 : f32
    %56 = vector.broadcast %cst_40 : f32 to vector<2x512xf32>
    %57 = arith.cmpf oge, %55, %56 : vector<2x512xf32>
    %cst_41 = arith.constant 0.00999999977 : f32
    %58 = vector.broadcast %cst_41 : f32 to vector<2x512xf32>
    %59 = arith.mulf %58, %55 : vector<2x512xf32>
    %60 = arith.select %57, %55, %59 : vector<2x512xi1>, vector<2x512xf32>
    %c0_42 = arith.constant 0 : index
    %c0_43 = arith.constant 0 : index
    %61 = vector.load %arg13[%c0_42, %c0_43] : memref<512x1024xf32, #tpu.memory_space<vmem>>, vector<512x1024xf32>
    %c0_44 = arith.constant 0 : index
    %c0_45 = arith.constant 0 : index
    %62 = vector.load %arg14[%c0_44, %c0_45] : memref<1x1024xf32, #tpu.memory_space<vmem>>, vector<1x1024xf32>
    %cst_46 = arith.constant dense<0.000000e+00> : vector<2x1024xf32>
    %63 = tpu.matmul %60, %61, %cst_46 {dimension_numbers = #tpu.dot_dimension_numbers<[1], [0], [0], [1], [0, 0, 1, 1], [], []>} : vector<2x512xf32>, vector<512x1024xf32>, vector<2x1024xf32> -> vector<2x1024xf32>
    %64 = vector.broadcast %62 : vector<1x1024xf32> to vector<2x1024xf32>
    %65 = arith.addf %63, %64 : vector<2x1024xf32>
    %cst_47 = arith.constant 0.000000e+00 : f32
    %66 = vector.broadcast %cst_47 : f32 to vector<2x1024xf32>
    %67 = arith.cmpf oge, %65, %66 : vector<2x1024xf32>
    %cst_48 = arith.constant 0.00999999977 : f32
    %68 = vector.broadcast %cst_48 : f32 to vector<2x1024xf32>
    %69 = arith.mulf %68, %65 : vector<2x1024xf32>
    %70 = arith.select %67, %65, %69 : vector<2x1024xi1>, vector<2x1024xf32>
    %c0_49 = arith.constant 0 : index
    %c0_50 = arith.constant 0 : index
    %71 = vector.load %arg15[%c0_49, %c0_50] : memref<1024x512xf32, #tpu.memory_space<vmem>>, vector<1024x512xf32>
    %c0_51 = arith.constant 0 : index
    %c0_52 = arith.constant 0 : index
    %72 = vector.load %arg16[%c0_51, %c0_52] : memref<1x512xf32, #tpu.memory_space<vmem>>, vector<1x512xf32>
    %cst_53 = arith.constant dense<0.000000e+00> : vector<2x512xf32>
    %73 = tpu.matmul %70, %71, %cst_53 {dimension_numbers = #tpu.dot_dimension_numbers<[1], [0], [0], [1], [0, 0, 1, 1], [], []>} : vector<2x1024xf32>, vector<1024x512xf32>, vector<2x512xf32> -> vector<2x512xf32>
    %74 = vector.broadcast %72 : vector<1x512xf32> to vector<2x512xf32>
    %75 = arith.addf %73, %74 : vector<2x512xf32>
    %cst_54 = arith.constant 0.000000e+00 : f32
    %76 = vector.broadcast %cst_54 : f32 to vector<2x512xf32>
    %77 = arith.cmpf oge, %75, %76 : vector<2x512xf32>
    %cst_55 = arith.constant 0.00999999977 : f32
    %78 = vector.broadcast %cst_55 : f32 to vector<2x512xf32>
    %79 = arith.mulf %78, %75 : vector<2x512xf32>
    %80 = arith.select %77, %75, %79 : vector<2x512xi1>, vector<2x512xf32>
    %c0_56 = arith.constant 0 : index
    %c0_57 = arith.constant 0 : index
    %81 = vector.load %arg17[%c0_56, %c0_57] : memref<512x256xf32, #tpu.memory_space<vmem>>, vector<512x256xf32>
    %c0_58 = arith.constant 0 : index
    %c0_59 = arith.constant 0 : index
    %82 = vector.load %arg18[%c0_58, %c0_59] : memref<1x256xf32, #tpu.memory_space<vmem>>, vector<1x256xf32>
    %cst_60 = arith.constant dense<0.000000e+00> : vector<2x256xf32>
    %83 = tpu.matmul %80, %81, %cst_60 {dimension_numbers = #tpu.dot_dimension_numbers<[1], [0], [0], [1], [0, 0, 1, 1], [], []>} : vector<2x512xf32>, vector<512x256xf32>, vector<2x256xf32> -> vector<2x256xf32>
    %84 = vector.broadcast %82 : vector<1x256xf32> to vector<2x256xf32>
    %85 = arith.addf %83, %84 : vector<2x256xf32>
    %cst_61 = arith.constant 0.000000e+00 : f32
    %86 = vector.broadcast %cst_61 : f32 to vector<2x256xf32>
    %87 = arith.cmpf oge, %85, %86 : vector<2x256xf32>
    %cst_62 = arith.constant 0.00999999977 : f32
    %88 = vector.broadcast %cst_62 : f32 to vector<2x256xf32>
    %89 = arith.mulf %88, %85 : vector<2x256xf32>
    %90 = arith.select %87, %85, %89 : vector<2x256xi1>, vector<2x256xf32>
    %c0_63 = arith.constant 0 : index
    %c0_64 = arith.constant 0 : index
    %91 = vector.load %arg19[%c0_63, %c0_64] : memref<256x128xf32, #tpu.memory_space<vmem>>, vector<256x128xf32>
    %c0_65 = arith.constant 0 : index
    %c0_66 = arith.constant 0 : index
    %92 = vector.load %arg20[%c0_65, %c0_66] : memref<1x128xf32, #tpu.memory_space<vmem>>, vector<1x128xf32>
    %cst_67 = arith.constant dense<0.000000e+00> : vector<2x128xf32>
    %93 = tpu.matmul %90, %91, %cst_67 {dimension_numbers = #tpu.dot_dimension_numbers<[1], [0], [0], [1], [0, 0, 1, 1], [], []>} : vector<2x256xf32>, vector<256x128xf32>, vector<2x128xf32> -> vector<2x128xf32>
    %94 = vector.broadcast %92 : vector<1x128xf32> to vector<2x128xf32>
    %95 = arith.addf %93, %94 : vector<2x128xf32>
    %cst_68 = arith.constant 0.000000e+00 : f32
    %96 = vector.broadcast %cst_68 : f32 to vector<2x128xf32>
    %97 = arith.cmpf oge, %95, %96 : vector<2x128xf32>
    %cst_69 = arith.constant 0.00999999977 : f32
    %98 = vector.broadcast %cst_69 : f32 to vector<2x128xf32>
    %99 = arith.mulf %98, %95 : vector<2x128xf32>
    %100 = arith.select %97, %95, %99 : vector<2x128xi1>, vector<2x128xf32>
    %c0_70 = arith.constant 0 : index
    %c0_71 = arith.constant 0 : index
    %101 = vector.load %arg21[%c0_70, %c0_71] : memref<128x64xf32, #tpu.memory_space<vmem>>, vector<128x64xf32>
    %c0_72 = arith.constant 0 : index
    %c0_73 = arith.constant 0 : index
    %102 = vector.load %arg22[%c0_72, %c0_73] : memref<1x64xf32, #tpu.memory_space<vmem>>, vector<1x64xf32>
    %cst_74 = arith.constant dense<0.000000e+00> : vector<2x64xf32>
    %103 = tpu.matmul %100, %101, %cst_74 {dimension_numbers = #tpu.dot_dimension_numbers<[1], [0], [0], [1], [0, 0, 1, 1], [], []>} : vector<2x128xf32>, vector<128x64xf32>, vector<2x64xf32> -> vector<2x64xf32>
    %104 = vector.broadcast %102 : vector<1x64xf32> to vector<2x64xf32>
    %105 = arith.addf %103, %104 : vector<2x64xf32>
    %cst_75 = arith.constant 0.000000e+00 : f32
    %106 = vector.broadcast %cst_75 : f32 to vector<2x64xf32>
    %107 = arith.cmpf oge, %105, %106 : vector<2x64xf32>
    %cst_76 = arith.constant 0.00999999977 : f32
    %108 = vector.broadcast %cst_76 : f32 to vector<2x64xf32>
    %109 = arith.mulf %108, %105 : vector<2x64xf32>
    %110 = arith.select %107, %105, %109 : vector<2x64xi1>, vector<2x64xf32>
    %c0_77 = arith.constant 0 : index
    %c0_78 = arith.constant 0 : index
    %111 = vector.load %arg23[%c0_77, %c0_78] : memref<64x128xf32, #tpu.memory_space<vmem>>, vector<64x128xf32>
    %c0_79 = arith.constant 0 : index
    %c0_80 = arith.constant 0 : index
    %112 = vector.load %arg24[%c0_79, %c0_80] : memref<1x128xf32, #tpu.memory_space<vmem>>, vector<1x128xf32>
    %cst_81 = arith.constant dense<0.000000e+00> : vector<2x128xf32>
    %113 = tpu.matmul %110, %111, %cst_81 {dimension_numbers = #tpu.dot_dimension_numbers<[1], [0], [0], [1], [0, 0, 1, 1], [], []>} : vector<2x64xf32>, vector<64x128xf32>, vector<2x128xf32> -> vector<2x128xf32>
    %114 = vector.broadcast %112 : vector<1x128xf32> to vector<2x128xf32>
    %115 = arith.addf %113, %114 : vector<2x128xf32>
    %cst_82 = arith.constant 0.000000e+00 : f32
    %116 = vector.broadcast %cst_82 : f32 to vector<2x128xf32>
    %117 = arith.cmpf oge, %115, %116 : vector<2x128xf32>
    %cst_83 = arith.constant 0.00999999977 : f32
    %118 = vector.broadcast %cst_83 : f32 to vector<2x128xf32>
    %119 = arith.mulf %118, %115 : vector<2x128xf32>
    %120 = arith.select %117, %115, %119 : vector<2x128xi1>, vector<2x128xf32>
    %c0_84 = arith.constant 0 : index
    %c0_85 = arith.constant 0 : index
    %121 = vector.load %arg25[%c0_84, %c0_85] : memref<2x128xf32, #tpu.memory_space<vmem>>, vector<2x128xf32>
    tpu.vector_store %arg25[%c0_84, %c0_85], %120 {strides = array<i32>} : memref<2x128xf32, #tpu.memory_space<vmem>>, vector<2x128xf32>,
    return
  }
}

</mosaic_0001>

<bundles_post_ra>
// kernel: model_forward.1
= control target key start
LH: loop header
LB: loop body
LE: loop exit
PB: predicated region body
PF: predicated region fallthrough
CT: control target
= control target key end

     0   :  { %s4825_s0 = inlined_call_operand.hbm [shape: f32[2,8], index: 0, kind: input, shape index: {}]   ;;  %s4826_s1 = inlined_call_operand.hbm [shape: f32[8,16], index: 1, kind: input, shape index: {}]   ;;  %s4827_s2 = inlined_call_operand.hbm [shape: f32[1,16], index: 2, kind: input, shape index: {}]   ;;  %s4828_s3 = inlined_call_operand.hbm [shape: f32[16,32], index: 3, kind: input, shape index: {}]   ;;  %s4829_s4 = inlined_call_operand.hbm [shape: f32[1,32], index: 4, kind: input, shape index: {}]   ;;  %s4830_s5 = inlined_call_operand.hbm [shape: f32[32,64], index: 5, kind: input, shape index: {}]   ;;  %s4831_s6 = inlined_call_operand.hbm [shape: f32[1,64], index: 6, kind: input, shape index: {}]   ;;  %s4832_s7 = inlined_call_operand.hbm [shape: f32[64,128], index: 7, kind: input, shape index: {}]   ;;  %s4833_s8 = inlined_call_operand.hbm [shape: f32[1,128], index: 8, kind: input, shape index: {}]   ;;  %s4834_s9 = inlined_call_operand.hbm [shape: f32[128,256], index: 9, kind: input, shape index: {}]   ;;  %s4835_s10 = inlined_call_operand.hbm [shape: f32[1,256], index: 10, kind: input, shape index: {}]   ;;  %s4836_s11 = inlined_call_operand.hbm [shape: f32[256,512], index: 11, kind: input, shape index: {}]   ;;  %s4837_s12 = inlined_call_operand.hbm [shape: f32[1,512], index: 12, kind: input, shape index: {}]   ;;  %s4838_s13 = inlined_call_operand.hbm [shape: f32[512,1024], index: 13, kind: input, shape index: {}]   ;;  %s4839_s14 = inlined_call_operand.hbm [shape: f32[1,1024], index: 14, kind: input, shape index: {}]   ;;  %s4840_s15 = inlined_call_operand.hbm [shape: f32[1024,512], index: 15, kind: input, shape index: {}]   ;;  %s4841_s16 = inlined_call_operand.hbm [shape: f32[1,512], index: 16, kind: input, shape index: {}]   ;;  %s4842_s17 = inlined_call_operand.hbm [shape: f32[512,256], index: 17, kind: input, shape index: {}]   ;;  %s4843_s18 = inlined_call_operand.hbm [shape: f32[1,256], index: 18, kind: input, shape index: {}]   ;;  %s4844_s19 = inlined_call_operand.hbm [shape: f32[256,128], index: 19, kind: input, shape index: {}]   ;;  %s4845_s20 = inlined_call_operand.hbm [shape: f32[1,128], index: 20, kind: input, shape index: {}]   ;;  %s4846_s21 = inlined_call_operand.vmem [shape: f32[128,64], index: 21, kind: input, shape index: {}]   ;;  %s4847_s22 = inlined_call_operand.hbm [shape: f32[1,64], index: 22, kind: input, shape index: {}]   ;;  %s4848_s23 = inlined_call_operand.vmem [shape: f32[64,128], index: 23, kind: input, shape index: {}]   ;;  %s4849_s24 = inlined_call_operand.vmem [shape: f32[1,128], index: 24, kind: input, shape index: {}]   ;;  %s4850_s25 = inlined_call_operand.vmem [shape: f32[2,128], index: 25, kind: output, shape index: {}]  }
   0x1   :  { %4854 = sst [smem:[#allocation48_spill]] %s4825_s0 }
   0x2   :  { %4855 = sst [smem:[#allocation49_spill]] %s4826_s1 }
   0x3   :  { %4856 = sst [smem:[#allocation50_spill]] %s4827_s2 }
   0x4   :  { %4857 = sst [smem:[#allocation51_spill]] %s4828_s3 }
   0x5   :  { %4858 = sst [smem:[#allocation52_spill]] %s4829_s4 }
   0x6   :  { %4859 = sst [smem:[#allocation53_spill]] %s4830_s5 }
   0x7   :  { %4860 = sst [smem:[#allocation54_spill]] %s4831_s6 }
   0x8   :  { %4861 = sst [smem:[#allocation55_spill]] %s4832_s7 }
   0x9   :  { %4862 = sst [smem:[#allocation56_spill]] %s4833_s8 }
   0xa   :  { %4863 = sst [smem:[#allocation57_spill]] %s4834_s9 }
   0xb   :  { %4864 = sst [smem:[#allocation58_spill]] %s4849_s24 }
   0xc   :  { %4865 = sst [smem:[#allocation59_spill]] %s4850_s25 }
   0xd   :  { %30 = vsyncpa [#allocation3], 0 }
   0xe   :  { %31 = vsyncpa [#allocation5], 0 }
   0xf   :  { %32 = vsyncpa [#allocation8], 0 }
  0x10   :  { %33 = vsyncpa [#allocation11], 0 }
  0x11   :  { %34 = vsyncpa [#allocation14], 0 }
  0x12   :  { %35 = vsyncpa [#allocation17], 0 }
  0x13   :  { %36 = vsyncpa [#allocation20], 0 }
  0x14   :  { %37 = vsyncpa [#allocation23], 0 }
  0x15   :  { %38 = vsyncpa [#allocation26], 0 }
  0x16   :  { %39 = vsyncpa [#allocation29], 0 }
  0x17   :  { %40 = vsyncpa [#allocation32], 0  ;;  %s4866_s6 = sld [smem:[#allocation49_spill]] }
  0x1d   :  { %s58_s30 = sshll.u32 %s4866_s6, 4  ;;  %s59_s30 = int_to_ptr.hbm [resolvable:$true] %s58_s30 }
  0x1e   :  { %41 = vsyncpa [#allocation35], 0  ;;  %s4370_s7 = smov [#allocation4]   ;;  %s4867_s8 = sld [smem:[#allocation51_spill]] }
  0x1f   :  { %s60_s3 = sshll.u32 %s4370_s7, 4  ;;  %s4371_s4 = smov [#allocation7]   ;;  %s61_s3 = int_to_ptr.vmem [resolvable:$true] %s60_s3 }
  0x20   :  { %63 = dma.hbm_to_vmem [thread:$0]  %s59_s30, 128, %s61_s3, [#allocation5]  }
  0x21   :  { %s81_s28 = sshll.u32 %s4371_s4, 4  ;;  %s4851_s9 = smov 128   ;;  %s82_s28 = int_to_ptr.vmem [resolvable:$true] %s81_s28 }
  0x22   :  { %s4852_s5 = smov 8   ;;  %s4868_s2 = sld [smem:[#allocation53_spill]] }
  0x23   :  { %s4374_s7 = smov [#allocation10]   ;;  %s4869_s3 = sld [smem:[#allocation55_spill]] }
  0x24   :  { %s79_s27 = sshll.u32 %s4867_s8, 4  ;;  %s105_s25 = sshll.u32 %s4374_s7, 4  ;;  %s80_s27 = int_to_ptr.hbm [resolvable:$true] %s79_s27  ;;  %s106_s25 = int_to_ptr.vmem [resolvable:$true] %s105_s25 }
  0x25   :  { %87 = dma.hbm_to_vmem [thread:$0]  %s80_s27, 256, %s82_s28, [#allocation8], %s4851_s9, %s4851_s9, %s4852_s5  }
  0x26   :  { %s4375_s8 = smov [#allocation13]   ;;  %s4870_s24 = sld [smem:[#allocation57_spill]] }
  0x27   :  { %s129_s4 = sshll.u32 %s4375_s8, 4  ;;  %s4376_s29 = smov [#allocation16]   ;;  %s130_s4 = int_to_ptr.vmem [resolvable:$true] %s129_s4 }
  0x28   :  { %s103_s6 = sshll.u32 %s4868_s2, 4  ;;  %s153_s2 = sshll.u32 %s4376_s29, 4  ;;  %s104_s6 = int_to_ptr.hbm [resolvable:$true] %s103_s6  ;;  %s154_s2 = int_to_ptr.vmem [resolvable:$true] %s153_s2 }
  0x29   :  { %s127_s1 = sshll.u32 %s4869_s3, 4  ;;  %s4378_s30 = smov 16   ;;  %s128_s1 = int_to_ptr.hbm [resolvable:$true] %s127_s1 }
  0x2a   :  { %111 = dma.hbm_to_vmem [thread:$0]  %s104_s6, 512, %s106_s25, [#allocation11], %s4851_s9, %s4851_s9, %s4852_s5  }
  0x2b   :  { %135 = dma.hbm_to_vmem [thread:$0]  %s128_s1, 1024, %s130_s4, [#allocation14], %s4851_s9, %s4851_s9, %s4852_s5  }
  0x2c   :  { %s151_s0 = sshll.u32 %s4870_s24, 4  ;;  %s175_s25 = sshll.u32 %s4836_s11, 4  ;;  %s152_s0 = int_to_ptr.hbm [resolvable:$true] %s151_s0  ;;  %s176_s25 = int_to_ptr.hbm [resolvable:$true] %s175_s25 }
  0x2d   :  { %s4853_s6 = smov 256   ;;  %s4379_s24 = smov [#allocation19]  }
  0x2e   :  { %159 = dma.hbm_to_vmem [thread:$0]  %s152_s0, 4096, %s154_s2, [#allocation17], %s4853_s6, %s4853_s6, %s4378_s30  }
  0x2f   :  { %s177_s3 = sshll.u32 %s4379_s24, 4  ;;  %s4380_s8 = smov 512   ;;  %s178_s3 = int_to_ptr.vmem [resolvable:$true] %s177_s3 }
  0x30   :  { %s4381_s27 = smov 32   ;;  %s199_s28 = sshll.u32 %s4838_s13, 4  ;;  %s200_s28 = int_to_ptr.hbm [resolvable:$true] %s199_s28 }
  0x31   :  { %183 = dma.hbm_to_vmem [thread:$0]  %s176_s25, 16384, %s178_s3, [#allocation20], %s4380_s8, %s4380_s8, %s4381_s27  }
  0x32   :  { %s4382_s29 = smov [#allocation22]   ;;  %s223_s9 = sshll.u32 %s4840_s15, 4  ;;  %s224_s9 = int_to_ptr.hbm [resolvable:$true] %s223_s9 }
  0x33   :  { %s201_s11 = sshll.u32 %s4382_s29, 4  ;;  %s4383_s0 = smov 1024   ;;  %s202_s11 = int_to_ptr.vmem [resolvable:$true] %s201_s11 }
  0x34   :  { %s4384_s2 = smov 64   ;;  %s4385_s24 = smov [#allocation25]  }
  0x35   :  { %207 = dma.hbm_to_vmem [thread:$0]  %s200_s28, 65536, %s202_s11, [#allocation23], %s4383_s0, %s4383_s0, %s4384_s2  }
  0x36   :  { %s225_s5 = sshll.u32 %s4385_s24, 4  ;;  %s247_s3 = sshll.u32 %s4842_s17, 4  ;;  %s226_s5 = int_to_ptr.vmem [resolvable:$true] %s225_s5  ;;  %s248_s3 = int_to_ptr.hbm [resolvable:$true] %s247_s3 }
  0x37   :  { %231 = dma.hbm_to_vmem [thread:$0]  %s224_s9, 65536, %s226_s5, [#allocation26], %s4380_s8, %s4380_s8, %s4381_s27  }
  0x38   :  { %s271_s4 = sshll.u32 %s4844_s19, 4  ;;  %s4386_s29 = smov [#allocation28]   ;;  %s272_s4 = int_to_ptr.hbm [resolvable:$true] %s271_s4 }
  0x39   :  { %s249_s7 = sshll.u32 %s4386_s29, 4  ;;  %s4871_s15 = smov 256   ;;  %s250_s7 = int_to_ptr.vmem [resolvable:$true] %s249_s7 }
  0x3a   :  { %255 = dma.hbm_to_vmem [thread:$0]  %s248_s3, 16384, %s250_s7, [#allocation29], %s4871_s15, %s4871_s15, %s4378_s30  }
  0x3b   :  { %s4387_s28 = smov [#allocation31]   ;;  %s4872_s17 = sld [smem:[#allocation48_spill]] }
  0x3c   :  { %s273_s11 = sshll.u32 %s4387_s28, 4  ;;  %s4873_s9 = smov 8   ;;  %s274_s11 = int_to_ptr.vmem [resolvable:$true] %s273_s11 }
  0x3d   :  { %s4874_s5 = smov 128   ;;  %s4875_s27 = sld [smem:[#allocation50_spill]] }
  0x3e   :  { %279 = dma.hbm_to_vmem [thread:$0]  %s272_s4, 4096, %s274_s11, [#allocation32], %s4874_s5, %s4874_s5, %s4873_s9  }
  0x3f   :  { %s4388_s24 = smov [#allocation2]   ;;  %s4389_s30 = smov [#allocation6]  }
  0x40   :  { %s49_s25 = sshll.u32 %s4388_s24, 4  ;;  %s71_s3 = sshll.u32 %s4389_s30, 4  ;;  %s50_s25 = int_to_ptr.vmem [resolvable:$true] %s49_s25  ;;  %s72_s3 = int_to_ptr.vmem [resolvable:$true] %s71_s3 }
  0x41   :  { %s47_s0 = sshll.u32 %s4872_s17, 4  ;;  %s4876_s29 = sld [smem:[#allocation52_spill]]  ;;  %s48_s0 = int_to_ptr.hbm [resolvable:$true] %s47_s0 }
  0x42   :  { %52 = dma.hbm_to_vmem [thread:$0]  %s48_s0, 32, %s50_s25, [#allocation3]  }
  0x43   :  { %s69_s2 = sshll.u32 %s4875_s27, 4  ;;  %s4877_s28 = sld [smem:[#allocation54_spill]]  ;;  %s70_s2 = int_to_ptr.hbm [resolvable:$true] %s69_s2 }
  0x44   :  { %74 = dma.hbm_to_vmem [thread:$0]  %s70_s2, 16, %s72_s3, [#allocation5]  }
  0x45   :  { %s4390_s26 = smov [#allocation9]   ;;  %s4391_s17 = smov [#allocation12]  }
  0x46   :  { %s95_s6 = sshll.u32 %s4390_s26, 4  ;;  %s119_s0 = sshll.u32 %s4391_s17, 4  ;;  %s96_s6 = int_to_ptr.vmem [resolvable:$true] %s95_s6  ;;  %s120_s0 = int_to_ptr.vmem [resolvable:$true] %s119_s0 }
  0x47   :  { %s93_s7 = sshll.u32 %s4876_s29, 4  ;;  %s4878_s19 = sld [smem:[#allocation56_spill]]  ;;  %s94_s7 = int_to_ptr.hbm [resolvable:$true] %s93_s7 }
  0x48   :  { %98 = dma.hbm_to_vmem [thread:$0]  %s94_s7, 16, %s96_s6, [#allocation8]  }
  0x49   :  { %s117_s11 = sshll.u32 %s4877_s28, 4  ;;  %s165_s24 = sshll.u32 %s4835_s10, 4  ;;  %s118_s11 = int_to_ptr.hbm [resolvable:$true] %s117_s11  ;;  %s166_s24 = int_to_ptr.hbm [resolvable:$true] %s165_s24 }
  0x4a   :  { %122 = dma.hbm_to_vmem [thread:$0]  %s118_s11, 16, %s120_s0, [#allocation11]  }
  0x4b   :  { %s4392_s25 = smov [#allocation15]   ;;  %s4393_s3 = smov [#allocation18]  }
  0x4c   :  { %s143_s30 = sshll.u32 %s4392_s25, 4  ;;  %s167_s13 = sshll.u32 %s4393_s3, 4  ;;  %s144_s30 = int_to_ptr.vmem [resolvable:$true] %s143_s30  ;;  %s168_s13 = int_to_ptr.vmem [resolvable:$true] %s167_s13 }
  0x4d   :  { %s141_s8 = sshll.u32 %s4878_s19, 4  ;;  %s189_s7 = sshll.u32 %s4837_s12, 4  ;;  %s142_s8 = int_to_ptr.hbm [resolvable:$true] %s141_s8  ;;  %s190_s7 = int_to_ptr.hbm [resolvable:$true] %s189_s7 }
  0x4e   :  { %146 = dma.hbm_to_vmem [thread:$0]  %s142_s8, 16, %s144_s30, [#allocation14]  }
  0x4f   :  { %170 = dma.hbm_to_vmem [thread:$0]  %s166_s24, 32, %s168_s13, [#allocation17]  }
  0x50   :  { %s213_s28 = sshll.u32 %s4839_s14, 4  ;;  %s4394_s11 = smov [#allocation21]   ;;  %s214_s28 = int_to_ptr.hbm [resolvable:$true] %s213_s28 }
  0x51   :  { %s191_s10 = sshll.u32 %s4394_s11, 4  ;;  %s4395_s26 = smov [#allocation24]   ;;  %s192_s10 = int_to_ptr.vmem [resolvable:$true] %s191_s10 }
  0x52   :  { %194 = dma.hbm_to_vmem [thread:$0]  %s190_s7, 64, %s192_s10, [#allocation20]  }
  0x53   :  { %s215_s6 = sshll.u32 %s4395_s26, 4  ;;  %s237_s9 = sshll.u32 %s4841_s16, 4  ;;  %s216_s6 = int_to_ptr.vmem [resolvable:$true] %s215_s6  ;;  %s238_s9 = int_to_ptr.hbm [resolvable:$true] %s237_s9 }
  0x54   :  { %218 = dma.hbm_to_vmem [thread:$0]  %s214_s28, 128, %s216_s6, [#allocation23]  }
  0x55   :  { %s261_s19 = sshll.u32 %s4843_s18, 4  ;;  %s4396_s8 = smov [#allocation27]   ;;  %s262_s19 = int_to_ptr.hbm [resolvable:$true] %s261_s19 }
  0x56   :  { %s239_s14 = sshll.u32 %s4396_s8, 4  ;;  %s4397_s27 = smov [#allocation30]   ;;  %s240_s14 = int_to_ptr.vmem [resolvable:$true] %s239_s14 }
  0x57   :  { %242 = dma.hbm_to_vmem [thread:$0]  %s238_s9, 64, %s240_s14, [#allocation26]  }
  0x58   :  { %s263_s2 = sshll.u32 %s4397_s27, 4  ;;  %s285_s30 = sshll.u32 %s4845_s20, 4  ;;  %s264_s2 = int_to_ptr.vmem [resolvable:$true] %s263_s2  ;;  %s286_s30 = int_to_ptr.hbm [resolvable:$true] %s285_s30 }
  0x59   :  { %266 = dma.hbm_to_vmem [thread:$0]  %s262_s19, 32, %s264_s2, [#allocation29]  }
  0x5a   :  { %s298_s13 = sshll.u32 %s4847_s22, 4  ;;  %s4398_s1 = smov [#allocation33]   ;;  %s299_s13 = int_to_ptr.hbm [resolvable:$true] %s298_s13 }
  0x5b   :  { %s287_s18 = sshll.u32 %s4398_s1, 4  ;;  %s4399_s29 = smov [#allocation34]   ;;  %s288_s18 = int_to_ptr.vmem [resolvable:$true] %s287_s18 }
  0x5c   :  { %290 = dma.hbm_to_vmem [thread:$0]  %s286_s30, 16, %s288_s18, [#allocation32]  }
  0x5d   :  { %s300_s7 = sshll.u32 %s4399_s29, 4  ;;  %s301_s7 = int_to_ptr.vmem [resolvable:$true] %s300_s7 }
  0x5e   :  { %303 = dma.hbm_to_vmem [thread:$0]  %s299_s13, 16, %s301_s7, [#allocation35]  }
  0x5f   :  { %4346 = dma.done.wait [#allocation3], 32  }
  0x60   :  { %4347 = vsyncadd [#allocation3], 4294967264 }
  0x61   :  { %4348 = dma.done.wait [#allocation5], 144  }
  0x62   :  { %4349 = vsyncadd [#allocation5], 4294967152 }
  0x63   :  { %4350 = dma.done.wait [#allocation8], 272  }
  0x64   :  { %4351 = vsyncadd [#allocation8], 4294967024 }
  0x65   :  { %4352 = dma.done.wait [#allocation11], 528  }
  0x66   :  { %4353 = vsyncadd [#allocation11], 4294966768 }
  0x67   :  { %4354 = dma.done.wait [#allocation14], 1040  }
  0x68   :  { %4355 = vsyncadd [#allocation14], 4294966256 }
  0x69   :  { %4356 = dma.done.wait [#allocation17], 4128  }
  0x6a   :  { %4357 = vsyncadd [#allocation17], 4294963168 }
  0x6b   :  { %4358 = dma.done.wait [#allocation20], 16448  }
  0x6c   :  { %4359 = vsyncadd [#allocation20], 4294950848 }
  0x6d   :  { %4360 = dma.done.wait [#allocation23], 65664  }
  0x6e   :  { %4361 = vsyncadd [#allocation23], 4294901632 }
  0x6f   :  { %4362 = dma.done.wait [#allocation26], 65600  }
  0x70   :  { %4363 = vsyncadd [#allocation26], 4294901696 }
  0x71   :  { %4364 = dma.done.wait [#allocation29], 16416  }
  0x72   :  { %4365 = vsyncadd [#allocation29], 4294950880 }
  0x73   :  { %4366 = dma.done.wait [#allocation32], 4112  }
  0x74   :  { %4367 = vsyncadd [#allocation32], 4294963184 }
  0x75   :  { %4368 = dma.done.wait [#allocation35], 16  }
  0x76   :  { %4369 = vsyncadd [#allocation35], 4294967280  ;;  %vm402_vm0 = vcmask 64512   ;;  %v397_v0 = vld [vmem:[#allocation4] sm:$0xff]  ;;  %v396_v1 = vld [vmem:[#allocation2] sm:$0x3] }
  0x77   :  { %421 = vmatpush.msra.mxu2 %v397_v0  ;;  %v430_v2 = vld [vmem:[#allocation7 + $0x8] sm:$0xff]  ;;  %v429_v3 = vld [vmem:[#allocation7] sm:$0xff]  ;;  %v3810_v5 = vld [vmem:[#allocation6] ss:$0 sm:$0xff]  ;;  %vm435_vm2 = vcmask 130048   ;;  %vm470_vm4 = vcmask 261120  }
  0x78   :  { %3775 = vmatmul.msk.f32.vlgmr.msra.gmra.mxu2 %vm402_vm0, %v396_v1  ;;  %453 = vmatpush.msra.mxu1 %v430_v2  ;;  %v465_v4 = vld [vmem:[#allocation10 + $0x18] sm:$0xff]  ;;  %v464_v10 = vld [vmem:[#allocation10 + $0x10] sm:$0xff]  ;;  %v463_v11 = vld [vmem:[#allocation10 + $0x8] sm:$0xff]  ;;  %vm509_vm6 = vcmask 523264   ;;  %s4879_s25 = sld [smem:[#allocation58_spill]] }
  0x79   :  { %486 = vmatpush.msrb.mxu2 %v465_v4  ;;  %v462_v12 = vld [vmem:[#allocation10] sm:$0xff]  ;;  %v503_v14 = vld [vmem:[#allocation13 + $0x30] sm:$0xff]  ;;  %v502_v15 = vld [vmem:[#allocation13 + $0x28] sm:$0xff]  ;;  %s4880_s16 = sld [smem:[#allocation59_spill]] }
  0x7a   :  { %454 = vmatpush.msra.mxu1 %v429_v3  ;;  %v504_v13 = vld [vmem:[#allocation13 + $0x38] sm:$0xff]  ;;  %v501_v16 = vld [vmem:[#allocation13 + $0x20] sm:$0xff]  ;;  %v499_v23 = vld [vmem:[#allocation13 + $0x10] sm:$0xff] }
  0x7b   :  { %487 = vmatpush.msrb.mxu2 %v464_v10  ;;  %521 = vmatpush.msra.mxu3 %v504_v13  ;;  %v500_v17 = vld [vmem:[#allocation13 + $0x18] sm:$0xff]  ;;  %v498_v24 = vld [vmem:[#allocation13 + $0x8] sm:$0xff]  ;;  %v497_v25 = vld [vmem:[#allocation13] sm:$0xff] }
  0x7c   :  { %v3811_v18 = vld [vmem:[#allocation9] ss:$0 sm:$0xff]  ;;  %v566_v26 = vld [vmem:[#allocation16 + $0xf0] sm:$0xff]  ;;  %v564_v28 = vld [vmem:[#allocation16 + $0xe0] sm:$0xff] }
  0x7d   :  { %488 = vmatpush.msrb.mxu2 %v463_v11  ;;  %522 = vmatpush.msra.mxu3 %v503_v14  ;;  %v567_v27 = vld [vmem:[#allocation16 + $0xf8] sm:$0xff]  ;;  %v565_v29 = vld [vmem:[#allocation16 + $0xe8] sm:$0xff]  ;;  %v562_v30 = vld [vmem:[#allocation16 + $0xd0] sm:$0xff] }
  0x7e   :  { %574 = vmatpush.msra.mxu0 %v566_v26  ;;  %594 = vmatpush.msrb.mxu1 %v567_v27  ;;  %v563_v31 = vld [vmem:[#allocation16 + $0xd8] sm:$0xff]  ;;  %v560_v32 = vld [vmem:[#allocation16 + $0xc0] sm:$0xff]  ;;  %v561_v33 = vld [vmem:[#allocation16 + $0xc8] sm:$0xff] }
  0x7f   :  { %489 = vmatpush.msrb.mxu2 %v462_v12  ;;  %523 = vmatpush.msra.mxu3 %v502_v15  ;;  %v558_v34 = vld [vmem:[#allocation16 + $0xb0] sm:$0xff]  ;;  %v559_v35 = vld [vmem:[#allocation16 + $0xb8] sm:$0xff]  ;;  %v556_v36 = vld [vmem:[#allocation16 + $0xa0] sm:$0xff] }
  0x80   :  { %575 = vmatpush.msra.mxu0 %v564_v28  ;;  %595 = vmatpush.msrb.mxu1 %v565_v29  ;;  %v557_v37 = vld [vmem:[#allocation16 + $0xa8] sm:$0xff]  ;;  %v554_v38 = vld [vmem:[#allocation16 + $0x90] sm:$0xff]  ;;  %v555_v39 = vld [vmem:[#allocation16 + $0x98] sm:$0xff] }
  0x81   :  { %524 = vmatpush.msra.mxu3 %v501_v16  ;;  %v552_v40 = vld [vmem:[#allocation16 + $0x80] sm:$0xff]  ;;  %v553_v41 = vld [vmem:[#allocation16 + $0x88] sm:$0xff]  ;;  %v550_v42 = vld [vmem:[#allocation16 + $0x70] sm:$0xff] }
  0x82   :  { %576 = vmatpush.msra.mxu0 %v562_v30  ;;  %596 = vmatpush.msrb.mxu1 %v563_v31  ;;  %v551_v43 = vld [vmem:[#allocation16 + $0x78] sm:$0xff]  ;;  %v548_v44 = vld [vmem:[#allocation16 + $0x60] sm:$0xff]  ;;  %v549_v45 = vld [vmem:[#allocation16 + $0x68] sm:$0xff] }
  0x83   :  { %525 = vmatpush.msra.mxu3 %v500_v17  ;;  %v546_v46 = vld [vmem:[#allocation16 + $0x50] sm:$0xff]  ;;  %v547_v47 = vld [vmem:[#allocation16 + $0x58] sm:$0xff]  ;;  %v544_v48 = vld [vmem:[#allocation16 + $0x40] sm:$0xff] }
  0x84   :  { %577 = vmatpush.msra.mxu0 %v560_v32  ;;  %597 = vmatpush.msrb.mxu1 %v561_v33  ;;  %v545_v49 = vld [vmem:[#allocation16 + $0x48] sm:$0xff]  ;;  %v542_v50 = vld [vmem:[#allocation16 + $0x30] sm:$0xff]  ;;  %v543_v51 = vld [vmem:[#allocation16 + $0x38] sm:$0xff] }
  0x85   :  { %526 = vmatpush.msra.mxu3 %v499_v23  ;;  %v3812_v52 = vld [vmem:[#allocation12] ss:$0 sm:$0xff]  ;;  %v540_v57 = vld [vmem:[#allocation16 + $0x20] sm:$0xff]  ;;  %v541_v58 = vld [vmem:[#allocation16 + $0x28] sm:$0xff] }
  0x86   :  { %578 = vmatpush.msra.mxu0 %v558_v34  ;;  %598 = vmatpush.msrb.mxu1 %v559_v35  ;;  %v538_v59 = vld [vmem:[#allocation16 + $0x10] sm:$0xff]  ;;  %v539_v60 = vld [vmem:[#allocation16 + $0x18] sm:$0xff]  ;;  %v536_v61 = vld [vmem:[#allocation16] sm:$0xff] }
  0x87   :  { %527 = vmatpush.msra.mxu3 %v498_v24  ;;  %v537_v62 = vld [vmem:[#allocation16 + $0x8] sm:$0xff] }
  0x88   :  { %579 = vmatpush.msra.mxu0 %v556_v36  ;;  %599 = vmatpush.msrb.mxu1 %v557_v37  ;;  %v680_v63 = vld [vmem:[#allocation19 + $0x1e0] sm:$0xff]  ;;  %v681_v1 = vld [vmem:[#allocation19 + $0x1e8] sm:$0xff] }
  0x89   :  { %528 = vmatpush.msra.mxu3 %v497_v25  ;;  %v744_v0 = vld [vmem:[#allocation19 + $0x3e0] sm:$0xff]  ;;  %758 = vmatpush.msra.mxu2 %v680_v63  ;;  %v745_v2 = vld [vmem:[#allocation19 + $0x3e8] sm:$0xff] }
  0x8a   :  { %580 = vmatpush.msra.mxu0 %v554_v38  ;;  %600 = vmatpush.msrb.mxu1 %v555_v39  ;;  %v676_v3 = vld [vmem:[#allocation19 + $0x1c0] sm:$0xff]  ;;  %v737_v10 = vld [vmem:[#allocation19 + $0x3a8] sm:$0xff] }
  0x8b   :  { %778 = vmatpush.msrb.mxu3 %v744_v0  ;;  %v740_v4 = vld [vmem:[#allocation19 + $0x3c0] sm:$0xff]  ;;  %759 = vmatpush.msra.mxu2 %v676_v3  ;;  %v669_v13 = vld [vmem:[#allocation19 + $0x188] sm:$0xff] }
  0x8c   :  { %581 = vmatpush.msra.mxu0 %v552_v40  ;;  %601 = vmatpush.msrb.mxu1 %v553_v41  ;;  %v668_v11 = vld [vmem:[#allocation19 + $0x180] sm:$0xff]  ;;  %v733_v14 = vld [vmem:[#allocation19 + $0x388] sm:$0xff] }
  0x8d   :  { %779 = vmatpush.msrb.mxu3 %v740_v4  ;;  %v732_v12 = vld [vmem:[#allocation19 + $0x380] sm:$0xff]  ;;  %v665_v17 = vld [vmem:[#allocation19 + $0x168] sm:$0xff]  ;;  %v682_v4 = vld [vmem:[#allocation19 + $0x1f0] sm:$0xff] }
  0x8e   :  { %582 = vmatpush.msra.mxu0 %v550_v42  ;;  %602 = vmatpush.msrb.mxu1 %v551_v43  ;;  %v664_v15 = vld [vmem:[#allocation19 + $0x160] sm:$0xff]  ;;  %v657_v25 = vld [vmem:[#allocation19 + $0x128] sm:$0xff] }
  0x8f   :  { %v728_v16 = vld [vmem:[#allocation19 + $0x360] sm:$0xff]  ;;  %v721_v26 = vld [vmem:[#allocation19 + $0x328] sm:$0xff] }
  0x90   :  { %583 = vmatpush.msra.mxu0 %v548_v44  ;;  %603 = vmatpush.msrb.mxu1 %v549_v45  ;;  %v656_v23 = vld [vmem:[#allocation19 + $0x120] sm:$0xff]  ;;  %v653_v29 = vld [vmem:[#allocation19 + $0x108] sm:$0xff] }
  0x91   :  { %v720_v24 = vld [vmem:[#allocation19 + $0x320] sm:$0xff]  ;;  %v717_v30 = vld [vmem:[#allocation19 + $0x308] sm:$0xff] }
  0x92   :  { %584 = vmatpush.msra.mxu0 %v546_v46  ;;  %604 = vmatpush.msrb.mxu1 %v547_v47  ;;  %v652_v27 = vld [vmem:[#allocation19 + $0x100] sm:$0xff]  ;;  %v649_v33 = vld [vmem:[#allocation19 + $0xe8] sm:$0xff] }
  0x93   :  { %v716_v28 = vld [vmem:[#allocation19 + $0x300] sm:$0xff]  ;;  %v713_v34 = vld [vmem:[#allocation19 + $0x2e8] sm:$0xff] }
  0x94   :  { %585 = vmatpush.msra.mxu0 %v544_v48  ;;  %605 = vmatpush.msrb.mxu1 %v545_v49  ;;  %v648_v31 = vld [vmem:[#allocation19 + $0xe0] sm:$0xff]  ;;  %v645_v37 = vld [vmem:[#allocation19 + $0xc8] sm:$0xff]  ;;  %v3813_v49 = vld [vmem:[#allocation15] ss:$0 sm:$0xff] }
  0x95   :  { %v712_v32 = vld [vmem:[#allocation19 + $0x2e0] sm:$0xff]  ;;  %v709_v38 = vld [vmem:[#allocation19 + $0x2c8] sm:$0xff] }
  0x96   :  { %586 = vmatpush.msra.mxu0 %v542_v50  ;;  %606 = vmatpush.msrb.mxu1 %v543_v51  ;;  %v644_v35 = vld [vmem:[#allocation19 + $0xc0] sm:$0xff]  ;;  %v641_v41 = vld [vmem:[#allocation19 + $0xa8] sm:$0xff] }
  0x97   :  { %v708_v36 = vld [vmem:[#allocation19 + $0x2c0] sm:$0xff]  ;;  %v705_v42 = vld [vmem:[#allocation19 + $0x2a8] sm:$0xff] }
  0x98   :  { %587 = vmatpush.msra.mxu0 %v540_v57  ;;  %607 = vmatpush.msrb.mxu1 %v541_v58  ;;  %v640_v39 = vld [vmem:[#allocation19 + $0xa0] sm:$0xff]  ;;  %v637_v45 = vld [vmem:[#allocation19 + $0x88] sm:$0xff] }
  0x99   :  { %v704_v40 = vld [vmem:[#allocation19 + $0x2a0] sm:$0xff]  ;;  %v701_v46 = vld [vmem:[#allocation19 + $0x288] sm:$0xff] }
  0x9a   :  { %588 = vmatpush.msra.mxu0 %v538_v59  ;;  %608 = vmatpush.msrb.mxu1 %v539_v60  ;;  %v636_v43 = vld [vmem:[#allocation19 + $0x80] sm:$0xff]  ;;  %v633_v50 = vld [vmem:[#allocation19 + $0x68] sm:$0xff] }
  0x9b   :  { %v700_v44 = vld [vmem:[#allocation19 + $0x280] sm:$0xff]  ;;  %v697_v51 = vld [vmem:[#allocation19 + $0x268] sm:$0xff] }
  0x9c   :  { %589 = vmatpush.msra.mxu0 %v536_v61  ;;  %609 = vmatpush.msrb.mxu1 %v537_v62  ;;  %v632_v47 = vld [vmem:[#allocation19 + $0x60] sm:$0xff]  ;;  %v625_v60 = vld [vmem:[#allocation19 + $0x28] sm:$0xff] }
  0x9d   :  { %v696_v48 = vld [vmem:[#allocation19 + $0x260] sm:$0xff]  ;;  %v689_v61 = vld [vmem:[#allocation19 + $0x228] sm:$0xff] }
  0x9e   :  { %798 = vmatpush.msrb.mxu0 %v681_v1  ;;  %v624_v57 = vld [vmem:[#allocation19 + $0x20] sm:$0xff]  ;;  %v621_v1 = vld [vmem:[#allocation19 + $0x8] sm:$0xff] }
  0x9f   :  { %v688_v58 = vld [vmem:[#allocation19 + $0x220] sm:$0xff] }
  0xa0   :  { %v620_v62 = vld [vmem:[#allocation19] sm:$0xff] }
  0xa1   :  { %v684_v63 = vld [vmem:[#allocation19 + $0x200] sm:$0xff] }
  0xfb   :  { %v423_v6 = vpop.f32.mrf.mxu2 }
  0xfc   :  { %v424_v7 = vadd.f32 %v3810_v5, %v423_v6  ;;  %v677_v5 = vld [vmem:[#allocation19 + $0x1c8] sm:$0xff] }
  0xfd   :  { %v741_v6 = vld [vmem:[#allocation19 + $0x3c8] sm:$0xff]  ;;  %799 = vmatpush.msrb.mxu0 %v677_v5  ;;  %v746_v5 = vld [vmem:[#allocation19 + $0x3f0] sm:$0xff] }
  0xfe   :  { %v427_v8 = vmul.f32 0.01, %v424_v7  ;;  %vm426_vm1 = vcmp.ge.f32.partialorder %v424_v7, 0.0 }
 0x100   :  { %v428_v9 = vsel %vm426_vm1, %v424_v7, %v427_v8  ;;  %v672_v7 = vld [vmem:[#allocation19 + $0x1a0] sm:$0xff] }
 0x101   :  { %3776 = vmatmul.msk.f32.vlgmr.msra.gmra.mxu1 %vm435_vm2, %v428_v9  ;;  %v736_v8 = vld [vmem:[#allocation19 + $0x3a0] sm:$0xff]  ;;  %v673_v9 = vld [vmem:[#allocation19 + $0x1a8] sm:$0xff]  ;;  %760 = vmatpush.msra.mxu2 %v672_v7  ;;  %v747_v7 = vld [vmem:[#allocation19 + $0x3f8] sm:$0xff] }
 0x102   :  { %818 = vmatpush.msra.mxu1 %v745_v2  ;;  %780 = vmatpush.msrb.mxu3 %v736_v8  ;;  %v685_v2 = vld [vmem:[#allocation19 + $0x208] sm:$0xff]  ;;  %v678_v8 = vld [vmem:[#allocation19 + $0x1d0] sm:$0xff] }
 0x103   :  { %800 = vmatpush.msrb.mxu0 %v673_v9  ;;  %761 = vmatpush.msra.mxu2 %v668_v11  ;;  %v742_v9 = vld [vmem:[#allocation19 + $0x3d0] sm:$0xff]  ;;  %v743_v11 = vld [vmem:[#allocation19 + $0x3d8] sm:$0xff] }
 0x104   :  { %819 = vmatpush.msra.mxu1 %v741_v6  ;;  %781 = vmatpush.msrb.mxu3 %v732_v12  ;;  %v683_v6 = vld [vmem:[#allocation19 + $0x1f8] sm:$0xff]  ;;  %v674_v12 = vld [vmem:[#allocation19 + $0x1b0] sm:$0xff] }
 0x105   :  { %801 = vmatpush.msrb.mxu0 %v669_v13  ;;  %762 = vmatpush.msra.mxu2 %v664_v15  ;;  %v738_v13 = vld [vmem:[#allocation19 + $0x3b0] sm:$0xff]  ;;  %v739_v15 = vld [vmem:[#allocation19 + $0x3b8] sm:$0xff] }
 0x106   :  { %820 = vmatpush.msra.mxu1 %v737_v10  ;;  %782 = vmatpush.msrb.mxu3 %v728_v16  ;;  %v679_v10 = vld [vmem:[#allocation19 + $0x1d8] sm:$0xff]  ;;  %v670_v16 = vld [vmem:[#allocation19 + $0x190] sm:$0xff] }
 0x107   :  { %802 = vmatpush.msrb.mxu0 %v665_v17  ;;  %v734_v17 = vld [vmem:[#allocation19 + $0x390] sm:$0xff] }
 0x108   :  { %821 = vmatpush.msra.mxu1 %v733_v14  ;;  %v675_v14 = vld [vmem:[#allocation19 + $0x1b8] sm:$0xff] }
 0x17e   :  { %v456_v19 = vpop.f32.mrf.mxu1 }
 0x17f   :  { %v457_v20 = vadd.f32 %v3811_v18, %v456_v19  ;;  %v729_v18 = vld [vmem:[#allocation19 + $0x368] sm:$0xff]  ;;  %v660_v19 = vld [vmem:[#allocation19 + $0x140] sm:$0xff] }
 0x180   :  { %822 = vmatpush.msra.mxu1 %v729_v18  ;;  %763 = vmatpush.msra.mxu2 %v660_v19  ;;  %v671_v18 = vld [vmem:[#allocation19 + $0x198] sm:$0xff] }
 0x181   :  { %vm459_vm3 = vcmp.ge.f32.partialorder %v457_v20, 0.0  ;;  %v460_v21 = vmul.f32 0.01, %v457_v20  ;;  %v735_v19 = vld [vmem:[#allocation19 + $0x398] sm:$0xff] }
 0x182   :  { %764 = vmatpush.msra.mxu2 %v656_v23  ;;  %v731_v23 = vld [vmem:[#allocation19 + $0x378] sm:$0xff] }
 0x183   :  { %v461_v22 = vsel %vm459_vm3, %v457_v20, %v460_v21  ;;  %v724_v20 = vld [vmem:[#allocation19 + $0x340] sm:$0xff]  ;;  %v661_v21 = vld [vmem:[#allocation19 + $0x148] sm:$0xff] }
 0x184   :  { %3777 = vmatmul.msk.f32.vlgmr.msrb.gmra.mxu2 %vm470_vm4, %v461_v22  ;;  %v725_v22 = vld [vmem:[#allocation19 + $0x348] sm:$0xff]  ;;  %783 = vmatpush.msrb.mxu3 %v724_v20  ;;  %v666_v20 = vld [vmem:[#allocation19 + $0x170] sm:$0xff] }
 0x185   :  { %803 = vmatpush.msrb.mxu0 %v661_v21  ;;  %823 = vmatpush.msra.mxu1 %v725_v22  ;;  %v730_v21 = vld [vmem:[#allocation19 + $0x370] sm:$0xff]  ;;  %v667_v22 = vld [vmem:[#allocation19 + $0x178] sm:$0xff] }
 0x186   :  { %784 = vmatpush.msrb.mxu3 %v720_v24  ;;  %765 = vmatpush.msra.mxu2 %v652_v27  ;;  %v662_v24 = vld [vmem:[#allocation19 + $0x150] sm:$0xff]  ;;  %v727_v27 = vld [vmem:[#allocation19 + $0x358] sm:$0xff] }
 0x187   :  { %804 = vmatpush.msrb.mxu0 %v657_v25  ;;  %824 = vmatpush.msra.mxu1 %v721_v26  ;;  %v726_v25 = vld [vmem:[#allocation19 + $0x350] sm:$0xff]  ;;  %v663_v26 = vld [vmem:[#allocation19 + $0x158] sm:$0xff] }
 0x188   :  { %785 = vmatpush.msrb.mxu3 %v716_v28  ;;  %766 = vmatpush.msra.mxu2 %v648_v31  ;;  %v658_v28 = vld [vmem:[#allocation19 + $0x130] sm:$0xff]  ;;  %v723_v31 = vld [vmem:[#allocation19 + $0x338] sm:$0xff] }
 0x189   :  { %805 = vmatpush.msrb.mxu0 %v653_v29  ;;  %825 = vmatpush.msra.mxu1 %v717_v30  ;;  %v722_v29 = vld [vmem:[#allocation19 + $0x330] sm:$0xff]  ;;  %v659_v30 = vld [vmem:[#allocation19 + $0x138] sm:$0xff] }
 0x18a   :  { %786 = vmatpush.msrb.mxu3 %v712_v32  ;;  %767 = vmatpush.msra.mxu2 %v644_v35  ;;  %v654_v32 = vld [vmem:[#allocation19 + $0x110] sm:$0xff]  ;;  %v719_v35 = vld [vmem:[#allocation19 + $0x318] sm:$0xff] }
 0x18b   :  { %806 = vmatpush.msrb.mxu0 %v649_v33  ;;  %826 = vmatpush.msra.mxu1 %v713_v34  ;;  %v718_v33 = vld [vmem:[#allocation19 + $0x310] sm:$0xff]  ;;  %v655_v34 = vld [vmem:[#allocation19 + $0x118] sm:$0xff] }
 0x18c   :  { %787 = vmatpush.msrb.mxu3 %v708_v36  ;;  %768 = vmatpush.msra.mxu2 %v640_v39  ;;  %v650_v36 = vld [vmem:[#allocation19 + $0xf0] sm:$0xff]  ;;  %v715_v39 = vld [vmem:[#allocation19 + $0x2f8] sm:$0xff] }
 0x18d   :  { %807 = vmatpush.msrb.mxu0 %v645_v37  ;;  %827 = vmatpush.msra.mxu1 %v709_v38  ;;  %v714_v37 = vld [vmem:[#allocation19 + $0x2f0] sm:$0xff]  ;;  %v651_v38 = vld [vmem:[#allocation19 + $0xf8] sm:$0xff] }
 0x18e   :  { %788 = vmatpush.msrb.mxu3 %v704_v40  ;;  %769 = vmatpush.msra.mxu2 %v636_v43  ;;  %v646_v40 = vld [vmem:[#allocation19 + $0xd0] sm:$0xff]  ;;  %v711_v43 = vld [vmem:[#allocation19 + $0x2d8] sm:$0xff] }
 0x18f   :  { %808 = vmatpush.msrb.mxu0 %v641_v41  ;;  %828 = vmatpush.msra.mxu1 %v705_v42  ;;  %v710_v41 = vld [vmem:[#allocation19 + $0x2d0] sm:$0xff]  ;;  %v647_v42 = vld [vmem:[#allocation19 + $0xd8] sm:$0xff] }
 0x190   :  { %789 = vmatpush.msrb.mxu3 %v700_v44  ;;  %770 = vmatpush.msra.mxu2 %v632_v47  ;;  %v642_v44 = vld [vmem:[#allocation19 + $0xb0] sm:$0xff]  ;;  %v707_v47 = vld [vmem:[#allocation19 + $0x2b8] sm:$0xff] }
 0x191   :  { %809 = vmatpush.msrb.mxu0 %v637_v45  ;;  %829 = vmatpush.msra.mxu1 %v701_v46  ;;  %v706_v45 = vld [vmem:[#allocation19 + $0x2b0] sm:$0xff]  ;;  %v643_v46 = vld [vmem:[#allocation19 + $0xb8] sm:$0xff] }
 0x192   :  { %790 = vmatpush.msrb.mxu3 %v696_v48  ;;  %v638_v48 = vld [vmem:[#allocation19 + $0x90] sm:$0xff] }
 0x193   :  { %810 = vmatpush.msrb.mxu0 %v633_v50  ;;  %830 = vmatpush.msra.mxu1 %v697_v51  ;;  %v639_v50 = vld [vmem:[#allocation19 + $0x98] sm:$0xff] }
 0x194   :  { %v703_v51 = vld [vmem:[#allocation19 + $0x298] sm:$0xff] }
 0x207   :  { %v491_v53 = vpop.f32.mrf.mxu2 }
 0x208   :  { %v492_v54 = vadd.f32 %v3812_v52, %v491_v53  ;;  %v628_v52 = vld [vmem:[#allocation19 + $0x40] sm:$0xff] }
 0x209   :  { %v692_v53 = vld [vmem:[#allocation19 + $0x240] sm:$0xff]  ;;  %771 = vmatpush.msra.mxu2 %v628_v52  ;;  %v634_v52 = vld [vmem:[#allocation19 + $0x70] sm:$0xff] }
 0x20a   :  { %v495_v55 = vmul.f32 0.01, %v492_v54  ;;  %vm494_vm5 = vcmp.ge.f32.partialorder %v492_v54, 0.0  ;;  %791 = vmatpush.msrb.mxu3 %v692_v53  ;;  %v698_v53 = vld [vmem:[#allocation19 + $0x270] sm:$0xff] }
 0x20b   :  { %772 = vmatpush.msra.mxu2 %v624_v57  ;;  %v694_v57 = vld [vmem:[#allocation19 + $0x250] sm:$0xff] }
 0x20c   :  { %v496_v56 = vsel %vm494_vm5, %v492_v54, %v495_v55  ;;  %v629_v54 = vld [vmem:[#allocation19 + $0x48] sm:$0xff]  ;;  %792 = vmatpush.msrb.mxu3 %v688_v58  ;;  %v631_v58 = vld [vmem:[#allocation19 + $0x58] sm:$0xff] }
 0x20d   :  { %3778 = vmatmul.msk.f32.vlgmr.msra.gmra.mxu3 %vm509_vm6, %v496_v56  ;;  %v693_v55 = vld [vmem:[#allocation19 + $0x248] sm:$0xff]  ;;  %811 = vmatpush.msrb.mxu0 %v629_v54  ;;  %v635_v54 = vld [vmem:[#allocation19 + $0x78] sm:$0xff] }
 0x20e   :  { %831 = vmatpush.msra.mxu1 %v693_v55  ;;  %773 = vmatpush.msra.mxu2 %v620_v62  ;;  %v699_v55 = vld [vmem:[#allocation19 + $0x278] sm:$0xff] }
 0x20f   :  { %812 = vmatpush.msrb.mxu0 %v625_v60  ;;  %793 = vmatpush.msrb.mxu3 %v684_v63  ;;  %v626_v60 = vld [vmem:[#allocation19 + $0x30] sm:$0xff]  ;;  %v627_v62 = vld [vmem:[#allocation19 + $0x38] sm:$0xff] }
 0x210   :  { %832 = vmatpush.msra.mxu1 %v689_v61  ;;  %838 = vmatpush.msrb.mxu2 %v682_v4  ;;  %v690_v61 = vld [vmem:[#allocation19 + $0x230] sm:$0xff]  ;;  %v691_v63 = vld [vmem:[#allocation19 + $0x238] sm:$0xff] }
 0x211   :  { %813 = vmatpush.msrb.mxu0 %v621_v1  ;;  %858 = vmatpush.msra.mxu3 %v746_v5  ;;  %v686_v1 = vld [vmem:[#allocation19 + $0x210] sm:$0xff]  ;;  %v568_v4 = vld [vmem:[#allocation18] sm:$0x3] }
 0x212   :  { %833 = vmatpush.msra.mxu1 %v685_v2  ;;  %839 = vmatpush.msrb.mxu2 %v678_v8  ;;  %v623_v2 = vld [vmem:[#allocation19 + $0x18] sm:$0xff]  ;;  %v570_v5 = vperm.slane %v568_v4, 0 }
 0x213   :  { %859 = vmatpush.msra.mxu3 %v742_v9 }
 0x214   :  { %840 = vmatpush.msrb.mxu2 %v674_v12 }
 0x215   :  { %860 = vmatpush.msra.mxu3 %v738_v13 }
 0x216   :  { %841 = vmatpush.msrb.mxu2 %v670_v16  ;;  %v1050_v16 = vld [vmem:[#allocation22 + $0x3c0] sm:$0xff] }
 0x217   :  { %861 = vmatpush.msra.mxu3 %v734_v17  ;;  %v1434_v17 = vld [vmem:[#allocation22 + $0xfc0] sm:$0xff] }
 0x218   :  { %842 = vmatpush.msrb.mxu2 %v666_v20  ;;  %v1042_v20 = vld [vmem:[#allocation22 + $0x380] sm:$0xff] }
 0x219   :  { %862 = vmatpush.msra.mxu3 %v730_v21  ;;  %v1426_v21 = vld [vmem:[#allocation22 + $0xf80] sm:$0xff] }
 0x21a   :  { %843 = vmatpush.msrb.mxu2 %v662_v24  ;;  %v1034_v24 = vld [vmem:[#allocation22 + $0x340] sm:$0xff] }
 0x21b   :  { %863 = vmatpush.msra.mxu3 %v726_v25  ;;  %v1418_v25 = vld [vmem:[#allocation22 + $0xf40] sm:$0xff] }
 0x21c   :  { %844 = vmatpush.msrb.mxu2 %v658_v28  ;;  %v1026_v28 = vld [vmem:[#allocation22 + $0x300] sm:$0xff] }
 0x21d   :  { %864 = vmatpush.msra.mxu3 %v722_v29  ;;  %v1410_v29 = vld [vmem:[#allocation22 + $0xf00] sm:$0xff] }
 0x21e   :  { %845 = vmatpush.msrb.mxu2 %v654_v32  ;;  %v1018_v32 = vld [vmem:[#allocation22 + $0x2c0] sm:$0xff] }
 0x21f   :  { %865 = vmatpush.msra.mxu3 %v718_v33  ;;  %v1402_v33 = vld [vmem:[#allocation22 + $0xec0] sm:$0xff] }
 0x220   :  { %846 = vmatpush.msrb.mxu2 %v650_v36  ;;  %v1010_v36 = vld [vmem:[#allocation22 + $0x280] sm:$0xff] }
 0x221   :  { %866 = vmatpush.msra.mxu3 %v714_v37  ;;  %v1394_v37 = vld [vmem:[#allocation22 + $0xe80] sm:$0xff] }
 0x222   :  { %847 = vmatpush.msrb.mxu2 %v646_v40  ;;  %v1002_v40 = vld [vmem:[#allocation22 + $0x240] sm:$0xff] }
 0x223   :  { %867 = vmatpush.msra.mxu3 %v710_v41  ;;  %v1386_v41 = vld [vmem:[#allocation22 + $0xe40] sm:$0xff] }
 0x224   :  { %848 = vmatpush.msrb.mxu2 %v642_v44  ;;  %v994_v44 = vld [vmem:[#allocation22 + $0x200] sm:$0xff] }
 0x225   :  { %868 = vmatpush.msra.mxu3 %v706_v45  ;;  %v1378_v45 = vld [vmem:[#allocation22 + $0xe00] sm:$0xff] }
 0x226   :  { %849 = vmatpush.msrb.mxu2 %v638_v48  ;;  %v986_v48 = vld [vmem:[#allocation22 + $0x1c0] sm:$0xff] }
 0x228   :  { %850 = vmatpush.msrb.mxu2 %v634_v52  ;;  %v978_v52 = vld [vmem:[#allocation22 + $0x180] sm:$0xff] }
 0x290   :  { %v530_v56 = vpop.f32.mrf.mxu3 }
 0x291   :  { %v531_v59 = vadd.f32 %v3813_v49, %v530_v56  ;;  %v702_v49 = vld [vmem:[#allocation19 + $0x290] sm:$0xff] }
 0x292   :  { %869 = vmatpush.msra.mxu3 %v702_v49  ;;  %v630_v56 = vld [vmem:[#allocation19 + $0x50] sm:$0xff]  ;;  %v1370_v49 = vld [vmem:[#allocation22 + $0xdc0] sm:$0xff] }
 0x293   :  { %vm533_vm7 = vcmp.ge.f32.partialorder %v531_v59, 0.0  ;;  %v534_v0 = vmul.f32 0.01, %v531_v59  ;;  %851 = vmatpush.msrb.mxu2 %v630_v56  ;;  %v970_v56 = vld [vmem:[#allocation22 + $0x140] sm:$0xff] }
 0x294   :  { %870 = vmatpush.msra.mxu3 %v698_v53  ;;  %v1362_v53 = vld [vmem:[#allocation22 + $0xd80] sm:$0xff] }
 0x295   :  { %v535_v3 = vsel %vm533_vm7, %v531_v59, %v534_v0  ;;  %v695_v59 = vld [vmem:[#allocation19 + $0x258] sm:$0xff]  ;;  %v622_v0 = vld [vmem:[#allocation19 + $0x10] sm:$0xff]  ;;  %852 = vmatpush.msrb.mxu2 %v626_v60  ;;  %v962_v60 = vld [vmem:[#allocation22 + $0x100] sm:$0xff] }
 0x296   :  { %590 = vmatmul.f32.vlgmr.msra.gmra.mxu0 %v535_v3  ;;  %610 = vmatmul.f32.vlgmr.msrb.gmra.mxu1 %v535_v3  ;;  %v687_v3 = vld [vmem:[#allocation19 + $0x218] sm:$0xff] }
 0x297   :  { %878 = vmatpush.msra.mxu0 %v683_v6  ;;  %898 = vmatpush.msrb.mxu1 %v747_v7  ;;  %v571_v6 = vperm.slane %v568_v4, 1  ;;  %v946_v4 = vld [vmem:[#allocation22 + $0x80] sm:$0xff] }
 0x298   :  { %871 = vmatpush.msra.mxu3 %v694_v57  ;;  %853 = vmatpush.msrb.mxu2 %v622_v0  ;;  %v1354_v57 = vld [vmem:[#allocation22 + $0xd40] sm:$0xff] }
 0x299   :  { %879 = vmatpush.msra.mxu0 %v679_v10  ;;  %899 = vmatpush.msrb.mxu1 %v743_v11  ;;  %v954_v0 = vld [vmem:[#allocation22 + $0xc0] sm:$0xff] }
 0x29a   :  { %872 = vmatpush.msra.mxu3 %v690_v61  ;;  %v1346_v61 = vld [vmem:[#allocation22 + $0xd00] sm:$0xff] }
 0x29b   :  { %880 = vmatpush.msra.mxu0 %v675_v14  ;;  %900 = vmatpush.msrb.mxu1 %v739_v15  ;;  %v1178_v15 = vld [vmem:[#allocation22 + $0x7c0] sm:$0xff] }
 0x29c   :  { %873 = vmatpush.msra.mxu3 %v686_v1  ;;  %v1338_v1 = vld [vmem:[#allocation22 + $0xcc0] sm:$0xff] }
 0x29d   :  { %881 = vmatpush.msra.mxu0 %v671_v18  ;;  %901 = vmatpush.msrb.mxu1 %v735_v19  ;;  %v1306_v18 = vld [vmem:[#allocation22 + $0xbc0] sm:$0xff] }
 0x29e   :  { %v1170_v19 = vld [vmem:[#allocation22 + $0x780] sm:$0xff] }
 0x29f   :  { %882 = vmatpush.msra.mxu0 %v667_v22  ;;  %902 = vmatpush.msrb.mxu1 %v731_v23  ;;  %v1298_v22 = vld [vmem:[#allocation22 + $0xb80] sm:$0xff] }
 0x2a0   :  { %v1162_v23 = vld [vmem:[#allocation22 + $0x740] sm:$0xff] }
 0x2a1   :  { %883 = vmatpush.msra.mxu0 %v663_v26  ;;  %903 = vmatpush.msrb.mxu1 %v727_v27  ;;  %v1290_v26 = vld [vmem:[#allocation22 + $0xb40] sm:$0xff] }
 0x2a2   :  { %v1154_v27 = vld [vmem:[#allocation22 + $0x700] sm:$0xff] }
 0x2a3   :  { %884 = vmatpush.msra.mxu0 %v659_v30  ;;  %904 = vmatpush.msrb.mxu1 %v723_v31  ;;  %v1282_v30 = vld [vmem:[#allocation22 + $0xb00] sm:$0xff] }
 0x2a4   :  { %v1146_v31 = vld [vmem:[#allocation22 + $0x6c0] sm:$0xff] }
 0x2a5   :  { %885 = vmatpush.msra.mxu0 %v655_v34  ;;  %905 = vmatpush.msrb.mxu1 %v719_v35  ;;  %v1274_v34 = vld [vmem:[#allocation22 + $0xac0] sm:$0xff] }
 0x2a6   :  { %v1138_v35 = vld [vmem:[#allocation22 + $0x680] sm:$0xff] }
 0x2a7   :  { %886 = vmatpush.msra.mxu0 %v651_v38  ;;  %906 = vmatpush.msrb.mxu1 %v715_v39  ;;  %v1266_v38 = vld [vmem:[#allocation22 + $0xa80] sm:$0xff] }
 0x2a8   :  { %v1130_v39 = vld [vmem:[#allocation22 + $0x640] sm:$0xff] }
 0x2a9   :  { %887 = vmatpush.msra.mxu0 %v647_v42  ;;  %907 = vmatpush.msrb.mxu1 %v711_v43  ;;  %v1258_v42 = vld [vmem:[#allocation22 + $0xa40] sm:$0xff] }
 0x2aa   :  { %v1122_v43 = vld [vmem:[#allocation22 + $0x600] sm:$0xff] }
 0x2ab   :  { %888 = vmatpush.msra.mxu0 %v643_v46  ;;  %908 = vmatpush.msrb.mxu1 %v707_v47  ;;  %v1250_v46 = vld [vmem:[#allocation22 + $0xa00] sm:$0xff] }
 0x2ac   :  { %v1114_v47 = vld [vmem:[#allocation22 + $0x5c0] sm:$0xff] }
 0x2ad   :  { %889 = vmatpush.msra.mxu0 %v639_v50  ;;  %909 = vmatpush.msrb.mxu1 %v703_v51  ;;  %v1242_v50 = vld [vmem:[#allocation22 + $0x9c0] sm:$0xff] }
 0x2ae   :  { %v1106_v51 = vld [vmem:[#allocation22 + $0x580] sm:$0xff] }
 0x2af   :  { %890 = vmatpush.msra.mxu0 %v635_v54  ;;  %910 = vmatpush.msrb.mxu1 %v699_v55  ;;  %v1234_v54 = vld [vmem:[#allocation22 + $0x980] sm:$0xff] }
 0x2b0   :  { %v1098_v55 = vld [vmem:[#allocation22 + $0x540] sm:$0xff] }
 0x2b1   :  { %891 = vmatpush.msra.mxu0 %v631_v58  ;;  %911 = vmatpush.msrb.mxu1 %v695_v59  ;;  %v1226_v58 = vld [vmem:[#allocation22 + $0x940] sm:$0xff] }
 0x2b2   :  { %v1090_v59 = vld [vmem:[#allocation22 + $0x500] sm:$0xff] }
 0x2b3   :  { %892 = vmatpush.msra.mxu0 %v627_v62  ;;  %912 = vmatpush.msrb.mxu1 %v691_v63  ;;  %v1218_v62 = vld [vmem:[#allocation22 + $0x900] sm:$0xff] }
 0x2b4   :  { %v1082_v63 = vld [vmem:[#allocation22 + $0x4c0] sm:$0xff] }
 0x2b5   :  { %893 = vmatpush.msra.mxu0 %v623_v2  ;;  %913 = vmatpush.msrb.mxu1 %v687_v3  ;;  %v1210_v2 = vld [vmem:[#allocation22 + $0x8c0] sm:$0xff] }
 0x2b6   :  { %v1074_v3 = vld [vmem:[#allocation22 + $0x480] sm:$0xff] }
 0x313   :  { %v591_v7 = vpop.f32.mrf.mxu0  ;;  %v611_v8 = vpop.f32.mrf.mxu1 }
 0x314   :  { %v592_v9 = vadd.f32 %v591_v7, %v570_v5  ;;  %v612_v10 = vadd.f32 %v611_v8, %v571_v6  ;;  %v1330_v5 = vld [vmem:[#allocation22 + $0xc80] sm:$0xff] }
 0x315   :  { %v1202_v6 = vld [vmem:[#allocation22 + $0x880] sm:$0xff] }
 0x316   :  { %vm614_vm8 = vcmp.ge.f32.partialorder %v592_v9, 0.0  ;;  %v616_v11 = vmul.f32 0.01, %v592_v9  ;;  %vm615_vm9 = vcmp.ge.f32.partialorder %v612_v10, 0.0  ;;  %v617_v12 = vmul.f32 0.01, %v612_v10 }
 0x317   :  { %v1066_v7 = vld [vmem:[#allocation22 + $0x440] sm:$0xff] }
 0x318   :  { %v618_v13 = vsel %vm614_vm8, %v592_v9, %v616_v11  ;;  %v619_v14 = vsel %vm615_vm9, %v612_v10, %v617_v12  ;;  %v938_v8 = vld [vmem:[#allocation22 + $0x40] sm:$0xff] }
 0x319   :  { %774 = vmatmul.f32.vlgmr.msra.gmra.mxu2 %v618_v13  ;;  %794 = vmatmul.f32.vlgmr.msrb.gmra.mxu3 %v619_v14  ;;  %v1322_v9 = vld [vmem:[#allocation22 + $0xc40] sm:$0xff] }
 0x31a   :  { %814 = vmatmul.f32.vlgmr.msrb.gmra.mxu0 %v618_v13  ;;  %834 = vmatmul.f32.vlgmr.msra.gmra.mxu1 %v619_v14  ;;  %v1194_v10 = vld [vmem:[#allocation22 + $0x840] sm:$0xff] }
 0x31b   :  { %1480 = vmatpush.msrb.mxu3 %v1178_v15  ;;  %1460 = vmatpush.msra.mxu2 %v1050_v16  ;;  %v1058_v11 = vld [vmem:[#allocation22 + $0x400] sm:$0xff] }
 0x31c   :  { %1520 = vmatpush.msra.mxu1 %v1434_v17  ;;  %1500 = vmatpush.msrb.mxu0 %v1306_v18  ;;  %v930_v12 = vld [vmem:[#allocation22] sm:$0xff]  ;;  %v1171_v17 = vld [vmem:[#allocation22 + $0x788] sm:$0xff] }
 0x31d   :  { %1481 = vmatpush.msrb.mxu3 %v1170_v19  ;;  %1461 = vmatpush.msra.mxu2 %v1042_v20  ;;  %v1314_v15 = vld [vmem:[#allocation22 + $0xc00] sm:$0xff]  ;;  %v1043_v18 = vld [vmem:[#allocation22 + $0x388] sm:$0xff] }
 0x31e   :  { %1521 = vmatpush.msra.mxu1 %v1426_v21  ;;  %1501 = vmatpush.msrb.mxu0 %v1298_v22  ;;  %v1186_v16 = vld [vmem:[#allocation22 + $0x800] sm:$0xff]  ;;  %v1435_v19 = vld [vmem:[#allocation22 + $0xfc8] sm:$0xff] }
 0x31f   :  { %1482 = vmatpush.msrb.mxu3 %v1162_v23  ;;  %1462 = vmatpush.msra.mxu2 %v1034_v24  ;;  %v1307_v20 = vld [vmem:[#allocation22 + $0xbc8] sm:$0xff] }
 0x320   :  { %1522 = vmatpush.msra.mxu1 %v1418_v25  ;;  %1502 = vmatpush.msrb.mxu0 %v1290_v26  ;;  %v1163_v21 = vld [vmem:[#allocation22 + $0x748] sm:$0xff] }
 0x321   :  { %854 = vmatmul.f32.vlgmr.msrb.gmra.mxu2 %v618_v13  ;;  %874 = vmatmul.f32.vlgmr.msra.gmra.mxu3 %v619_v14  ;;  %v1035_v22 = vld [vmem:[#allocation22 + $0x348] sm:$0xff] }
 0x322   :  { %894 = vmatmul.f32.vlgmr.msra.gmra.mxu0 %v618_v13  ;;  %914 = vmatmul.f32.vlgmr.msrb.gmra.mxu1 %v619_v14  ;;  %v1179_v13 = vld [vmem:[#allocation22 + $0x7c8] sm:$0xff] }
 0x323   :  { %1483 = vmatpush.msrb.mxu3 %v1154_v27  ;;  %1463 = vmatpush.msra.mxu2 %v1026_v28  ;;  %v1051_v14 = vld [vmem:[#allocation22 + $0x3c8] sm:$0xff] }
 0x324   :  { %1523 = vmatpush.msra.mxu1 %v1410_v29  ;;  %1503 = vmatpush.msrb.mxu0 %v1282_v30  ;;  %v1427_v23 = vld [vmem:[#allocation22 + $0xf88] sm:$0xff] }
 0x325   :  { %1484 = vmatpush.msrb.mxu3 %v1146_v31  ;;  %1464 = vmatpush.msra.mxu2 %v1018_v32  ;;  %v1299_v24 = vld [vmem:[#allocation22 + $0xb88] sm:$0xff] }
 0x326   :  { %1524 = vmatpush.msra.mxu1 %v1402_v33  ;;  %1504 = vmatpush.msrb.mxu0 %v1274_v34  ;;  %v1155_v25 = vld [vmem:[#allocation22 + $0x708] sm:$0xff] }
 0x327   :  { %1485 = vmatpush.msrb.mxu3 %v1138_v35  ;;  %1465 = vmatpush.msra.mxu2 %v1010_v36  ;;  %v1027_v26 = vld [vmem:[#allocation22 + $0x308] sm:$0xff] }
 0x328   :  { %1525 = vmatpush.msra.mxu1 %v1394_v37  ;;  %1505 = vmatpush.msrb.mxu0 %v1266_v38  ;;  %v1419_v27 = vld [vmem:[#allocation22 + $0xf48] sm:$0xff] }
 0x329   :  { %1486 = vmatpush.msrb.mxu3 %v1130_v39  ;;  %1466 = vmatpush.msra.mxu2 %v1002_v40  ;;  %v1291_v28 = vld [vmem:[#allocation22 + $0xb48] sm:$0xff] }
 0x32a   :  { %1526 = vmatpush.msra.mxu1 %v1386_v41  ;;  %1506 = vmatpush.msrb.mxu0 %v1258_v42  ;;  %v1147_v29 = vld [vmem:[#allocation22 + $0x6c8] sm:$0xff] }
 0x32b   :  { %1487 = vmatpush.msrb.mxu3 %v1122_v43  ;;  %1467 = vmatpush.msra.mxu2 %v994_v44  ;;  %v1019_v30 = vld [vmem:[#allocation22 + $0x2c8] sm:$0xff] }
 0x32c   :  { %1527 = vmatpush.msra.mxu1 %v1378_v45  ;;  %1507 = vmatpush.msrb.mxu0 %v1250_v46  ;;  %v1411_v31 = vld [vmem:[#allocation22 + $0xf08] sm:$0xff] }
 0x32d   :  { %1488 = vmatpush.msrb.mxu3 %v1114_v47  ;;  %1468 = vmatpush.msra.mxu2 %v986_v48  ;;  %v1283_v32 = vld [vmem:[#allocation22 + $0xb08] sm:$0xff] }
 0x32e   :  { %1528 = vmatpush.msra.mxu1 %v1370_v49  ;;  %1508 = vmatpush.msrb.mxu0 %v1242_v50  ;;  %v1139_v33 = vld [vmem:[#allocation22 + $0x688] sm:$0xff] }
 0x32f   :  { %1489 = vmatpush.msrb.mxu3 %v1106_v51  ;;  %1469 = vmatpush.msra.mxu2 %v978_v52  ;;  %v1011_v34 = vld [vmem:[#allocation22 + $0x288] sm:$0xff] }
 0x330   :  { %1529 = vmatpush.msra.mxu1 %v1362_v53  ;;  %1509 = vmatpush.msrb.mxu0 %v1234_v54  ;;  %v1403_v35 = vld [vmem:[#allocation22 + $0xec8] sm:$0xff] }
 0x331   :  { %1490 = vmatpush.msrb.mxu3 %v1098_v55  ;;  %1470 = vmatpush.msra.mxu2 %v970_v56  ;;  %v1275_v36 = vld [vmem:[#allocation22 + $0xac8] sm:$0xff] }
 0x332   :  { %1530 = vmatpush.msra.mxu1 %v1354_v57  ;;  %1510 = vmatpush.msrb.mxu0 %v1226_v58  ;;  %v1131_v37 = vld [vmem:[#allocation22 + $0x648] sm:$0xff] }
 0x333   :  { %1491 = vmatpush.msrb.mxu3 %v1090_v59  ;;  %1471 = vmatpush.msra.mxu2 %v962_v60  ;;  %v1003_v38 = vld [vmem:[#allocation22 + $0x248] sm:$0xff] }
 0x334   :  { %1531 = vmatpush.msra.mxu1 %v1346_v61  ;;  %1511 = vmatpush.msrb.mxu0 %v1218_v62  ;;  %v1395_v39 = vld [vmem:[#allocation22 + $0xe88] sm:$0xff] }
 0x335   :  { %1492 = vmatpush.msrb.mxu3 %v1082_v63  ;;  %1472 = vmatpush.msra.mxu2 %v954_v0  ;;  %v1123_v40 = vld [vmem:[#allocation22 + $0x608] sm:$0xff] }
 0x336   :  { %1532 = vmatpush.msra.mxu1 %v1338_v1  ;;  %1512 = vmatpush.msrb.mxu0 %v1210_v2  ;;  %v995_v41 = vld [vmem:[#allocation22 + $0x208] sm:$0xff] }
 0x337   :  { %1493 = vmatpush.msrb.mxu3 %v1074_v3  ;;  %1473 = vmatpush.msra.mxu2 %v946_v4  ;;  %v1387_v42 = vld [vmem:[#allocation22 + $0xe48] sm:$0xff] }
 0x338   :  { %1533 = vmatpush.msra.mxu1 %v1330_v5  ;;  %1513 = vmatpush.msrb.mxu0 %v1202_v6  ;;  %v1115_v43 = vld [vmem:[#allocation22 + $0x5c8] sm:$0xff] }
 0x339   :  { %1494 = vmatpush.msrb.mxu3 %v1066_v7  ;;  %1474 = vmatpush.msra.mxu2 %v938_v8  ;;  %v987_v44 = vld [vmem:[#allocation22 + $0x1c8] sm:$0xff] }
 0x33a   :  { %1534 = vmatpush.msra.mxu1 %v1322_v9  ;;  %1514 = vmatpush.msrb.mxu0 %v1194_v10  ;;  %v1379_v45 = vld [vmem:[#allocation22 + $0xe08] sm:$0xff] }
 0x33b   :  { %1495 = vmatpush.msrb.mxu3 %v1058_v11  ;;  %1475 = vmatpush.msra.mxu2 %v930_v12  ;;  %v1107_v46 = vld [vmem:[#allocation22 + $0x588] sm:$0xff] }
 0x33c   :  { %1535 = vmatpush.msra.mxu1 %v1314_v15  ;;  %1515 = vmatpush.msrb.mxu0 %v1186_v16  ;;  %v1099_v47 = vld [vmem:[#allocation22 + $0x548] sm:$0xff]  ;;  %v748_v15 = vld [vmem:[#allocation21] sm:$0xf] }
 0x33d   :  { %1560 = vmatpush.msra.mxu3 %v1179_v13  ;;  %1540 = vmatpush.msrb.mxu2 %v1051_v14  ;;  %v1091_v48 = vld [vmem:[#allocation22 + $0x508] sm:$0xff]  ;;  %v751_v16 = vperm.slane %v748_v15, 1 }
 0x33e   :  { %1600 = vmatpush.msrb.mxu1 %v1435_v19  ;;  %1580 = vmatpush.msra.mxu0 %v1307_v20  ;;  %v979_v49 = vld [vmem:[#allocation22 + $0x188] sm:$0xff]  ;;  %v750_v20 = vperm.slane %v748_v15, 0 }
 0x33f   :  { %1561 = vmatpush.msra.mxu3 %v1171_v17  ;;  %1541 = vmatpush.msrb.mxu2 %v1043_v18  ;;  %v1083_v50 = vld [vmem:[#allocation22 + $0x4c8] sm:$0xff] }
 0x340   :  { %1601 = vmatpush.msrb.mxu1 %v1427_v23  ;;  %1581 = vmatpush.msra.mxu0 %v1299_v24  ;;  %v1267_v51 = vld [vmem:[#allocation22 + $0xa88] sm:$0xff] }
 0x341   :  { %1562 = vmatpush.msra.mxu3 %v1163_v21  ;;  %1542 = vmatpush.msrb.mxu2 %v1035_v22  ;;  %v1371_v52 = vld [vmem:[#allocation22 + $0xdc8] sm:$0xff] }
 0x342   :  { %1602 = vmatpush.msrb.mxu1 %v1419_v27  ;;  %1582 = vmatpush.msra.mxu0 %v1291_v28  ;;  %v971_v53 = vld [vmem:[#allocation22 + $0x148] sm:$0xff]  ;;  %v1180_v27 = vld [vmem:[#allocation22 + $0x7d0] sm:$0xff] }
 0x343   :  { %1563 = vmatpush.msra.mxu3 %v1155_v25  ;;  %1543 = vmatpush.msrb.mxu2 %v1027_v26  ;;  %v1075_v54 = vld [vmem:[#allocation22 + $0x488] sm:$0xff]  ;;  %v753_v25 = vperm.slane %v748_v15, 3 }
 0x344   :  { %1603 = vmatpush.msrb.mxu1 %v1411_v31  ;;  %1583 = vmatpush.msra.mxu0 %v1283_v32  ;;  %v1259_v55 = vld [vmem:[#allocation22 + $0xa48] sm:$0xff]  ;;  %v1172_v31 = vld [vmem:[#allocation22 + $0x790] sm:$0xff] }
 0x345   :  { %1564 = vmatpush.msra.mxu3 %v1147_v29  ;;  %1544 = vmatpush.msrb.mxu2 %v1019_v30  ;;  %v1363_v56 = vld [vmem:[#allocation22 + $0xd88] sm:$0xff] }
 0x346   :  { %1604 = vmatpush.msrb.mxu1 %v1403_v35  ;;  %1584 = vmatpush.msra.mxu0 %v1275_v36  ;;  %v963_v57 = vld [vmem:[#allocation22 + $0x108] sm:$0xff]  ;;  %v1164_v35 = vld [vmem:[#allocation22 + $0x750] sm:$0xff]  ;;  %v752_v36 = vperm.slane %v748_v15, 2 }
 0x347   :  { %1565 = vmatpush.msra.mxu3 %v1139_v33  ;;  %1545 = vmatpush.msrb.mxu2 %v1011_v34  ;;  %v1067_v58 = vld [vmem:[#allocation22 + $0x448] sm:$0xff]  ;;  %v1084_v15 = vld [vmem:[#allocation22 + $0x4d0] sm:$0xff] }
 0x348   :  { %1605 = vmatpush.msrb.mxu1 %v1395_v39  ;;  %1585 = vmatpush.msra.mxu0 %v1267_v51  ;;  %v1251_v59 = vld [vmem:[#allocation22 + $0xa08] sm:$0xff]  ;;  %v1140_v51 = vld [vmem:[#allocation22 + $0x690] sm:$0xff] }
 0x349   :  { %1566 = vmatpush.msra.mxu3 %v1131_v37  ;;  %1546 = vmatpush.msrb.mxu2 %v1003_v38  ;;  %v1355_v60 = vld [vmem:[#allocation22 + $0xd48] sm:$0xff]  ;;  %v1052_v38 = vld [vmem:[#allocation22 + $0x3d0] sm:$0xff] }
 0x34a   :  { %1606 = vmatpush.msrb.mxu1 %v1387_v42  ;;  %1586 = vmatpush.msra.mxu0 %v1259_v55  ;;  %v955_v61 = vld [vmem:[#allocation22 + $0xc8] sm:$0xff]  ;;  %v1132_v55 = vld [vmem:[#allocation22 + $0x650] sm:$0xff] }
 0x34b   :  { %1567 = vmatpush.msra.mxu3 %v1123_v40  ;;  %1547 = vmatpush.msrb.mxu2 %v995_v41  ;;  %v1059_v62 = vld [vmem:[#allocation22 + $0x408] sm:$0xff]  ;;  %v1156_v40 = vld [vmem:[#allocation22 + $0x710] sm:$0xff] }
 0x34c   :  { %1607 = vmatpush.msrb.mxu1 %v1379_v45  ;;  %1587 = vmatpush.msra.mxu0 %v1251_v59  ;;  %v1243_v63 = vld [vmem:[#allocation22 + $0x9c8] sm:$0xff]  ;;  %v1148_v45 = vld [vmem:[#allocation22 + $0x6d0] sm:$0xff] }
 0x34d   :  { %1568 = vmatpush.msra.mxu3 %v1115_v43  ;;  %1548 = vmatpush.msrb.mxu2 %v987_v44  ;;  %v1347_v0 = vld [vmem:[#allocation22 + $0xd08] sm:$0xff]  ;;  %v1044_v44 = vld [vmem:[#allocation22 + $0x390] sm:$0xff] }
 0x34e   :  { %1608 = vmatpush.msrb.mxu1 %v1371_v52  ;;  %1588 = vmatpush.msra.mxu0 %v1243_v63  ;;  %v947_v1 = vld [vmem:[#allocation22 + $0x88] sm:$0xff]  ;;  %v1428_v52 = vld [vmem:[#allocation22 + $0xf90] sm:$0xff] }
 0x34f   :  { %1569 = vmatpush.msra.mxu3 %v1107_v46  ;;  %1549 = vmatpush.msrb.mxu2 %v979_v49  ;;  %v1235_v2 = vld [vmem:[#allocation22 + $0x988] sm:$0xff]  ;;  %v1020_v59 = vld [vmem:[#allocation22 + $0x2d0] sm:$0xff] }
 0x350   :  { %1609 = vmatpush.msrb.mxu1 %v1363_v56  ;;  %v1339_v3 = vld [vmem:[#allocation22 + $0xcc8] sm:$0xff]  ;;  %1589 = vmatpush.msra.mxu0 %v1235_v2  ;;  %v1420_v56 = vld [vmem:[#allocation22 + $0xf50] sm:$0xff] }
 0x351   :  { %1570 = vmatpush.msra.mxu3 %v1099_v47  ;;  %1550 = vmatpush.msrb.mxu2 %v971_v53  ;;  %v939_v4 = vld [vmem:[#allocation22 + $0x48] sm:$0xff]  ;;  %v1012_v63 = vld [vmem:[#allocation22 + $0x290] sm:$0xff] }
 0x352   :  { %1610 = vmatpush.msrb.mxu1 %v1355_v60  ;;  %v1227_v5 = vld [vmem:[#allocation22 + $0x948] sm:$0xff]  ;;  %v1308_v60 = vld [vmem:[#allocation22 + $0xbd0] sm:$0xff] }
 0x353   :  { %1571 = vmatpush.msra.mxu3 %v1091_v48  ;;  %1551 = vmatpush.msrb.mxu2 %v963_v57  ;;  %v1331_v6 = vld [vmem:[#allocation22 + $0xc88] sm:$0xff]  ;;  %v1436_v48 = vld [vmem:[#allocation22 + $0xfd0] sm:$0xff] }
 0x354   :  { %1611 = vmatpush.msrb.mxu1 %v1347_v0  ;;  %1590 = vmatpush.msra.mxu0 %v1227_v5  ;;  %v931_v7 = vld [vmem:[#allocation22 + $0x8] sm:$0xff]  ;;  %v1300_v0 = vld [vmem:[#allocation22 + $0xb90] sm:$0xff] }
 0x355   :  { %1572 = vmatpush.msra.mxu3 %v1083_v50  ;;  %1552 = vmatpush.msrb.mxu2 %v955_v61  ;;  %v1219_v8 = vld [vmem:[#allocation22 + $0x908] sm:$0xff]  ;;  %v1036_v50 = vld [vmem:[#allocation22 + $0x350] sm:$0xff] }
 0x356   :  { %1612 = vmatpush.msrb.mxu1 %v1339_v3  ;;  %v1323_v9 = vld [vmem:[#allocation22 + $0xc48] sm:$0xff]  ;;  %1591 = vmatpush.msra.mxu0 %v1219_v8  ;;  %v1412_v61 = vld [vmem:[#allocation22 + $0xf10] sm:$0xff] }
 0x357   :  { %1573 = vmatpush.msra.mxu3 %v1075_v54  ;;  %1553 = vmatpush.msrb.mxu2 %v947_v1  ;;  %v1211_v10 = vld [vmem:[#allocation22 + $0x8c8] sm:$0xff]  ;;  %v1028_v54 = vld [vmem:[#allocation22 + $0x310] sm:$0xff] }
 0x358   :  { %1613 = vmatpush.msrb.mxu1 %v1331_v6  ;;  %v1315_v11 = vld [vmem:[#allocation22 + $0xc08] sm:$0xff]  ;;  %1592 = vmatpush.msra.mxu0 %v1211_v10  ;;  %v1404_v1 = vld [vmem:[#allocation22 + $0xed0] sm:$0xff] }
 0x359   :  { %1574 = vmatpush.msra.mxu3 %v1067_v58  ;;  %1554 = vmatpush.msrb.mxu2 %v939_v4  ;;  %v1203_v12 = vld [vmem:[#allocation22 + $0x888] sm:$0xff]  ;;  %v1124_v58 = vld [vmem:[#allocation22 + $0x610] sm:$0xff] }
 0x35a   :  { %1614 = vmatpush.msrb.mxu1 %v1323_v9  ;;  %1593 = vmatpush.msra.mxu0 %v1203_v12  ;;  %v1195_v13 = vld [vmem:[#allocation22 + $0x848] sm:$0xff]  ;;  %v1004_v2 = vld [vmem:[#allocation22 + $0x250] sm:$0xff] }
 0x35b   :  { %1575 = vmatpush.msra.mxu3 %v1059_v62  ;;  %1555 = vmatpush.msrb.mxu2 %v931_v7  ;;  %v1187_v14 = vld [vmem:[#allocation22 + $0x808] sm:$0xff]  ;;  %v1116_v62 = vld [vmem:[#allocation22 + $0x5d0] sm:$0xff] }
 0x35c   :  { %1615 = vmatpush.msrb.mxu1 %v1315_v11  ;;  %1594 = vmatpush.msra.mxu0 %v1195_v13  ;;  %v1108_v3 = vld [vmem:[#allocation22 + $0x590] sm:$0xff] }
 0x35d   :  { %v1292_v4 = vld [vmem:[#allocation22 + $0xb50] sm:$0xff] }
 0x35e   :  { %1595 = vmatpush.msra.mxu0 %v1187_v14  ;;  %v1396_v5 = vld [vmem:[#allocation22 + $0xe90] sm:$0xff] }
 0x35f   :  { %v996_v6 = vld [vmem:[#allocation22 + $0x210] sm:$0xff] }
 0x360   :  { %v1100_v7 = vld [vmem:[#allocation22 + $0x550] sm:$0xff] }
 0x361   :  { %v1284_v8 = vld [vmem:[#allocation22 + $0xb10] sm:$0xff] }
 0x362   :  { %v1388_v9 = vld [vmem:[#allocation22 + $0xe50] sm:$0xff] }
 0x363   :  { %v988_v10 = vld [vmem:[#allocation22 + $0x1d0] sm:$0xff] }
 0x364   :  { %v1092_v11 = vld [vmem:[#allocation22 + $0x510] sm:$0xff] }
 0x365   :  { %v1276_v12 = vld [vmem:[#allocation22 + $0xad0] sm:$0xff] }
 0x366   :  { %v1380_v13 = vld [vmem:[#allocation22 + $0xe10] sm:$0xff] }
 0x367   :  { %v980_v14 = vld [vmem:[#allocation22 + $0x190] sm:$0xff] }
 0x397   :  { %v815_v17 = vpop.f32.mrf.mxu0  ;;  %v835_v18 = vpop.f32.mrf.mxu1 }
 0x398   :  { %v816_v19 = vadd.f32 %v815_v17, %v751_v16  ;;  %v1268_v16 = vld [vmem:[#allocation22 + $0xa90] sm:$0xff] }
 0x399   :  { %v1372_v17 = vld [vmem:[#allocation22 + $0xdd0] sm:$0xff] }
 0x39a   :  { %v836_v21 = vadd.f32 %v835_v18, %v816_v19  ;;  %v972_v18 = vld [vmem:[#allocation22 + $0x150] sm:$0xff] }
 0x39b   :  { %v1076_v19 = vld [vmem:[#allocation22 + $0x490] sm:$0xff] }
 0x39c   :  { %vm919_vm10 = vcmp.ge.f32.partialorder %v836_v21, 0.0  ;;  %v923_v22 = vmul.f32 0.01, %v836_v21  ;;  %v775_v23 = vpop.f32.mrf.mxu2  ;;  %v795_v24 = vpop.f32.mrf.mxu3 }
 0x39d   :  { %v776_v26 = vadd.f32 %v775_v23, %v750_v20  ;;  %v1260_v20 = vld [vmem:[#allocation22 + $0xa50] sm:$0xff] }
 0x39e   :  { %v4615_v28 = vsel %vm919_vm10, %v836_v21, %v923_v22  ;;  %v1364_v21 = vld [vmem:[#allocation22 + $0xd90] sm:$0xff] }
 0x39f   :  { %v796_v29 = vadd.f32 %v795_v24, %v776_v26  ;;  %v895_v30 = vpop.f32.mrf.mxu0  ;;  %1496 = vmatmul.f32.vlgmr.msrb.gmra.mxu3 %v4615_v28  ;;  %v915_v34 = vpop.f32.mrf.mxu1  ;;  %v964_v22 = vld [vmem:[#allocation22 + $0x110] sm:$0xff] }
 0x3a0   :  { %v896_v32 = vadd.f32 %v895_v30, %v753_v25  ;;  %1640 = vmatpush.msrb.mxu3 %v1180_v27  ;;  %v1068_v23 = vld [vmem:[#allocation22 + $0x450] sm:$0xff] }
 0x3a1   :  { %vm918_vm11 = vcmp.ge.f32.partialorder %v796_v29, 0.0  ;;  %v922_v33 = vmul.f32 0.01, %v796_v29  ;;  %v1252_v24 = vld [vmem:[#allocation22 + $0xa10] sm:$0xff] }
 0x3a2   :  { %v916_v37 = vadd.f32 %v915_v34, %v896_v32  ;;  %1641 = vmatpush.msrb.mxu3 %v1172_v31  ;;  %v1356_v25 = vld [vmem:[#allocation22 + $0xd50] sm:$0xff]  ;;  %v1181_v31 = vld [vmem:[#allocation22 + $0x7d8] sm:$0xff] }
 0x3a3   :  { %v4618_v39 = vsel %vm918_vm11, %v796_v29, %v922_v33  ;;  %v956_v26 = vld [vmem:[#allocation22 + $0xd0] sm:$0xff] }
 0x3a4   :  { %vm921_vm12 = vcmp.ge.f32.partialorder %v916_v37, 0.0  ;;  %v925_v41 = vmul.f32 0.01, %v916_v37  ;;  %1642 = vmatpush.msrb.mxu3 %v1164_v35  ;;  %v855_v42 = vpop.f32.mrf.mxu2  ;;  %1476 = vmatmul.f32.vlgmr.msra.gmra.mxu2 %v4618_v39  ;;  %v875_v47 = vpop.f32.mrf.mxu3  ;;  %v1060_v27 = vld [vmem:[#allocation22 + $0x410] sm:$0xff]  ;;  %v1173_v35 = vld [vmem:[#allocation22 + $0x798] sm:$0xff] }
 0x3a5   :  { %v856_v43 = vadd.f32 %v855_v42, %v752_v36  ;;  %1620 = vmatpush.msra.mxu2 %v1052_v38  ;;  %v1244_v29 = vld [vmem:[#allocation22 + $0x9d0] sm:$0xff] }
 0x3a6   :  { %v4621_v46 = vsel %vm921_vm12, %v916_v37, %v925_v41  ;;  %1643 = vmatpush.msrb.mxu3 %v1156_v40  ;;  %v1348_v30 = vld [vmem:[#allocation22 + $0xd10] sm:$0xff]  ;;  %v1165_v40 = vld [vmem:[#allocation22 + $0x758] sm:$0xff] }
 0x3a7   :  { %v876_v49 = vadd.f32 %v875_v47, %v856_v43  ;;  %1536 = vmatmul.f32.vlgmr.msra.gmra.mxu1 %v4621_v46  ;;  %1576 = vmatmul.f32.vlgmr.msra.gmra.mxu3 %v4615_v28  ;;  %v948_v32 = vld [vmem:[#allocation22 + $0x90] sm:$0xff] }
 0x3a8   :  { %1621 = vmatpush.msra.mxu2 %v1044_v44  ;;  %1644 = vmatpush.msrb.mxu3 %v1148_v45  ;;  %v1236_v33 = vld [vmem:[#allocation22 + $0x990] sm:$0xff]  ;;  %v1157_v44 = vld [vmem:[#allocation22 + $0x718] sm:$0xff] }
 0x3a9   :  { %vm920_vm13 = vcmp.ge.f32.partialorder %v876_v49, 0.0  ;;  %v924_v53 = vmul.f32 0.01, %v876_v49  ;;  %1680 = vmatpush.msra.mxu1 %v1436_v48  ;;  %v1340_v34 = vld [vmem:[#allocation22 + $0xcd0] sm:$0xff]  ;;  %v1053_v45 = vld [vmem:[#allocation22 + $0x3d8] sm:$0xff] }
 0x3aa   :  { %1622 = vmatpush.msra.mxu2 %v1036_v50  ;;  %1645 = vmatpush.msrb.mxu3 %v1140_v51  ;;  %v940_v36 = vld [vmem:[#allocation22 + $0x50] sm:$0xff]  ;;  %v1045_v50 = vld [vmem:[#allocation22 + $0x398] sm:$0xff] }
 0x3ab   :  { %v4625_v57 = vsel %vm920_vm13, %v876_v49, %v924_v53  ;;  %1681 = vmatpush.msra.mxu1 %v1428_v52  ;;  %v1228_v37 = vld [vmem:[#allocation22 + $0x950] sm:$0xff]  ;;  %v1149_v49 = vld [vmem:[#allocation22 + $0x6d8] sm:$0xff] }
 0x3ac   :  { %1623 = vmatpush.msra.mxu2 %v1028_v54  ;;  %1646 = vmatpush.msrb.mxu3 %v1132_v55  ;;  %v1332_v38 = vld [vmem:[#allocation22 + $0xc90] sm:$0xff]  ;;  %v1437_v51 = vld [vmem:[#allocation22 + $0xfd8] sm:$0xff] }
 0x3ad   :  { %1682 = vmatpush.msra.mxu1 %v1420_v56  ;;  %1516 = vmatmul.f32.vlgmr.msrb.gmra.mxu0 %v4625_v57  ;;  %v932_v41 = vld [vmem:[#allocation22 + $0x10] sm:$0xff]  ;;  %v1037_v53 = vld [vmem:[#allocation22 + $0x358] sm:$0xff] }
 0x3ae   :  { %1556 = vmatmul.f32.vlgmr.msrb.gmra.mxu2 %v4618_v39  ;;  %1647 = vmatpush.msrb.mxu3 %v1124_v58  ;;  %v1220_v42 = vld [vmem:[#allocation22 + $0x910] sm:$0xff]  ;;  %v1141_v54 = vld [vmem:[#allocation22 + $0x698] sm:$0xff] }
 0x3af   :  { %1624 = vmatpush.msra.mxu2 %v1020_v59  ;;  %1660 = vmatpush.msrb.mxu0 %v1308_v60  ;;  %v1324_v43 = vld [vmem:[#allocation22 + $0xc50] sm:$0xff]  ;;  %v1429_v55 = vld [vmem:[#allocation22 + $0xf98] sm:$0xff] }
 0x3b0   :  { %1683 = vmatpush.msra.mxu1 %v1412_v61  ;;  %1648 = vmatpush.msrb.mxu3 %v1116_v62  ;;  %v1212_v47 = vld [vmem:[#allocation22 + $0x8d0] sm:$0xff]  ;;  %v1029_v58 = vld [vmem:[#allocation22 + $0x318] sm:$0xff] }
 0x3b1   :  { %1616 = vmatmul.f32.vlgmr.msrb.gmra.mxu1 %v4621_v46  ;;  %1625 = vmatpush.msra.mxu2 %v1012_v63  ;;  %v1316_v48 = vld [vmem:[#allocation22 + $0xc10] sm:$0xff]  ;;  %v1133_v59 = vld [vmem:[#allocation22 + $0x658] sm:$0xff] }
 0x3b2   :  { %1661 = vmatpush.msrb.mxu0 %v1300_v0  ;;  %1684 = vmatpush.msra.mxu1 %v1404_v1  ;;  %v1204_v52 = vld [vmem:[#allocation22 + $0x890] sm:$0xff]  ;;  %v1421_v60 = vld [vmem:[#allocation22 + $0xf58] sm:$0xff] }
 0x3b3   :  { %1626 = vmatpush.msra.mxu2 %v1004_v2  ;;  %1649 = vmatpush.msrb.mxu3 %v1108_v3  ;;  %v1196_v56 = vld [vmem:[#allocation22 + $0x850] sm:$0xff]  ;;  %v1021_v62 = vld [vmem:[#allocation22 + $0x2d8] sm:$0xff] }
 0x3b4   :  { %1662 = vmatpush.msrb.mxu0 %v1292_v4  ;;  %1685 = vmatpush.msra.mxu1 %v1396_v5  ;;  %v1188_v61 = vld [vmem:[#allocation22 + $0x810] sm:$0xff]  ;;  %v1125_v63 = vld [vmem:[#allocation22 + $0x618] sm:$0xff] }
 0x3b5   :  { %1627 = vmatpush.msra.mxu2 %v996_v6  ;;  %1650 = vmatpush.msrb.mxu3 %v1100_v7  ;;  %v1309_v0 = vld [vmem:[#allocation22 + $0xbd8] sm:$0xff] }
 0x3b6   :  { %1663 = vmatpush.msrb.mxu0 %v1284_v8  ;;  %1686 = vmatpush.msra.mxu1 %v1388_v9  ;;  %v1413_v1 = vld [vmem:[#allocation22 + $0xf18] sm:$0xff] }
 0x3b7   :  { %1596 = vmatmul.f32.vlgmr.msra.gmra.mxu0 %v4625_v57  ;;  %1628 = vmatpush.msra.mxu2 %v988_v10  ;;  %v1013_v2 = vld [vmem:[#allocation22 + $0x298] sm:$0xff] }
 0x3b8   :  { %1651 = vmatpush.msrb.mxu3 %v1092_v11  ;;  %1664 = vmatpush.msrb.mxu0 %v1276_v12  ;;  %v1117_v3 = vld [vmem:[#allocation22 + $0x5d8] sm:$0xff] }
 0x3b9   :  { %1687 = vmatpush.msra.mxu1 %v1380_v13  ;;  %1629 = vmatpush.msra.mxu2 %v980_v14  ;;  %v1301_v4 = vld [vmem:[#allocation22 + $0xb98] sm:$0xff] }
 0x3ba   :  { %1652 = vmatpush.msrb.mxu3 %v1084_v15  ;;  %1665 = vmatpush.msrb.mxu0 %v1268_v16  ;;  %v1405_v5 = vld [vmem:[#allocation22 + $0xed8] sm:$0xff] }
 0x3bb   :  { %1688 = vmatpush.msra.mxu1 %v1372_v17  ;;  %1630 = vmatpush.msra.mxu2 %v972_v18  ;;  %v1005_v6 = vld [vmem:[#allocation22 + $0x258] sm:$0xff] }
 0x3bc   :  { %1653 = vmatpush.msrb.mxu3 %v1076_v19  ;;  %1666 = vmatpush.msrb.mxu0 %v1260_v20  ;;  %v1109_v7 = vld [vmem:[#allocation22 + $0x598] sm:$0xff] }
 0x3bd   :  { %1689 = vmatpush.msra.mxu1 %v1364_v21  ;;  %1631 = vmatpush.msra.mxu2 %v964_v22  ;;  %v1293_v8 = vld [vmem:[#allocation22 + $0xb58] sm:$0xff] }
 0x3be   :  { %1654 = vmatpush.msrb.mxu3 %v1068_v23  ;;  %1667 = vmatpush.msrb.mxu0 %v1252_v24  ;;  %v1397_v9 = vld [vmem:[#allocation22 + $0xe98] sm:$0xff] }
 0x3bf   :  { %1690 = vmatpush.msra.mxu1 %v1356_v25  ;;  %1632 = vmatpush.msra.mxu2 %v956_v26  ;;  %v997_v10 = vld [vmem:[#allocation22 + $0x218] sm:$0xff] }
 0x3c0   :  { %1655 = vmatpush.msrb.mxu3 %v1060_v27  ;;  %1668 = vmatpush.msrb.mxu0 %v1244_v29  ;;  %v1101_v11 = vld [vmem:[#allocation22 + $0x558] sm:$0xff] }
 0x3c1   :  { %1691 = vmatpush.msra.mxu1 %v1348_v30  ;;  %1656 = vmatmul.f32.vlgmr.msrb.gmra.mxu3 %v4615_v28  ;;  %v1285_v12 = vld [vmem:[#allocation22 + $0xb18] sm:$0xff] }
 0x3c2   :  { %1720 = vmatpush.msra.mxu3 %v1181_v31  ;;  %1633 = vmatpush.msra.mxu2 %v948_v32  ;;  %v1389_v13 = vld [vmem:[#allocation22 + $0xe58] sm:$0xff] }
 0x3c3   :  { %1669 = vmatpush.msrb.mxu0 %v1236_v33  ;;  %1692 = vmatpush.msra.mxu1 %v1340_v34  ;;  %v989_v14 = vld [vmem:[#allocation22 + $0x1d8] sm:$0xff] }
 0x3c4   :  { %1721 = vmatpush.msra.mxu3 %v1173_v35  ;;  %1634 = vmatpush.msra.mxu2 %v940_v36  ;;  %v1093_v15 = vld [vmem:[#allocation22 + $0x518] sm:$0xff]  ;;  %v1182_v35 = vld [vmem:[#allocation22 + $0x7e0] sm:$0xff] }
 0x3c5   :  { %1670 = vmatpush.msrb.mxu0 %v1228_v37  ;;  %1693 = vmatpush.msra.mxu1 %v1332_v38  ;;  %v1277_v16 = vld [vmem:[#allocation22 + $0xad8] sm:$0xff] }
 0x3c6   :  { %1722 = vmatpush.msra.mxu3 %v1165_v40  ;;  %1635 = vmatpush.msra.mxu2 %v932_v41  ;;  %v1381_v17 = vld [vmem:[#allocation22 + $0xe18] sm:$0xff]  ;;  %v1174_v40 = vld [vmem:[#allocation22 + $0x7a0] sm:$0xff] }
 0x3c7   :  { %1671 = vmatpush.msrb.mxu0 %v1220_v42  ;;  %1694 = vmatpush.msra.mxu1 %v1324_v43  ;;  %v981_v18 = vld [vmem:[#allocation22 + $0x198] sm:$0xff] }
 0x3c8   :  { %1636 = vmatmul.f32.vlgmr.msra.gmra.mxu2 %v4618_v39  ;;  %1723 = vmatpush.msra.mxu3 %v1157_v44  ;;  %v1085_v19 = vld [vmem:[#allocation22 + $0x4d8] sm:$0xff]  ;;  %v1166_v44 = vld [vmem:[#allocation22 + $0x760] sm:$0xff] }
 0x3c9   :  { %1700 = vmatpush.msrb.mxu2 %v1053_v45  ;;  %1672 = vmatpush.msrb.mxu0 %v1212_v47  ;;  %v1269_v20 = vld [vmem:[#allocation22 + $0xa98] sm:$0xff] }
 0x3ca   :  { %1695 = vmatpush.msra.mxu1 %v1316_v48  ;;  %1724 = vmatpush.msra.mxu3 %v1149_v49  ;;  %v1373_v21 = vld [vmem:[#allocation22 + $0xdd8] sm:$0xff]  ;;  %v1158_v49 = vld [vmem:[#allocation22 + $0x720] sm:$0xff] }
 0x3cb   :  { %1696 = vmatmul.f32.vlgmr.msra.gmra.mxu1 %v4621_v46  ;;  %1701 = vmatpush.msrb.mxu2 %v1045_v50  ;;  %v973_v22 = vld [vmem:[#allocation22 + $0x158] sm:$0xff]  ;;  %v1054_v50 = vld [vmem:[#allocation22 + $0x3e0] sm:$0xff] }
 0x3cc   :  { %1760 = vmatpush.msrb.mxu1 %v1437_v51  ;;  %1673 = vmatpush.msrb.mxu0 %v1204_v52  ;;  %v1077_v23 = vld [vmem:[#allocation22 + $0x498] sm:$0xff] }
 0x3cd   :  { %1702 = vmatpush.msrb.mxu2 %v1037_v53  ;;  %1725 = vmatpush.msra.mxu3 %v1141_v54  ;;  %v1261_v24 = vld [vmem:[#allocation22 + $0xa58] sm:$0xff]  ;;  %v1150_v53 = vld [vmem:[#allocation22 + $0x6e0] sm:$0xff] }
 0x3ce   :  { %1761 = vmatpush.msrb.mxu1 %v1429_v55  ;;  %1674 = vmatpush.msrb.mxu0 %v1196_v56  ;;  %v1365_v25 = vld [vmem:[#allocation22 + $0xd98] sm:$0xff]  ;;  %v1046_v54 = vld [vmem:[#allocation22 + $0x3a0] sm:$0xff] }
 0x3cf   :  { %1703 = vmatpush.msrb.mxu2 %v1029_v58  ;;  %1726 = vmatpush.msra.mxu3 %v1133_v59  ;;  %v965_v26 = vld [vmem:[#allocation22 + $0x118] sm:$0xff]  ;;  %v1438_v55 = vld [vmem:[#allocation22 + $0xfe0] sm:$0xff] }
 0x3d0   :  { %1762 = vmatpush.msrb.mxu1 %v1421_v60  ;;  %1675 = vmatpush.msrb.mxu0 %v1188_v61  ;;  %v1069_v27 = vld [vmem:[#allocation22 + $0x458] sm:$0xff]  ;;  %v1038_v58 = vld [vmem:[#allocation22 + $0x360] sm:$0xff] }
 0x3d1   :  { %1676 = vmatmul.f32.vlgmr.msrb.gmra.mxu0 %v4625_v57  ;;  %1704 = vmatpush.msrb.mxu2 %v1021_v62  ;;  %v1253_v29 = vld [vmem:[#allocation22 + $0xa18] sm:$0xff]  ;;  %v1142_v59 = vld [vmem:[#allocation22 + $0x6a0] sm:$0xff] }
 0x3d2   :  { %1727 = vmatpush.msra.mxu3 %v1125_v63  ;;  %1740 = vmatpush.msra.mxu0 %v1309_v0  ;;  %v1357_v30 = vld [vmem:[#allocation22 + $0xd58] sm:$0xff]  ;;  %v1430_v60 = vld [vmem:[#allocation22 + $0xfa0] sm:$0xff] }
 0x3d3   :  { %1763 = vmatpush.msrb.mxu1 %v1413_v1  ;;  %1705 = vmatpush.msrb.mxu2 %v1013_v2  ;;  %v957_v31 = vld [vmem:[#allocation22 + $0xd8] sm:$0xff]  ;;  %v1030_v62 = vld [vmem:[#allocation22 + $0x320] sm:$0xff] }
 0x3d4   :  { %1728 = vmatpush.msra.mxu3 %v1117_v3  ;;  %1741 = vmatpush.msra.mxu0 %v1301_v4  ;;  %v1061_v32 = vld [vmem:[#allocation22 + $0x418] sm:$0xff]  ;;  %v1134_v63 = vld [vmem:[#allocation22 + $0x660] sm:$0xff] }
 0x3d5   :  { %1764 = vmatpush.msrb.mxu1 %v1405_v5  ;;  %1706 = vmatpush.msrb.mxu2 %v1005_v6  ;;  %v1245_v33 = vld [vmem:[#allocation22 + $0x9d8] sm:$0xff]  ;;  %v1422_v0 = vld [vmem:[#allocation22 + $0xf60] sm:$0xff] }
 0x3d6   :  { %1729 = vmatpush.msra.mxu3 %v1109_v7  ;;  %1742 = vmatpush.msra.mxu0 %v1293_v8  ;;  %v1349_v34 = vld [vmem:[#allocation22 + $0xd18] sm:$0xff]  ;;  %v1022_v2 = vld [vmem:[#allocation22 + $0x2e0] sm:$0xff] }
 0x3d7   :  { %1765 = vmatpush.msrb.mxu1 %v1397_v9  ;;  %1707 = vmatpush.msrb.mxu2 %v997_v10  ;;  %v949_v36 = vld [vmem:[#allocation22 + $0x98] sm:$0xff]  ;;  %v1126_v3 = vld [vmem:[#allocation22 + $0x620] sm:$0xff] }
 0x3d8   :  { %1730 = vmatpush.msra.mxu3 %v1101_v11  ;;  %1743 = vmatpush.msra.mxu0 %v1285_v12  ;;  %v1237_v37 = vld [vmem:[#allocation22 + $0x998] sm:$0xff]  ;;  %v1310_v4 = vld [vmem:[#allocation22 + $0xbe0] sm:$0xff] }
 0x3d9   :  { %1766 = vmatpush.msrb.mxu1 %v1389_v13  ;;  %1708 = vmatpush.msrb.mxu2 %v989_v14  ;;  %v1341_v38 = vld [vmem:[#allocation22 + $0xcd8] sm:$0xff]  ;;  %v1414_v5 = vld [vmem:[#allocation22 + $0xf20] sm:$0xff] }
 0x3da   :  { %1731 = vmatpush.msra.mxu3 %v1093_v15  ;;  %1744 = vmatpush.msra.mxu0 %v1277_v16  ;;  %v941_v41 = vld [vmem:[#allocation22 + $0x58] sm:$0xff]  ;;  %v1014_v6 = vld [vmem:[#allocation22 + $0x2a0] sm:$0xff] }
 0x3db   :  { %1767 = vmatpush.msrb.mxu1 %v1381_v17  ;;  %1709 = vmatpush.msrb.mxu2 %v981_v18  ;;  %v1229_v42 = vld [vmem:[#allocation22 + $0x958] sm:$0xff]  ;;  %v1118_v7 = vld [vmem:[#allocation22 + $0x5e0] sm:$0xff] }
 0x3dc   :  { %1732 = vmatpush.msra.mxu3 %v1085_v19  ;;  %1745 = vmatpush.msra.mxu0 %v1269_v20  ;;  %v1333_v43 = vld [vmem:[#allocation22 + $0xc98] sm:$0xff]  ;;  %v1302_v8 = vld [vmem:[#allocation22 + $0xba0] sm:$0xff] }
 0x3dd   :  { %1768 = vmatpush.msrb.mxu1 %v1373_v21  ;;  %1710 = vmatpush.msrb.mxu2 %v973_v22  ;;  %v933_v45 = vld [vmem:[#allocation22 + $0x18] sm:$0xff]  ;;  %v1406_v9 = vld [vmem:[#allocation22 + $0xee0] sm:$0xff] }
 0x3de   :  { %1733 = vmatpush.msra.mxu3 %v1077_v23  ;;  %1746 = vmatpush.msra.mxu0 %v1261_v24  ;;  %v1221_v47 = vld [vmem:[#allocation22 + $0x918] sm:$0xff]  ;;  %v1006_v10 = vld [vmem:[#allocation22 + $0x260] sm:$0xff] }
 0x3df   :  { %1769 = vmatpush.msrb.mxu1 %v1365_v25  ;;  %1711 = vmatpush.msrb.mxu2 %v965_v26  ;;  %v1325_v48 = vld [vmem:[#allocation22 + $0xc58] sm:$0xff]  ;;  %v1110_v11 = vld [vmem:[#allocation22 + $0x5a0] sm:$0xff] }
 0x3e0   :  { %1734 = vmatpush.msra.mxu3 %v1069_v27  ;;  %1747 = vmatpush.msra.mxu0 %v1253_v29  ;;  %v1213_v51 = vld [vmem:[#allocation22 + $0x8d8] sm:$0xff]  ;;  %v1294_v12 = vld [vmem:[#allocation22 + $0xb60] sm:$0xff] }
 0x3e1   :  { %1770 = vmatpush.msrb.mxu1 %v1357_v30  ;;  %1712 = vmatpush.msrb.mxu2 %v957_v31  ;;  %v1317_v52 = vld [vmem:[#allocation22 + $0xc18] sm:$0xff]  ;;  %v1398_v13 = vld [vmem:[#allocation22 + $0xea0] sm:$0xff] }
 0x3e2   :  { %1735 = vmatpush.msra.mxu3 %v1061_v32  ;;  %1748 = vmatpush.msra.mxu0 %v1245_v33  ;;  %v1205_v56 = vld [vmem:[#allocation22 + $0x898] sm:$0xff]  ;;  %v998_v14 = vld [vmem:[#allocation22 + $0x220] sm:$0xff] }
 0x3e3   :  { %1771 = vmatpush.msrb.mxu1 %v1349_v34  ;;  %1736 = vmatmul.f32.vlgmr.msra.gmra.mxu3 %v4615_v28  ;;  %v1197_v61 = vld [vmem:[#allocation22 + $0x858] sm:$0xff]  ;;  %v1102_v15 = vld [vmem:[#allocation22 + $0x560] sm:$0xff] }
 0x3e4   :  { %1800 = vmatpush.msrb.mxu3 %v1182_v35  ;;  %1713 = vmatpush.msrb.mxu2 %v949_v36  ;;  %v1189_v1 = vld [vmem:[#allocation22 + $0x818] sm:$0xff]  ;;  %v1286_v16 = vld [vmem:[#allocation22 + $0xb20] sm:$0xff] }
 0x3e5   :  { %1749 = vmatpush.msra.mxu0 %v1237_v37  ;;  %1772 = vmatpush.msrb.mxu1 %v1341_v38  ;;  %v1390_v17 = vld [vmem:[#allocation22 + $0xe60] sm:$0xff] }
 0x3e6   :  { %1801 = vmatpush.msrb.mxu3 %v1174_v40  ;;  %1714 = vmatpush.msrb.mxu2 %v941_v41  ;;  %v990_v18 = vld [vmem:[#allocation22 + $0x1e0] sm:$0xff]  ;;  %v1183_v40 = vld [vmem:[#allocation22 + $0x7e8] sm:$0xff] }
 0x3e7   :  { %1750 = vmatpush.msra.mxu0 %v1229_v42  ;;  %1773 = vmatpush.msrb.mxu1 %v1333_v43  ;;  %v1094_v19 = vld [vmem:[#allocation22 + $0x520] sm:$0xff] }
 0x3e8   :  { %1802 = vmatpush.msrb.mxu3 %v1166_v44  ;;  %1715 = vmatpush.msrb.mxu2 %v933_v45  ;;  %v1278_v20 = vld [vmem:[#allocation22 + $0xae0] sm:$0xff]  ;;  %v1175_v44 = vld [vmem:[#allocation22 + $0x7a8] sm:$0xff] }
 0x3e9   :  { %1751 = vmatpush.msra.mxu0 %v1221_v47  ;;  %1774 = vmatpush.msrb.mxu1 %v1325_v48  ;;  %v1382_v21 = vld [vmem:[#allocation22 + $0xe20] sm:$0xff] }
 0x3ea   :  { %1716 = vmatmul.f32.vlgmr.msrb.gmra.mxu2 %v4618_v39  ;;  %1803 = vmatpush.msrb.mxu3 %v1158_v49  ;;  %v982_v22 = vld [vmem:[#allocation22 + $0x1a0] sm:$0xff]  ;;  %v1167_v49 = vld [vmem:[#allocation22 + $0x768] sm:$0xff] }
 0x3eb   :  { %1780 = vmatpush.msra.mxu2 %v1054_v50  ;;  %1752 = vmatpush.msra.mxu0 %v1213_v51  ;;  %v1086_v23 = vld [vmem:[#allocation22 + $0x4e0] sm:$0xff] }
 0x3ec   :  { %1775 = vmatpush.msrb.mxu1 %v1317_v52  ;;  %1804 = vmatpush.msrb.mxu3 %v1150_v53  ;;  %v1270_v24 = vld [vmem:[#allocation22 + $0xaa0] sm:$0xff]  ;;  %v1159_v53 = vld [vmem:[#allocation22 + $0x728] sm:$0xff] }
 0x3ed   :  { %1776 = vmatmul.f32.vlgmr.msrb.gmra.mxu1 %v4621_v46  ;;  %1781 = vmatpush.msra.mxu2 %v1046_v54  ;;  %v1374_v25 = vld [vmem:[#allocation22 + $0xde0] sm:$0xff]  ;;  %v1055_v54 = vld [vmem:[#allocation22 + $0x3e8] sm:$0xff] }
 0x3ee   :  { %1840 = vmatpush.msra.mxu1 %v1438_v55  ;;  %1753 = vmatpush.msra.mxu0 %v1205_v56  ;;  %v974_v26 = vld [vmem:[#allocation22 + $0x160] sm:$0xff] }
 0x3ef   :  { %1782 = vmatpush.msra.mxu2 %v1038_v58  ;;  %1805 = vmatpush.msrb.mxu3 %v1142_v59  ;;  %v1078_v27 = vld [vmem:[#allocation22 + $0x4a0] sm:$0xff]  ;;  %v1151_v58 = vld [vmem:[#allocation22 + $0x6e8] sm:$0xff] }
 0x3f0   :  { %1841 = vmatpush.msra.mxu1 %v1430_v60  ;;  %1754 = vmatpush.msra.mxu0 %v1197_v61  ;;  %v1262_v29 = vld [vmem:[#allocation22 + $0xa60] sm:$0xff]  ;;  %v1047_v59 = vld [vmem:[#allocation22 + $0x3a8] sm:$0xff] }
 0x3f1   :  { %1783 = vmatpush.msra.mxu2 %v1030_v62  ;;  %1806 = vmatpush.msrb.mxu3 %v1134_v63  ;;  %v1366_v30 = vld [vmem:[#allocation22 + $0xda0] sm:$0xff]  ;;  %v1439_v60 = vld [vmem:[#allocation22 + $0xfe8] sm:$0xff] }
 0x3f2   :  { %1842 = vmatpush.msra.mxu1 %v1422_v0  ;;  %1755 = vmatpush.msra.mxu0 %v1189_v1  ;;  %v966_v31 = vld [vmem:[#allocation22 + $0x120] sm:$0xff]  ;;  %v1039_v62 = vld [vmem:[#allocation22 + $0x368] sm:$0xff] }
 0x3f3   :  { %1756 = vmatmul.f32.vlgmr.msra.gmra.mxu0 %v4625_v57  ;;  %1784 = vmatpush.msra.mxu2 %v1022_v2  ;;  %v1070_v32 = vld [vmem:[#allocation22 + $0x460] sm:$0xff]  ;;  %v1143_v63 = vld [vmem:[#allocation22 + $0x6a8] sm:$0xff] }
 0x3f4   :  { %1807 = vmatpush.msrb.mxu3 %v1126_v3  ;;  %1820 = vmatpush.msrb.mxu0 %v1310_v4  ;;  %v1254_v33 = vld [vmem:[#allocation22 + $0xa20] sm:$0xff]  ;;  %v1431_v0 = vld [vmem:[#allocation22 + $0xfa8] sm:$0xff] }
 0x3f5   :  { %1843 = vmatpush.msra.mxu1 %v1414_v5  ;;  %1785 = vmatpush.msra.mxu2 %v1014_v6  ;;  %v1358_v34 = vld [vmem:[#allocation22 + $0xd60] sm:$0xff]  ;;  %v1031_v2 = vld [vmem:[#allocation22 + $0x328] sm:$0xff] }
 0x3f6   :  { %1808 = vmatpush.msrb.mxu3 %v1118_v7  ;;  %1821 = vmatpush.msrb.mxu0 %v1302_v8  ;;  %v958_v35 = vld [vmem:[#allocation22 + $0xe0] sm:$0xff]  ;;  %v1135_v3 = vld [vmem:[#allocation22 + $0x668] sm:$0xff] }
 0x3f7   :  { %1844 = vmatpush.msra.mxu1 %v1406_v9  ;;  %1786 = vmatpush.msra.mxu2 %v1006_v10  ;;  %v1062_v36 = vld [vmem:[#allocation22 + $0x420] sm:$0xff]  ;;  %v1423_v4 = vld [vmem:[#allocation22 + $0xf68] sm:$0xff] }
 0x3f8   :  { %1809 = vmatpush.msrb.mxu3 %v1110_v11  ;;  %1822 = vmatpush.msrb.mxu0 %v1294_v12  ;;  %v1246_v37 = vld [vmem:[#allocation22 + $0x9e0] sm:$0xff]  ;;  %v1023_v6 = vld [vmem:[#allocation22 + $0x2e8] sm:$0xff] }
 0x3f9   :  { %1845 = vmatpush.msra.mxu1 %v1398_v13  ;;  %1787 = vmatpush.msra.mxu2 %v998_v14  ;;  %v1350_v38 = vld [vmem:[#allocation22 + $0xd20] sm:$0xff]  ;;  %v1127_v7 = vld [vmem:[#allocation22 + $0x628] sm:$0xff] }
 0x3fa   :  { %1810 = vmatpush.msrb.mxu3 %v1102_v15  ;;  %1823 = vmatpush.msrb.mxu0 %v1286_v16  ;;  %v950_v41 = vld [vmem:[#allocation22 + $0xa0] sm:$0xff]  ;;  %v1311_v8 = vld [vmem:[#allocation22 + $0xbe8] sm:$0xff] }
 0x3fb   :  { %1846 = vmatpush.msra.mxu1 %v1390_v17  ;;  %1788 = vmatpush.msra.mxu2 %v990_v18  ;;  %v1238_v42 = vld [vmem:[#allocation22 + $0x9a0] sm:$0xff]  ;;  %v1415_v9 = vld [vmem:[#allocation22 + $0xf28] sm:$0xff] }
 0x3fc   :  { %1811 = vmatpush.msrb.mxu3 %v1094_v19  ;;  %1824 = vmatpush.msrb.mxu0 %v1278_v20  ;;  %v1342_v43 = vld [vmem:[#allocation22 + $0xce0] sm:$0xff]  ;;  %v1015_v10 = vld [vmem:[#allocation22 + $0x2a8] sm:$0xff] }
 0x3fd   :  { %1847 = vmatpush.msra.mxu1 %v1382_v21  ;;  %1789 = vmatpush.msra.mxu2 %v982_v22  ;;  %v942_v45 = vld [vmem:[#allocation22 + $0x60] sm:$0xff]  ;;  %v1119_v11 = vld [vmem:[#allocation22 + $0x5e8] sm:$0xff] }
 0x3fe   :  { %1812 = vmatpush.msrb.mxu3 %v1086_v23  ;;  %1825 = vmatpush.msrb.mxu0 %v1270_v24  ;;  %v1230_v47 = vld [vmem:[#allocation22 + $0x960] sm:$0xff]  ;;  %v1303_v12 = vld [vmem:[#allocation22 + $0xba8] sm:$0xff] }
 0x3ff   :  { %1848 = vmatpush.msra.mxu1 %v1374_v25  ;;  %1790 = vmatpush.msra.mxu2 %v974_v26  ;;  %v1334_v48 = vld [vmem:[#allocation22 + $0xca0] sm:$0xff]  ;;  %v1407_v13 = vld [vmem:[#allocation22 + $0xee8] sm:$0xff] }
 0x400   :  { %1813 = vmatpush.msrb.mxu3 %v1078_v27  ;;  %1826 = vmatpush.msrb.mxu0 %v1262_v29  ;;  %v934_v50 = vld [vmem:[#allocation22 + $0x20] sm:$0xff]  ;;  %v1007_v14 = vld [vmem:[#allocation22 + $0x268] sm:$0xff] }
 0x401   :  { %1849 = vmatpush.msra.mxu1 %v1366_v30  ;;  %1791 = vmatpush.msra.mxu2 %v966_v31  ;;  %v1222_v51 = vld [vmem:[#allocation22 + $0x920] sm:$0xff]  ;;  %v1111_v15 = vld [vmem:[#allocation22 + $0x5a8] sm:$0xff] }
 0x402   :  { %1814 = vmatpush.msrb.mxu3 %v1070_v32  ;;  %1827 = vmatpush.msrb.mxu0 %v1254_v33  ;;  %v1326_v52 = vld [vmem:[#allocation22 + $0xc60] sm:$0xff]  ;;  %v1295_v16 = vld [vmem:[#allocation22 + $0xb68] sm:$0xff] }
 0x403   :  { %1850 = vmatpush.msra.mxu1 %v1358_v34  ;;  %1792 = vmatpush.msra.mxu2 %v958_v35  ;;  %v1214_v55 = vld [vmem:[#allocation22 + $0x8e0] sm:$0xff]  ;;  %v1399_v17 = vld [vmem:[#allocation22 + $0xea8] sm:$0xff] }
 0x404   :  { %1815 = vmatpush.msrb.mxu3 %v1062_v36  ;;  %1828 = vmatpush.msrb.mxu0 %v1246_v37  ;;  %v1318_v56 = vld [vmem:[#allocation22 + $0xc20] sm:$0xff]  ;;  %v999_v18 = vld [vmem:[#allocation22 + $0x228] sm:$0xff] }
 0x405   :  { %1851 = vmatpush.msra.mxu1 %v1350_v38  ;;  %1816 = vmatmul.f32.vlgmr.msrb.gmra.mxu3 %v4615_v28  ;;  %v1206_v61 = vld [vmem:[#allocation22 + $0x8a0] sm:$0xff]  ;;  %v1103_v19 = vld [vmem:[#allocation22 + $0x568] sm:$0xff] }
 0x406   :  { %1880 = vmatpush.msra.mxu3 %v1183_v40  ;;  %1793 = vmatpush.msra.mxu2 %v950_v41  ;;  %v1198_v1 = vld [vmem:[#allocation22 + $0x860] sm:$0xff]  ;;  %v1287_v20 = vld [vmem:[#allocation22 + $0xb28] sm:$0xff] }
 0x407   :  { %1829 = vmatpush.msrb.mxu0 %v1238_v42  ;;  %1852 = vmatpush.msra.mxu1 %v1342_v43  ;;  %v1190_v5 = vld [vmem:[#allocation22 + $0x820] sm:$0xff]  ;;  %v1391_v21 = vld [vmem:[#allocation22 + $0xe68] sm:$0xff] }
 0x408   :  { %1881 = vmatpush.msra.mxu3 %v1175_v44  ;;  %1794 = vmatpush.msra.mxu2 %v942_v45  ;;  %v991_v22 = vld [vmem:[#allocation22 + $0x1e8] sm:$0xff]  ;;  %v1184_v44 = vld [vmem:[#allocation22 + $0x7f0] sm:$0xff] }
 0x409   :  { %1830 = vmatpush.msrb.mxu0 %v1230_v47  ;;  %1853 = vmatpush.msra.mxu1 %v1334_v48  ;;  %v1095_v23 = vld [vmem:[#allocation22 + $0x528] sm:$0xff] }
 0x40a   :  { %1882 = vmatpush.msra.mxu3 %v1167_v49  ;;  %1795 = vmatpush.msra.mxu2 %v934_v50  ;;  %v1279_v24 = vld [vmem:[#allocation22 + $0xae8] sm:$0xff]  ;;  %v1176_v49 = vld [vmem:[#allocation22 + $0x7b0] sm:$0xff] }
 0x40b   :  { %1831 = vmatpush.msrb.mxu0 %v1222_v51  ;;  %1854 = vmatpush.msra.mxu1 %v1326_v52  ;;  %v1383_v25 = vld [vmem:[#allocation22 + $0xe28] sm:$0xff] }
 0x40c   :  { %1796 = vmatmul.f32.vlgmr.msra.gmra.mxu2 %v4618_v39  ;;  %1883 = vmatpush.msra.mxu3 %v1159_v53  ;;  %v983_v26 = vld [vmem:[#allocation22 + $0x1a8] sm:$0xff]  ;;  %v1168_v53 = vld [vmem:[#allocation22 + $0x770] sm:$0xff] }
 0x40d   :  { %1860 = vmatpush.msrb.mxu2 %v1055_v54  ;;  %1832 = vmatpush.msrb.mxu0 %v1214_v55  ;;  %v1087_v27 = vld [vmem:[#allocation22 + $0x4e8] sm:$0xff] }
 0x40e   :  { %1855 = vmatpush.msra.mxu1 %v1318_v56  ;;  %1884 = vmatpush.msra.mxu3 %v1151_v58  ;;  %v1271_v29 = vld [vmem:[#allocation22 + $0xaa8] sm:$0xff]  ;;  %v1160_v58 = vld [vmem:[#allocation22 + $0x730] sm:$0xff] }
 0x40f   :  { %1856 = vmatmul.f32.vlgmr.msra.gmra.mxu1 %v4621_v46  ;;  %1861 = vmatpush.msrb.mxu2 %v1047_v59  ;;  %v1375_v30 = vld [vmem:[#allocation22 + $0xde8] sm:$0xff]  ;;  %v1056_v59 = vld [vmem:[#allocation22 + $0x3f0] sm:$0xff] }
 0x410   :  { %1920 = vmatpush.msrb.mxu1 %v1439_v60  ;;  %1833 = vmatpush.msrb.mxu0 %v1206_v61  ;;  %v975_v31 = vld [vmem:[#allocation22 + $0x168] sm:$0xff] }
 0x411   :  { %1862 = vmatpush.msrb.mxu2 %v1039_v62  ;;  %1885 = vmatpush.msra.mxu3 %v1143_v63  ;;  %v1079_v32 = vld [vmem:[#allocation22 + $0x4a8] sm:$0xff]  ;;  %v1152_v62 = vld [vmem:[#allocation22 + $0x6f0] sm:$0xff] }
 0x412   :  { %1921 = vmatpush.msrb.mxu1 %v1431_v0  ;;  %1834 = vmatpush.msrb.mxu0 %v1198_v1  ;;  %v1263_v33 = vld [vmem:[#allocation22 + $0xa68] sm:$0xff]  ;;  %v1048_v63 = vld [vmem:[#allocation22 + $0x3b0] sm:$0xff] }
 0x413   :  { %1863 = vmatpush.msrb.mxu2 %v1031_v2  ;;  %1886 = vmatpush.msra.mxu3 %v1135_v3  ;;  %v1367_v34 = vld [vmem:[#allocation22 + $0xda8] sm:$0xff]  ;;  %v1440_v0 = vld [vmem:[#allocation22 + $0xff0] sm:$0xff] }
 0x414   :  { %1922 = vmatpush.msrb.mxu1 %v1423_v4  ;;  %1835 = vmatpush.msrb.mxu0 %v1190_v5  ;;  %v967_v35 = vld [vmem:[#allocation22 + $0x128] sm:$0xff]  ;;  %v1040_v2 = vld [vmem:[#allocation22 + $0x370] sm:$0xff] }
 0x415   :  { %1836 = vmatmul.f32.vlgmr.msrb.gmra.mxu0 %v4625_v57  ;;  %1864 = vmatpush.msrb.mxu2 %v1023_v6  ;;  %v1071_v36 = vld [vmem:[#allocation22 + $0x468] sm:$0xff]  ;;  %v1144_v3 = vld [vmem:[#allocation22 + $0x6b0] sm:$0xff] }
 0x416   :  { %1887 = vmatpush.msra.mxu3 %v1127_v7  ;;  %1900 = vmatpush.msra.mxu0 %v1311_v8  ;;  %v1255_v37 = vld [vmem:[#allocation22 + $0xa28] sm:$0xff]  ;;  %v1432_v4 = vld [vmem:[#allocation22 + $0xfb0] sm:$0xff] }
 0x417   :  { %1923 = vmatpush.msrb.mxu1 %v1415_v9  ;;  %1865 = vmatpush.msrb.mxu2 %v1015_v10  ;;  %v1359_v38 = vld [vmem:[#allocation22 + $0xd68] sm:$0xff]  ;;  %v1032_v6 = vld [vmem:[#allocation22 + $0x330] sm:$0xff] }
 0x418   :  { %1888 = vmatpush.msra.mxu3 %v1119_v11  ;;  %1901 = vmatpush.msra.mxu0 %v1303_v12  ;;  %v959_v40 = vld [vmem:[#allocation22 + $0xe8] sm:$0xff]  ;;  %v1136_v7 = vld [vmem:[#allocation22 + $0x670] sm:$0xff] }
 0x419   :  { %1924 = vmatpush.msrb.mxu1 %v1407_v13  ;;  %1866 = vmatpush.msrb.mxu2 %v1007_v14  ;;  %v1063_v41 = vld [vmem:[#allocation22 + $0x428] sm:$0xff]  ;;  %v1424_v8 = vld [vmem:[#allocation22 + $0xf70] sm:$0xff] }
 0x41a   :  { %1889 = vmatpush.msra.mxu3 %v1111_v15  ;;  %1902 = vmatpush.msra.mxu0 %v1295_v16  ;;  %v1247_v42 = vld [vmem:[#allocation22 + $0x9e8] sm:$0xff]  ;;  %v1024_v10 = vld [vmem:[#allocation22 + $0x2f0] sm:$0xff] }
 0x41b   :  { %1925 = vmatpush.msrb.mxu1 %v1399_v17  ;;  %1867 = vmatpush.msrb.mxu2 %v999_v18  ;;  %v1351_v43 = vld [vmem:[#allocation22 + $0xd28] sm:$0xff]  ;;  %v1128_v11 = vld [vmem:[#allocation22 + $0x630] sm:$0xff] }
 0x41c   :  { %1890 = vmatpush.msra.mxu3 %v1103_v19  ;;  %1903 = vmatpush.msra.mxu0 %v1287_v20  ;;  %v951_v45 = vld [vmem:[#allocation22 + $0xa8] sm:$0xff]  ;;  %v1312_v12 = vld [vmem:[#allocation22 + $0xbf0] sm:$0xff] }
 0x41d   :  { %1926 = vmatpush.msrb.mxu1 %v1391_v21  ;;  %1868 = vmatpush.msrb.mxu2 %v991_v22  ;;  %v1239_v47 = vld [vmem:[#allocation22 + $0x9a8] sm:$0xff]  ;;  %v1416_v13 = vld [vmem:[#allocation22 + $0xf30] sm:$0xff] }
 0x41e   :  { %1891 = vmatpush.msra.mxu3 %v1095_v23  ;;  %1904 = vmatpush.msra.mxu0 %v1279_v24  ;;  %v1343_v48 = vld [vmem:[#allocation22 + $0xce8] sm:$0xff]  ;;  %v1016_v14 = vld [vmem:[#allocation22 + $0x2b0] sm:$0xff] }
 0x41f   :  { %1927 = vmatpush.msrb.mxu1 %v1383_v25  ;;  %1869 = vmatpush.msrb.mxu2 %v983_v26  ;;  %v943_v50 = vld [vmem:[#allocation22 + $0x68] sm:$0xff]  ;;  %v1120_v15 = vld [vmem:[#allocation22 + $0x5f0] sm:$0xff] }
 0x420   :  { %1892 = vmatpush.msra.mxu3 %v1087_v27  ;;  %1905 = vmatpush.msra.mxu0 %v1271_v29  ;;  %v1231_v51 = vld [vmem:[#allocation22 + $0x968] sm:$0xff]  ;;  %v1304_v16 = vld [vmem:[#allocation22 + $0xbb0] sm:$0xff] }
 0x421   :  { %1928 = vmatpush.msrb.mxu1 %v1375_v30  ;;  %1870 = vmatpush.msrb.mxu2 %v975_v31  ;;  %v1335_v52 = vld [vmem:[#allocation22 + $0xca8] sm:$0xff]  ;;  %v1408_v17 = vld [vmem:[#allocation22 + $0xef0] sm:$0xff] }
 0x422   :  { %1893 = vmatpush.msra.mxu3 %v1079_v32  ;;  %1906 = vmatpush.msra.mxu0 %v1263_v33  ;;  %v935_v54 = vld [vmem:[#allocation22 + $0x28] sm:$0xff]  ;;  %v1008_v18 = vld [vmem:[#allocation22 + $0x270] sm:$0xff] }
 0x423   :  { %1929 = vmatpush.msrb.mxu1 %v1367_v34  ;;  %1871 = vmatpush.msrb.mxu2 %v967_v35  ;;  %v1223_v55 = vld [vmem:[#allocation22 + $0x928] sm:$0xff]  ;;  %v1112_v19 = vld [vmem:[#allocation22 + $0x5b0] sm:$0xff] }
 0x424   :  { %1894 = vmatpush.msra.mxu3 %v1071_v36  ;;  %1907 = vmatpush.msra.mxu0 %v1255_v37  ;;  %v1327_v56 = vld [vmem:[#allocation22 + $0xc68] sm:$0xff]  ;;  %v1296_v20 = vld [vmem:[#allocation22 + $0xb70] sm:$0xff] }
 0x425   :  { %1930 = vmatpush.msrb.mxu1 %v1359_v38  ;;  %1872 = vmatpush.msrb.mxu2 %v959_v40  ;;  %v1215_v60 = vld [vmem:[#allocation22 + $0x8e8] sm:$0xff]  ;;  %v1400_v21 = vld [vmem:[#allocation22 + $0xeb0] sm:$0xff] }
 0x426   :  { %1895 = vmatpush.msra.mxu3 %v1063_v41  ;;  %1908 = vmatpush.msra.mxu0 %v1247_v42  ;;  %v1319_v61 = vld [vmem:[#allocation22 + $0xc28] sm:$0xff]  ;;  %v1000_v22 = vld [vmem:[#allocation22 + $0x230] sm:$0xff] }
 0x427   :  { %1931 = vmatpush.msrb.mxu1 %v1351_v43  ;;  %1896 = vmatmul.f32.vlgmr.msra.gmra.mxu3 %v4615_v28  ;;  %v1207_v1 = vld [vmem:[#allocation22 + $0x8a8] sm:$0xff]  ;;  %v1104_v23 = vld [vmem:[#allocation22 + $0x570] sm:$0xff] }
 0x428   :  { %1960 = vmatpush.msrb.mxu3 %v1184_v44  ;;  %1873 = vmatpush.msrb.mxu2 %v951_v45  ;;  %v1199_v5 = vld [vmem:[#allocation22 + $0x868] sm:$0xff]  ;;  %v1288_v24 = vld [vmem:[#allocation22 + $0xb30] sm:$0xff] }
 0x429   :  { %1909 = vmatpush.msra.mxu0 %v1239_v47  ;;  %1932 = vmatpush.msrb.mxu1 %v1343_v48  ;;  %v1191_v9 = vld [vmem:[#allocation22 + $0x828] sm:$0xff]  ;;  %v1392_v25 = vld [vmem:[#allocation22 + $0xe70] sm:$0xff] }
 0x42a   :  { %1961 = vmatpush.msrb.mxu3 %v1176_v49  ;;  %1874 = vmatpush.msrb.mxu2 %v943_v50  ;;  %v992_v26 = vld [vmem:[#allocation22 + $0x1f0] sm:$0xff]  ;;  %v1185_v49 = vld [vmem:[#allocation22 + $0x7f8] sm:$0xff] }
 0x42b   :  { %1910 = vmatpush.msra.mxu0 %v1231_v51  ;;  %1933 = vmatpush.msrb.mxu1 %v1335_v52  ;;  %v1096_v27 = vld [vmem:[#allocation22 + $0x530] sm:$0xff] }
 0x42c   :  { %1962 = vmatpush.msrb.mxu3 %v1168_v53  ;;  %1875 = vmatpush.msrb.mxu2 %v935_v54  ;;  %v1280_v29 = vld [vmem:[#allocation22 + $0xaf0] sm:$0xff]  ;;  %v1177_v53 = vld [vmem:[#allocation22 + $0x7b8] sm:$0xff] }
 0x42d   :  { %1911 = vmatpush.msra.mxu0 %v1223_v55  ;;  %1934 = vmatpush.msrb.mxu1 %v1327_v56  ;;  %v1384_v30 = vld [vmem:[#allocation22 + $0xe30] sm:$0xff] }
 0x42e   :  { %1876 = vmatmul.f32.vlgmr.msrb.gmra.mxu2 %v4618_v39  ;;  %1963 = vmatpush.msrb.mxu3 %v1160_v58  ;;  %v984_v31 = vld [vmem:[#allocation22 + $0x1b0] sm:$0xff]  ;;  %v1169_v58 = vld [vmem:[#allocation22 + $0x778] sm:$0xff] }
 0x42f   :  { %1940 = vmatpush.msra.mxu2 %v1056_v59  ;;  %1912 = vmatpush.msra.mxu0 %v1215_v60  ;;  %v1088_v32 = vld [vmem:[#allocation22 + $0x4f0] sm:$0xff] }
 0x430   :  { %1935 = vmatpush.msrb.mxu1 %v1319_v61  ;;  %1964 = vmatpush.msrb.mxu3 %v1152_v62  ;;  %v1272_v33 = vld [vmem:[#allocation22 + $0xab0] sm:$0xff]  ;;  %v1161_v62 = vld [vmem:[#allocation22 + $0x738] sm:$0xff] }
 0x431   :  { %1936 = vmatmul.f32.vlgmr.msrb.gmra.mxu1 %v4621_v46  ;;  %1941 = vmatpush.msra.mxu2 %v1048_v63  ;;  %v1376_v34 = vld [vmem:[#allocation22 + $0xdf0] sm:$0xff]  ;;  %v1057_v63 = vld [vmem:[#allocation22 + $0x3f8] sm:$0xff] }
 0x432   :  { %2000 = vmatpush.msra.mxu1 %v1440_v0  ;;  %1913 = vmatpush.msra.mxu0 %v1207_v1  ;;  %v976_v35 = vld [vmem:[#allocation22 + $0x170] sm:$0xff] }
 0x433   :  { %1942 = vmatpush.msra.mxu2 %v1040_v2  ;;  %1965 = vmatpush.msrb.mxu3 %v1144_v3  ;;  %v1080_v36 = vld [vmem:[#allocation22 + $0x4b0] sm:$0xff]  ;;  %v1153_v2 = vld [vmem:[#allocation22 + $0x6f8] sm:$0xff] }
 0x434   :  { %2001 = vmatpush.msra.mxu1 %v1432_v4  ;;  %1914 = vmatpush.msra.mxu0 %v1199_v5  ;;  %v1264_v37 = vld [vmem:[#allocation22 + $0xa70] sm:$0xff]  ;;  %v1049_v3 = vld [vmem:[#allocation22 + $0x3b8] sm:$0xff] }
 0x435   :  { %1943 = vmatpush.msra.mxu2 %v1032_v6  ;;  %1966 = vmatpush.msrb.mxu3 %v1136_v7  ;;  %v1368_v38 = vld [vmem:[#allocation22 + $0xdb0] sm:$0xff]  ;;  %v1441_v4 = vld [vmem:[#allocation22 + $0xff8] sm:$0xff] }
 0x436   :  { %2002 = vmatpush.msra.mxu1 %v1424_v8  ;;  %1915 = vmatpush.msra.mxu0 %v1191_v9  ;;  %v968_v40 = vld [vmem:[#allocation22 + $0x130] sm:$0xff]  ;;  %v1041_v6 = vld [vmem:[#allocation22 + $0x378] sm:$0xff] }
 0x437   :  { %1916 = vmatmul.f32.vlgmr.msra.gmra.mxu0 %v4625_v57  ;;  %1944 = vmatpush.msra.mxu2 %v1024_v10  ;;  %v1072_v41 = vld [vmem:[#allocation22 + $0x470] sm:$0xff]  ;;  %v1145_v7 = vld [vmem:[#allocation22 + $0x6b8] sm:$0xff] }
 0x438   :  { %1967 = vmatpush.msrb.mxu3 %v1128_v11  ;;  %1980 = vmatpush.msrb.mxu0 %v1312_v12  ;;  %v1256_v42 = vld [vmem:[#allocation22 + $0xa30] sm:$0xff]  ;;  %v1433_v8 = vld [vmem:[#allocation22 + $0xfb8] sm:$0xff] }
 0x439   :  { %2003 = vmatpush.msra.mxu1 %v1416_v13  ;;  %1945 = vmatpush.msra.mxu2 %v1016_v14  ;;  %v1360_v43 = vld [vmem:[#allocation22 + $0xd70] sm:$0xff]  ;;  %v1033_v10 = vld [vmem:[#allocation22 + $0x338] sm:$0xff] }
 0x43a   :  { %1968 = vmatpush.msrb.mxu3 %v1120_v15  ;;  %1981 = vmatpush.msrb.mxu0 %v1304_v16  ;;  %v960_v44 = vld [vmem:[#allocation22 + $0xf0] sm:$0xff]  ;;  %v1137_v11 = vld [vmem:[#allocation22 + $0x678] sm:$0xff] }
 0x43b   :  { %2004 = vmatpush.msra.mxu1 %v1408_v17  ;;  %1946 = vmatpush.msra.mxu2 %v1008_v18  ;;  %v1064_v45 = vld [vmem:[#allocation22 + $0x430] sm:$0xff]  ;;  %v1425_v12 = vld [vmem:[#allocation22 + $0xf78] sm:$0xff] }
 0x43c   :  { %1969 = vmatpush.msrb.mxu3 %v1112_v19  ;;  %1982 = vmatpush.msrb.mxu0 %v1296_v20  ;;  %v1248_v47 = vld [vmem:[#allocation22 + $0x9f0] sm:$0xff]  ;;  %v1025_v14 = vld [vmem:[#allocation22 + $0x2f8] sm:$0xff] }
 0x43d   :  { %2005 = vmatpush.msra.mxu1 %v1400_v21  ;;  %1947 = vmatpush.msra.mxu2 %v1000_v22  ;;  %v1352_v48 = vld [vmem:[#allocation22 + $0xd30] sm:$0xff]  ;;  %v1129_v15 = vld [vmem:[#allocation22 + $0x638] sm:$0xff] }
 0x43e   :  { %1970 = vmatpush.msrb.mxu3 %v1104_v23  ;;  %1983 = vmatpush.msrb.mxu0 %v1288_v24  ;;  %v952_v50 = vld [vmem:[#allocation22 + $0xb0] sm:$0xff]  ;;  %v1313_v16 = vld [vmem:[#allocation22 + $0xbf8] sm:$0xff] }
 0x43f   :  { %2006 = vmatpush.msra.mxu1 %v1392_v25  ;;  %1948 = vmatpush.msra.mxu2 %v992_v26  ;;  %v1240_v51 = vld [vmem:[#allocation22 + $0x9b0] sm:$0xff]  ;;  %v1417_v17 = vld [vmem:[#allocation22 + $0xf38] sm:$0xff] }
 0x440   :  { %1971 = vmatpush.msrb.mxu3 %v1096_v27  ;;  %1984 = vmatpush.msrb.mxu0 %v1280_v29  ;;  %v1344_v52 = vld [vmem:[#allocation22 + $0xcf0] sm:$0xff]  ;;  %v1017_v18 = vld [vmem:[#allocation22 + $0x2b8] sm:$0xff] }
 0x441   :  { %2007 = vmatpush.msra.mxu1 %v1384_v30  ;;  %1949 = vmatpush.msra.mxu2 %v984_v31  ;;  %v944_v54 = vld [vmem:[#allocation22 + $0x70] sm:$0xff]  ;;  %v1121_v19 = vld [vmem:[#allocation22 + $0x5f8] sm:$0xff] }
 0x442   :  { %1972 = vmatpush.msrb.mxu3 %v1088_v32  ;;  %1985 = vmatpush.msrb.mxu0 %v1272_v33  ;;  %v1232_v55 = vld [vmem:[#allocation22 + $0x970] sm:$0xff]  ;;  %v1305_v20 = vld [vmem:[#allocation22 + $0xbb8] sm:$0xff] }
 0x443   :  { %2008 = vmatpush.msra.mxu1 %v1376_v34  ;;  %1950 = vmatpush.msra.mxu2 %v976_v35  ;;  %v1336_v56 = vld [vmem:[#allocation22 + $0xcb0] sm:$0xff]  ;;  %v1409_v21 = vld [vmem:[#allocation22 + $0xef8] sm:$0xff] }
 0x444   :  { %1973 = vmatpush.msrb.mxu3 %v1080_v36  ;;  %1986 = vmatpush.msrb.mxu0 %v1264_v37  ;;  %v936_v59 = vld [vmem:[#allocation22 + $0x30] sm:$0xff]  ;;  %v1009_v22 = vld [vmem:[#allocation22 + $0x278] sm:$0xff] }
 0x445   :  { %2009 = vmatpush.msra.mxu1 %v1368_v38  ;;  %1951 = vmatpush.msra.mxu2 %v968_v40  ;;  %v1224_v60 = vld [vmem:[#allocation22 + $0x930] sm:$0xff]  ;;  %v1113_v23 = vld [vmem:[#allocation22 + $0x5b8] sm:$0xff] }
 0x446   :  { %1974 = vmatpush.msrb.mxu3 %v1072_v41  ;;  %1987 = vmatpush.msrb.mxu0 %v1256_v42  ;;  %v1328_v61 = vld [vmem:[#allocation22 + $0xc70] sm:$0xff]  ;;  %v1297_v24 = vld [vmem:[#allocation22 + $0xb78] sm:$0xff] }
 0x447   :  { %2010 = vmatpush.msra.mxu1 %v1360_v43  ;;  %1952 = vmatpush.msra.mxu2 %v960_v44  ;;  %v1216_v0 = vld [vmem:[#allocation22 + $0x8f0] sm:$0xff]  ;;  %v1401_v25 = vld [vmem:[#allocation22 + $0xeb8] sm:$0xff] }
 0x448   :  { %1975 = vmatpush.msrb.mxu3 %v1064_v45  ;;  %1988 = vmatpush.msrb.mxu0 %v1248_v47  ;;  %v1320_v1 = vld [vmem:[#allocation22 + $0xc30] sm:$0xff]  ;;  %v1001_v26 = vld [vmem:[#allocation22 + $0x238] sm:$0xff]  ;;  %v4651_v45 = vpop.f32.mrf.mxu2 }
 0x449   :  { %2011 = vmatpush.msra.mxu1 %v1352_v48  ;;  %1976 = vmatmul.f32.vlgmr.msrb.gmra.mxu3 %v4615_v28  ;;  %v1208_v5 = vld [vmem:[#allocation22 + $0x8b0] sm:$0xff]  ;;  %v1105_v27 = vld [vmem:[#allocation22 + $0x578] sm:$0xff] }
 0x44a   :  { %2040 = vmatpush.msra.mxu3 %v1185_v49  ;;  %1953 = vmatpush.msra.mxu2 %v952_v50  ;;  %v1200_v9 = vld [vmem:[#allocation22 + $0x870] sm:$0xff]  ;;  %v1289_v29 = vld [vmem:[#allocation22 + $0xb38] sm:$0xff] }
 0x44b   :  { %1989 = vmatpush.msrb.mxu0 %v1240_v51  ;;  %2012 = vmatpush.msra.mxu1 %v1344_v52  ;;  %v1192_v13 = vld [vmem:[#allocation22 + $0x830] sm:$0xff]  ;;  %v1393_v30 = vld [vmem:[#allocation22 + $0xe78] sm:$0xff] }
 0x44c   :  { %2041 = vmatpush.msra.mxu3 %v1177_v53  ;;  %1954 = vmatpush.msra.mxu2 %v944_v54  ;;  %v993_v31 = vld [vmem:[#allocation22 + $0x1f8] sm:$0xff]  ;;  %v2248_v54 = vld [vmem:[#allocation25 + $0x3e0] sm:$0xff] }
 0x44d   :  { %1990 = vmatpush.msrb.mxu0 %v1232_v55  ;;  %2013 = vmatpush.msra.mxu1 %v1336_v56  ;;  %v1097_v32 = vld [vmem:[#allocation22 + $0x538] sm:$0xff] }
 0x44e   :  { %2042 = vmatpush.msra.mxu3 %v1169_v58  ;;  %1955 = vmatpush.msra.mxu2 %v936_v59  ;;  %v1281_v33 = vld [vmem:[#allocation22 + $0xaf8] sm:$0xff]  ;;  %v4653_v59 = vpop.f32.mrf.mxu3 }
 0x44f   :  { %1991 = vmatpush.msrb.mxu0 %v1224_v60  ;;  %2014 = vmatpush.msra.mxu1 %v1328_v61  ;;  %v1385_v34 = vld [vmem:[#allocation22 + $0xe38] sm:$0xff]  ;;  %v2244_v60 = vld [vmem:[#allocation25 + $0x3c0] sm:$0xff] }
 0x450   :  { %1956 = vmatmul.f32.vlgmr.msra.gmra.mxu2 %v4618_v39  ;;  %2043 = vmatpush.msra.mxu3 %v1161_v62  ;;  %v985_v35 = vld [vmem:[#allocation22 + $0x1b8] sm:$0xff] }
 0x451   :  { %2020 = vmatpush.msrb.mxu2 %v1057_v63  ;;  %1992 = vmatpush.msrb.mxu0 %v1216_v0  ;;  %v1089_v36 = vld [vmem:[#allocation22 + $0x4f8] sm:$0xff]  ;;  %v2240_v0 = vld [vmem:[#allocation25 + $0x3a0] sm:$0xff] }
 0x452   :  { %2015 = vmatpush.msra.mxu1 %v1320_v1  ;;  %2044 = vmatpush.msra.mxu3 %v1153_v2  ;;  %v1273_v37 = vld [vmem:[#allocation22 + $0xab8] sm:$0xff] }
 0x453   :  { %2016 = vmatmul.f32.vlgmr.msra.gmra.mxu1 %v4621_v46  ;;  %2021 = vmatpush.msrb.mxu2 %v1049_v3  ;;  %v1377_v38 = vld [vmem:[#allocation22 + $0xdf8] sm:$0xff] }
 0x454   :  { %2080 = vmatpush.msrb.mxu1 %v1441_v4  ;;  %1993 = vmatpush.msrb.mxu0 %v1208_v5  ;;  %v977_v40 = vld [vmem:[#allocation22 + $0x178] sm:$0xff]  ;;  %v4656_v4 = vpop.f32.mrf.mxu0  ;;  %v1557_v5 = vpop.f32.mrf.mxu2 }
 0x455   :  { %2022 = vmatpush.msrb.mxu2 %v1041_v6  ;;  %2045 = vmatpush.msra.mxu3 %v1145_v7  ;;  %v1081_v41 = vld [vmem:[#allocation22 + $0x4b8] sm:$0xff]  ;;  %v2184_v6 = vld [vmem:[#allocation25 + $0x1e0] sm:$0xff] }
 0x456   :  { %2081 = vmatpush.msrb.mxu1 %v1433_v8  ;;  %1994 = vmatpush.msrb.mxu0 %v1200_v9  ;;  %v1265_v42 = vld [vmem:[#allocation22 + $0xa78] sm:$0xff]  ;;  %v2232_v9 = vld [vmem:[#allocation25 + $0x360] sm:$0xff] }
 0x457   :  { %2023 = vmatpush.msrb.mxu2 %v1033_v10  ;;  %2046 = vmatpush.msra.mxu3 %v1137_v11  ;;  %v1369_v43 = vld [vmem:[#allocation22 + $0xdb8] sm:$0xff]  ;;  %v2180_v10 = vld [vmem:[#allocation25 + $0x1c0] sm:$0xff]  ;;  %v4659_v11 = vpop.f32.mrf.mxu1 }
 0x458   :  { %2082 = vmatpush.msrb.mxu1 %v1425_v12  ;;  %1995 = vmatpush.msrb.mxu0 %v1192_v13  ;;  %v969_v44 = vld [vmem:[#allocation22 + $0x138] sm:$0xff]  ;;  %v4661_v12 = vld [vmem:[#allocation24] sm:$0xff]  ;;  %v2376_v13 = vld [vmem:[#allocation25 + $0x7e0] sm:$0xff] }
 0x459   :  { %1996 = vmatmul.f32.vlgmr.msrb.gmra.mxu0 %v4625_v57  ;;  %2024 = vmatpush.msrb.mxu2 %v1025_v14  ;;  %v1073_v47 = vld [vmem:[#allocation22 + $0x478] sm:$0xff] }
 0x45a   :  { %2047 = vmatpush.msra.mxu3 %v1129_v15  ;;  %2060 = vmatpush.msra.mxu0 %v1313_v16  ;;  %v1257_v48 = vld [vmem:[#allocation22 + $0xa38] sm:$0xff]  ;;  %v1445_v15 = vperm.slane %v4661_v12, 1  ;;  %v2176_v16 = vld [vmem:[#allocation25 + $0x1a0] sm:$0xff] }
 0x45b   :  { %2083 = vmatpush.msrb.mxu1 %v1417_v17  ;;  %2025 = vmatpush.msrb.mxu2 %v1017_v18  ;;  %v1361_v49 = vld [vmem:[#allocation22 + $0xd78] sm:$0xff]  ;;  %v2228_v17 = vld [vmem:[#allocation25 + $0x340] sm:$0xff]  ;;  %v1577_v18 = vpop.f32.mrf.mxu3 }
 0x45c   :  { %2048 = vmatpush.msra.mxu3 %v1121_v19  ;;  %2061 = vmatpush.msra.mxu0 %v1305_v20  ;;  %v961_v50 = vld [vmem:[#allocation22 + $0xf8] sm:$0xff]  ;;  %v2172_v20 = vld [vmem:[#allocation25 + $0x180] sm:$0xff] }
 0x45d   :  { %2084 = vmatpush.msrb.mxu1 %v1409_v21  ;;  %2026 = vmatpush.msrb.mxu2 %v1009_v22  ;;  %v1065_v51 = vld [vmem:[#allocation22 + $0x438] sm:$0xff]  ;;  %v2224_v21 = vld [vmem:[#allocation25 + $0x320] sm:$0xff]  ;;  %v4665_v22 = vpop.f32.mrf.mxu2 }
 0x45e   :  { %2049 = vmatpush.msra.mxu3 %v1113_v23  ;;  %2062 = vmatpush.msra.mxu0 %v1297_v24  ;;  %v1249_v52 = vld [vmem:[#allocation22 + $0x9f8] sm:$0xff]  ;;  %v2368_v23 = vld [vmem:[#allocation25 + $0x7a0] sm:$0xff] }
 0x45f   :  { %2085 = vmatpush.msrb.mxu1 %v1401_v25  ;;  %2027 = vmatpush.msrb.mxu2 %v1001_v26  ;;  %v1353_v53 = vld [vmem:[#allocation22 + $0xd38] sm:$0xff]  ;;  %v1558_v25 = vadd.f32 %v1557_v5, %v1445_v15  ;;  %v2168_v26 = vld [vmem:[#allocation25 + $0x160] sm:$0xff] }
 0x460   :  { %2050 = vmatpush.msra.mxu3 %v1105_v27  ;;  %2063 = vmatpush.msra.mxu0 %v1289_v29  ;;  %v953_v55 = vld [vmem:[#allocation22 + $0xb8] sm:$0xff]  ;;  %v1597_v27 = vpop.f32.mrf.mxu0  ;;  %v2312_v29 = vld [vmem:[#allocation25 + $0x5e0] sm:$0xff] }
 0x461   :  { %2086 = vmatpush.msrb.mxu1 %v1393_v30  ;;  %2028 = vmatpush.msrb.mxu2 %v993_v31  ;;  %v1241_v56 = vld [vmem:[#allocation22 + $0x9b8] sm:$0xff]  ;;  %v2364_v30 = vld [vmem:[#allocation25 + $0x780] sm:$0xff] }
 0x462   :  { %2051 = vmatpush.msra.mxu3 %v1097_v32  ;;  %2064 = vmatpush.msra.mxu0 %v1281_v33  ;;  %v1345_v58 = vld [vmem:[#allocation22 + $0xcf8] sm:$0xff]  ;;  %v2164_v31 = vld [vmem:[#allocation25 + $0x140] sm:$0xff]  ;;  %v1444_v32 = vperm.slane %v4661_v12, 0 }
 0x463   :  { %2087 = vmatpush.msrb.mxu1 %v1385_v34  ;;  %2029 = vmatpush.msrb.mxu2 %v985_v35  ;;  %v945_v61 = vld [vmem:[#allocation22 + $0x78] sm:$0xff]  ;;  %v2216_v33 = vld [vmem:[#allocation25 + $0x2e0] sm:$0xff]  ;;  %v1578_v35 = vadd.f32 %v1577_v18, %v1558_v25 }
 0x464   :  { %2052 = vmatpush.msra.mxu3 %v1089_v36  ;;  %2065 = vmatpush.msra.mxu0 %v1273_v37  ;;  %v1233_v62 = vld [vmem:[#allocation22 + $0x978] sm:$0xff]  ;;  %v2308_v34 = vld [vmem:[#allocation25 + $0x5c0] sm:$0xff] }
 0x465   :  { %2088 = vmatpush.msrb.mxu1 %v1377_v38  ;;  %2030 = vmatpush.msrb.mxu2 %v977_v40  ;;  %v1337_v63 = vld [vmem:[#allocation22 + $0xcb8] sm:$0xff]  ;;  %v2360_v36 = vld [vmem:[#allocation25 + $0x760] sm:$0xff]  ;;  %v1617_v38 = vpop.f32.mrf.mxu1  ;;  %v4669_v40 = vpop.f32.mrf.mxu3 }
 0x466   :  { %2053 = vmatpush.msra.mxu3 %v1081_v41  ;;  %2066 = vmatpush.msra.mxu0 %v1265_v42  ;;  %v937_v1 = vld [vmem:[#allocation22 + $0x38] sm:$0xff]  ;;  %v2160_v37 = vld [vmem:[#allocation25 + $0x120] sm:$0xff] }
 0x467   :  { %2089 = vmatpush.msrb.mxu1 %v1369_v43  ;;  %2031 = vmatpush.msrb.mxu2 %v969_v44  ;;  %v1225_v2 = vld [vmem:[#allocation22 + $0x938] sm:$0xff]  ;;  %v2212_v41 = vld [vmem:[#allocation25 + $0x2c0] sm:$0xff]  ;;  %v1447_v43 = vperm.slane %v4661_v12, 3 }
 0x468   :  { %2054 = vmatpush.msra.mxu3 %v1073_v47  ;;  %2067 = vmatpush.msra.mxu0 %v1257_v48  ;;  %v1329_v3 = vld [vmem:[#allocation22 + $0xc78] sm:$0xff]  ;;  %v2304_v42 = vld [vmem:[#allocation25 + $0x5a0] sm:$0xff]  ;;  %v1478_v47 = vadd.f32 %v4651_v45, %v1444_v32 }
 0x469   :  { %2090 = vmatpush.msrb.mxu1 %v1361_v49  ;;  %2032 = vmatpush.msrb.mxu2 %v961_v50  ;;  %v1217_v7 = vld [vmem:[#allocation22 + $0x8f8] sm:$0xff]  ;;  %v2156_v44 = vld [vmem:[#allocation25 + $0x100] sm:$0xff] }
 0x46a   :  { %2055 = vmatpush.msra.mxu3 %v1065_v51  ;;  %2068 = vmatpush.msra.mxu0 %v1249_v52  ;;  %v1321_v8 = vld [vmem:[#allocation22 + $0xc38] sm:$0xff]  ;;  %v2208_v49 = vld [vmem:[#allocation25 + $0x2a0] sm:$0xff]  ;;  %v1598_v51 = vadd.f32 %v1597_v27, %v1578_v35 }
 0x46b   :  { %2091 = vmatpush.msrb.mxu1 %v1353_v53  ;;  %2056 = vmatmul.f32.vlgmr.msra.gmra.mxu3 %v4615_v28  ;;  %v2236_v28 = vld [vmem:[#allocation25 + $0x380] sm:$0xff]  ;;  %v1209_v14 = vld [vmem:[#allocation22 + $0x8b8] sm:$0xff] }
 0x46c   :  { %2666 = vmatpush.msrb.mxu3 %v2248_v54  ;;  %2033 = vmatpush.msrb.mxu2 %v953_v55  ;;  %v1201_v19 = vld [vmem:[#allocation22 + $0x878] sm:$0xff]  ;;  %v2300_v50 = vld [vmem:[#allocation25 + $0x580] sm:$0xff]  ;;  %v4673_v54 = vpop.f32.mrf.mxu0 }
 0x46d   :  { %2069 = vmatpush.msra.mxu0 %v1241_v56  ;;  %2092 = vmatpush.msrb.mxu1 %v1345_v58  ;;  %v1193_v24 = vld [vmem:[#allocation22 + $0x838] sm:$0xff]  ;;  %v1717_v48 = vpop.f32.mrf.mxu2  ;;  %v2352_v52 = vld [vmem:[#allocation25 + $0x720] sm:$0xff]  ;;  %v4677_v5 = vpop.f32.mrf.mxu1 }
 0x46e   :  { %2667 = vmatpush.msrb.mxu3 %v2244_v60  ;;  %2034 = vmatpush.msrb.mxu2 %v945_v61  ;;  %v2152_v53 = vld [vmem:[#allocation25 + $0xe0] sm:$0xff]  ;;  %v1718_v58 = vadd.f32 %v1717_v48, %v1447_v43  ;;  %v1498_v61 = vadd.f32 %v4653_v59, %v1478_v47 }
 0x46f   :  { %2070 = vmatpush.msra.mxu0 %v1233_v62  ;;  %2093 = vmatpush.msrb.mxu1 %v1337_v63  ;;  %v2204_v55 = vld [vmem:[#allocation25 + $0x280] sm:$0xff] }
 0x470   :  { %2668 = vmatpush.msrb.mxu3 %v2240_v0  ;;  %2035 = vmatpush.msrb.mxu2 %v937_v1  ;;  %v2296_v56 = vld [vmem:[#allocation25 + $0x560] sm:$0xff]  ;;  %v1618_v0 = vadd.f32 %v1617_v38, %v1598_v51  ;;  %v1446_v1 = vperm.slane %v4661_v12, 2 }
 0x471   :  { %2071 = vmatpush.msra.mxu0 %v1225_v2  ;;  %2094 = vmatpush.msrb.mxu1 %v1329_v3  ;;  %v2348_v45 = vld [vmem:[#allocation25 + $0x700] sm:$0xff] }
 0x472   :  { %2036 = vmatmul.f32.vlgmr.msrb.gmra.mxu2 %v4618_v39  ;;  %2669 = vmatpush.msrb.mxu3 %v2236_v28  ;;  %v2372_v39 = vld [vmem:[#allocation25 + $0x7c0] sm:$0xff]  ;;  %v1737_v28 = vpop.f32.mrf.mxu3  ;;  %v2109_v15 = vmul.f32 0.01, %v1618_v0  ;;  %vm2101_vm14 = vcmp.ge.f32.partialorder %v1618_v0, 0.0 }
 0x473   :  { %2646 = vmatpush.msra.mxu2 %v2184_v6  ;;  %2072 = vmatpush.msra.mxu0 %v1217_v7  ;;  %v2148_v60 = vld [vmem:[#allocation25 + $0xc0] sm:$0xff] }
 0x474   :  { %2095 = vmatpush.msrb.mxu1 %v1321_v8  ;;  %2670 = vmatpush.msrb.mxu3 %v2232_v9  ;;  %v2200_v62 = vld [vmem:[#allocation25 + $0x260] sm:$0xff]  ;;  %v1738_v8 = vadd.f32 %v1737_v28, %v1718_v58 }
 0x475   :  { %2096 = vmatmul.f32.vlgmr.msrb.gmra.mxu1 %v4621_v46  ;;  %2647 = vmatpush.msra.mxu2 %v2180_v10  ;;  %v2220_v46 = vld [vmem:[#allocation25 + $0x300] sm:$0xff]  ;;  %v1518_v10 = vadd.f32 %v4656_v4, %v1498_v61 }
 0x476   :  { %2706 = vmatpush.msra.mxu1 %v2376_v13  ;;  %2073 = vmatpush.msra.mxu0 %v1209_v14  ;;  %v2292_v63 = vld [vmem:[#allocation25 + $0x540] sm:$0xff] }
 0x477   :  { %2648 = vmatpush.msra.mxu2 %v2176_v16  ;;  %2671 = vmatpush.msrb.mxu3 %v2228_v17  ;;  %v2344_v2 = vld [vmem:[#allocation25 + $0x6e0] sm:$0xff]  ;;  %v1638_v16 = vadd.f32 %v4665_v22, %v1446_v1 }
 0x478   :  { %2707 = vmatpush.msra.mxu1 %v2372_v39  ;;  %2074 = vmatpush.msra.mxu0 %v1201_v19  ;;  %v2144_v3 = vld [vmem:[#allocation25 + $0xa0] sm:$0xff]  ;;  %v1757_v39 = vpop.f32.mrf.mxu0 }
 0x479   :  { %2649 = vmatpush.msra.mxu2 %v2172_v20  ;;  %2672 = vmatpush.msrb.mxu3 %v2224_v21  ;;  %v2196_v6 = vld [vmem:[#allocation25 + $0x240] sm:$0xff]  ;;  %v1758_v21 = vadd.f32 %v1757_v39, %v1738_v8  ;;  %v1658_v25 = vadd.f32 %v4669_v40, %v1638_v16 }
 0x47a   :  { %2708 = vmatpush.msra.mxu1 %v2368_v23  ;;  %2075 = vmatpush.msra.mxu0 %v1193_v24  ;;  %v2288_v7 = vld [vmem:[#allocation25 + $0x520] sm:$0xff]  ;;  %v1538_v23 = vadd.f32 %v4659_v11, %v1518_v10 }
 0x47b   :  { %2076 = vmatmul.f32.vlgmr.msra.gmra.mxu0 %v4625_v57  ;;  %2650 = vmatpush.msra.mxu2 %v2168_v26  ;;  %v2356_v57 = vld [vmem:[#allocation25 + $0x740] sm:$0xff]  ;;  %v4683_v26 = vsel %vm2101_vm14, %v1618_v0, %v2109_v15 }
 0x47c   :  { %2673 = vmatpush.msrb.mxu3 %v2220_v46  ;;  %2686 = vmatpush.msrb.mxu0 %v2312_v29  ;;  %v2340_v59 = vld [vmem:[#allocation25 + $0x6c0] sm:$0xff]  ;;  %v1777_v29 = vpop.f32.mrf.mxu1  ;;  %vm2100_vm15 = vcmp.ge.f32.partialorder %v1538_v23, 0.0 }
 0x47d   :  { %2709 = vmatpush.msra.mxu1 %v2364_v30  ;;  %2651 = vmatpush.msra.mxu2 %v2164_v31  ;;  %v2140_v9 = vld [vmem:[#allocation25 + $0x80] sm:$0xff]  ;;  %v1778_v32 = vadd.f32 %v1777_v29, %v1758_v21 }
 0x47e   :  { %2674 = vmatpush.msrb.mxu3 %v2216_v33  ;;  %2687 = vmatpush.msrb.mxu0 %v2308_v34  ;;  %v2192_v13 = vld [vmem:[#allocation25 + $0x220] sm:$0xff]  ;;  %v2108_v34 = vmul.f32 0.01, %v1538_v23 }
 0x47f   :  { %2710 = vmatpush.msra.mxu1 %v2360_v36  ;;  %2652 = vmatpush.msra.mxu2 %v2160_v37  ;;  %v2284_v14 = vld [vmem:[#allocation25 + $0x500] sm:$0xff]  ;;  %v1678_v37 = vadd.f32 %v4673_v54, %v1658_v25  ;;  %vm2103_vm0 = vcmp.ge.f32.partialorder %v1778_v32, 0.0 }
 0x480   :  { %2675 = vmatpush.msrb.mxu3 %v2212_v41  ;;  %2688 = vmatpush.msrb.mxu0 %v2304_v42  ;;  %v2336_v17 = vld [vmem:[#allocation25 + $0x6a0] sm:$0xff]  ;;  %v2111_v42 = vmul.f32 0.01, %v1778_v32 }
 0x481   :  { %2711 = vmatpush.msra.mxu1 %v2356_v57  ;;  %2653 = vmatpush.msra.mxu2 %v2156_v44  ;;  %v2136_v18 = vld [vmem:[#allocation25 + $0x60] sm:$0xff]  ;;  %v4687_v44 = vsel %vm2100_vm15, %v1538_v23, %v2108_v34 }
 0x482   :  { %2676 = vmatpush.msrb.mxu3 %v2208_v49  ;;  %2689 = vmatpush.msrb.mxu0 %v2300_v50  ;;  %v2188_v19 = vld [vmem:[#allocation25 + $0x200] sm:$0xff]  ;;  %v1698_v49 = vadd.f32 %v4677_v5, %v1678_v37 }
 0x483   :  { %2712 = vmatpush.msra.mxu1 %v2352_v52  ;;  %2654 = vmatpush.msra.mxu2 %v2152_v53  ;;  %v2280_v20 = vld [vmem:[#allocation25 + $0x4e0] sm:$0xff]  ;;  %v4691_v53 = vsel %vm2103_vm0, %v1778_v32, %v2111_v42 }
 0x484   :  { %2677 = vmatpush.msrb.mxu3 %v2204_v55  ;;  %2690 = vmatpush.msrb.mxu0 %v2296_v56  ;;  %v2332_v4 = vld [vmem:[#allocation25 + $0x680] sm:$0xff]  ;;  %v2110_v58 = vmul.f32 0.01, %v1698_v49  ;;  %vm2102_vm1 = vcmp.ge.f32.partialorder %v1698_v49, 0.0 }
 0x485   :  { %2713 = vmatpush.msra.mxu1 %v2348_v45  ;;  %2655 = vmatpush.msra.mxu2 %v2148_v60  ;;  %v2504_v24 = vld [vmem:[#allocation25 + $0xbe0] sm:$0xff] }
 0x486   :  { %2678 = vmatpush.msrb.mxu3 %v2200_v62  ;;  %2691 = vmatpush.msrb.mxu0 %v2292_v63  ;;  %v2132_v22 = vld [vmem:[#allocation25 + $0x40] sm:$0xff]  ;;  %v1448_v63 = vperm.slane %v4661_v12, 4 }
 0x487   :  { %2714 = vmatpush.msra.mxu1 %v2344_v2  ;;  %2656 = vmatpush.msra.mxu2 %v2144_v3  ;;  %v2276_v27 = vld [vmem:[#allocation25 + $0x4c0] sm:$0xff]  ;;  %v4695_v3 = vsel %vm2102_vm1, %v1698_v49, %v2110_v58 }
 0x488   :  { %2679 = vmatpush.msrb.mxu3 %v2196_v6  ;;  %2692 = vmatpush.msrb.mxu0 %v2288_v7  ;;  %v2328_v46 = vld [vmem:[#allocation25 + $0x660] sm:$0xff]  ;;  %v1817_v15 = vpop.f32.mrf.mxu3 }
 0x489   :  { %2715 = vmatpush.msra.mxu1 %v2340_v59  ;;  %2657 = vmatpush.msra.mxu2 %v2140_v9  ;;  %v2500_v30 = vld [vmem:[#allocation25 + $0xbc0] sm:$0xff] }
 0x48a   :  { %2680 = vmatpush.msrb.mxu3 %v2192_v13  ;;  %2693 = vmatpush.msrb.mxu0 %v2284_v14  ;;  %v2128_v31 = vld [vmem:[#allocation25 + $0x20] sm:$0xff] }
 0x48b   :  { %2716 = vmatpush.msra.mxu1 %v2336_v17  ;;  %2658 = vmatpush.msra.mxu2 %v2136_v18  ;;  %v2272_v11 = vld [vmem:[#allocation25 + $0x4a0] sm:$0xff] }
 0x48c   :  { %2681 = vmatpush.msrb.mxu3 %v2188_v19  ;;  %2694 = vmatpush.msrb.mxu0 %v2280_v20  ;;  %v2324_v33 = vld [vmem:[#allocation25 + $0x640] sm:$0xff]  ;;  %v1857_v32 = vpop.f32.mrf.mxu1 }
 0x48d   :  { %2717 = vmatpush.msra.mxu1 %v2332_v4  ;;  %2682 = vmatmul.f32.vlgmr.msrb.gmra.mxu3 %v4683_v26  ;;  %v2496_v35 = vld [vmem:[#allocation25 + $0xba0] sm:$0xff] }
 0x48e   :  { %2746 = vmatpush.msra.mxu3 %v2504_v24  ;;  %2659 = vmatpush.msra.mxu2 %v2132_v22  ;;  %v2124_v36 = vld [vmem:[#allocation25] sm:$0xff] }
 0x48f   :  { %2695 = vmatpush.msrb.mxu0 %v2276_v27  ;;  %2718 = vmatpush.msra.mxu1 %v2328_v46  ;;  %v2268_v38 = vld [vmem:[#allocation25 + $0x480] sm:$0xff]  ;;  %v1797_v2 = vpop.f32.mrf.mxu2 }
 0x490   :  { %2747 = vmatpush.msra.mxu3 %v2500_v30  ;;  %2660 = vmatpush.msra.mxu2 %v2128_v31  ;;  %v2320_v40 = vld [vmem:[#allocation25 + $0x620] sm:$0xff]  ;;  %v1798_v8 = vadd.f32 %v1797_v2, %v1448_v63  ;;  %v2181_v63 = vld [vmem:[#allocation25 + $0x1c8] sm:$0xff] }
 0x491   :  { %2696 = vmatpush.msrb.mxu0 %v2272_v11  ;;  %2719 = vmatpush.msra.mxu1 %v2324_v33  ;;  %v2492_v41 = vld [vmem:[#allocation25 + $0xb80] sm:$0xff]  ;;  %v2249_v33 = vld [vmem:[#allocation25 + $0x3e8] sm:$0xff] }
 0x492   :  { %2748 = vmatpush.msra.mxu3 %v2496_v35  ;;  %2661 = vmatpush.msra.mxu2 %v2124_v36  ;;  %v2440_v43 = vld [vmem:[#allocation25 + $0x9e0] sm:$0xff]  ;;  %v1818_v17 = vadd.f32 %v1817_v15, %v1798_v8  ;;  %v1837_v4 = vpop.f32.mrf.mxu0 }
 0x493   :  { %v2264_v57 = vld [vmem:[#allocation25 + $0x460] sm:$0xff]  ;;  %2697 = vmatpush.msrb.mxu0 %v2268_v38  ;;  %2720 = vmatpush.msra.mxu1 %v2320_v40  ;;  %v2245_v38 = vld [vmem:[#allocation25 + $0x3c8] sm:$0xff] }
 0x494   :  { %v2316_v47 = vld [vmem:[#allocation25 + $0x600] sm:$0xff]  ;;  %2662 = vmatmul.f32.vlgmr.msra.gmra.mxu2 %v4687_v44  ;;  %2749 = vmatpush.msra.mxu3 %v2492_v41  ;;  %v1838_v24 = vadd.f32 %v1837_v4, %v1818_v17  ;;  %v2213_v4 = vld [vmem:[#allocation25 + $0x2c8] sm:$0xff] }
 0x495   :  { %v2488_v48 = vld [vmem:[#allocation25 + $0xb60] sm:$0xff]  ;;  %2726 = vmatpush.msrb.mxu2 %v2440_v43  ;;  %2698 = vmatpush.msrb.mxu0 %v2264_v57  ;;  %v2241_v43 = vld [vmem:[#allocation25 + $0x3a8] sm:$0xff]  ;;  %v1449_v57 = vperm.slane %v4661_v12, 5 }
 0x496   :  { %v2436_v50 = vld [vmem:[#allocation25 + $0x9c0] sm:$0xff]  ;;  %2721 = vmatpush.msra.mxu1 %v2316_v47  ;;  %2750 = vmatpush.msra.mxu3 %v2488_v48  ;;  %v1858_v34 = vadd.f32 %v1857_v32, %v1838_v24  ;;  %v2309_v24 = vld [vmem:[#allocation25 + $0x5c8] sm:$0xff] }
 0x497   :  { %v2260_v51 = vld [vmem:[#allocation25 + $0x440] sm:$0xff]  ;;  %2722 = vmatmul.f32.vlgmr.msra.gmra.mxu1 %v4691_v53  ;;  %2727 = vmatpush.msrb.mxu2 %v2436_v50  ;;  %v2301_v32 = vld [vmem:[#allocation25 + $0x588] sm:$0xff] }
 0x498   :  { %v2484_v52 = vld [vmem:[#allocation25 + $0xb40] sm:$0xff]  ;;  %2699 = vmatpush.msrb.mxu0 %v2260_v51  ;;  %v2112_v47 = vmul.f32 0.01, %v1858_v34  ;;  %vm2104_vm2 = vcmp.ge.f32.partialorder %v1858_v34, 0.0  ;;  %v2237_v51 = vld [vmem:[#allocation25 + $0x388] sm:$0xff] }
 0x499   :  { %v2432_v54 = vld [vmem:[#allocation25 + $0x9a0] sm:$0xff]  ;;  %2751 = vmatpush.msra.mxu3 %v2484_v52 }
 0x49a   :  { %v2256_v55 = vld [vmem:[#allocation25 + $0x420] sm:$0xff]  ;;  %2728 = vmatpush.msrb.mxu2 %v2432_v54 }
 0x49b   :  { %v2480_v56 = vld [vmem:[#allocation25 + $0xb20] sm:$0xff]  ;;  %2700 = vmatpush.msrb.mxu0 %v2256_v55  ;;  %v2185_v55 = vld [vmem:[#allocation25 + $0x1e8] sm:$0xff] }
 0x49c   :  { %v2428_v45 = vld [vmem:[#allocation25 + $0x980] sm:$0xff]  ;;  %2752 = vmatpush.msra.mxu3 %v2480_v56  ;;  %v2233_v56 = vld [vmem:[#allocation25 + $0x368] sm:$0xff] }
 0x49d   :  { %v2252_v60 = vld [vmem:[#allocation25 + $0x400] sm:$0xff]  ;;  %2729 = vmatpush.msrb.mxu2 %v2428_v45  ;;  %v4699_v45 = vsel %vm2104_vm2, %v1858_v34, %v2112_v47  ;;  %v2201_v34 = vld [vmem:[#allocation25 + $0x268] sm:$0xff] }
 0x49e   :  { %v2476_v61 = vld [vmem:[#allocation25 + $0xb00] sm:$0xff]  ;;  %2701 = vmatpush.msrb.mxu0 %v2252_v60 }
 0x49f   :  { %v2424_v62 = vld [vmem:[#allocation25 + $0x960] sm:$0xff]  ;;  %2753 = vmatpush.msra.mxu3 %v2476_v61  ;;  %2702 = vmatmul.f32.vlgmr.msrb.gmra.mxu0 %v4695_v3 }
 0x4a0   :  { %v2472_v0 = vld [vmem:[#allocation25 + $0xae0] sm:$0xff]  ;;  %2730 = vmatpush.msrb.mxu2 %v2424_v62 }
 0x4a1   :  { %v2568_v1 = vld [vmem:[#allocation25 + $0xde0] sm:$0xff]  ;;  %2754 = vmatpush.msra.mxu3 %v2472_v0  ;;  %v2229_v0 = vld [vmem:[#allocation25 + $0x348] sm:$0xff] }
 0x4a2   :  { %v2420_v5 = vld [vmem:[#allocation25 + $0x940] sm:$0xff]  ;;  %2766 = vmatpush.msra.mxu0 %v2568_v1 }
 0x4a3   :  { %v2468_v28 = vld [vmem:[#allocation25 + $0xac0] sm:$0xff]  ;;  %2731 = vmatpush.msrb.mxu2 %v2420_v5 }
 0x4a4   :  { %v2564_v6 = vld [vmem:[#allocation25 + $0xdc0] sm:$0xff]  ;;  %2755 = vmatpush.msra.mxu3 %v2468_v28 }
 0x4a5   :  { %v2416_v7 = vld [vmem:[#allocation25 + $0x920] sm:$0xff]  ;;  %2767 = vmatpush.msra.mxu0 %v2564_v6  ;;  %v2177_v6 = vld [vmem:[#allocation25 + $0x1a8] sm:$0xff] }
 0x4a6   :  { %v2464_v59 = vld [vmem:[#allocation25 + $0xaa0] sm:$0xff]  ;;  %2732 = vmatpush.msrb.mxu2 %v2416_v7  ;;  %v2225_v7 = vld [vmem:[#allocation25 + $0x328] sm:$0xff] }
 0x4a7   :  { %v2560_v9 = vld [vmem:[#allocation25 + $0xda0] sm:$0xff]  ;;  %2756 = vmatpush.msra.mxu3 %v2464_v59 }
 0x4a8   :  { %v2412_v10 = vld [vmem:[#allocation25 + $0x900] sm:$0xff]  ;;  %2768 = vmatpush.msra.mxu0 %v2560_v9 }
 0x4a9   :  { %v2460_v13 = vld [vmem:[#allocation25 + $0xa80] sm:$0xff]  ;;  %2733 = vmatpush.msrb.mxu2 %v2412_v10 }
 0x4aa   :  { %v2556_v14 = vld [vmem:[#allocation25 + $0xd80] sm:$0xff]  ;;  %2757 = vmatpush.msra.mxu3 %v2460_v13  ;;  %v1897_v60 = vpop.f32.mrf.mxu3  ;;  %v2173_v13 = vld [vmem:[#allocation25 + $0x188] sm:$0xff] }
 0x4ab   :  { %v2408_v16 = vld [vmem:[#allocation25 + $0x8e0] sm:$0xff]  ;;  %2769 = vmatpush.msra.mxu0 %v2556_v14  ;;  %v2221_v14 = vld [vmem:[#allocation25 + $0x308] sm:$0xff] }
 0x4ac   :  { %v2456_v18 = vld [vmem:[#allocation25 + $0xa60] sm:$0xff]  ;;  %2734 = vmatpush.msrb.mxu2 %v2408_v16 }
 0x4ad   :  { %v2552_v39 = vld [vmem:[#allocation25 + $0xd60] sm:$0xff]  ;;  %2758 = vmatpush.msra.mxu3 %v2456_v18  ;;  %v2169_v18 = vld [vmem:[#allocation25 + $0x168] sm:$0xff] }
 0x4ae   :  { %v2404_v19 = vld [vmem:[#allocation25 + $0x8c0] sm:$0xff]  ;;  %2770 = vmatpush.msra.mxu0 %v2552_v39  ;;  %v1937_v59 = vpop.f32.mrf.mxu1 }
 0x4af   :  { %v2452_v20 = vld [vmem:[#allocation25 + $0xa40] sm:$0xff]  ;;  %2735 = vmatpush.msrb.mxu2 %v2404_v19  ;;  %v2217_v19 = vld [vmem:[#allocation25 + $0x2e8] sm:$0xff] }
 0x4b0   :  { %v2548_v21 = vld [vmem:[#allocation25 + $0xd40] sm:$0xff]  ;;  %2759 = vmatpush.msra.mxu3 %v2452_v20  ;;  %v2313_v20 = vld [vmem:[#allocation25 + $0x5e8] sm:$0xff] }
 0x4b1   :  { %v2400_v23 = vld [vmem:[#allocation25 + $0x8a0] sm:$0xff]  ;;  %2771 = vmatpush.msra.mxu0 %v2548_v21  ;;  %v1877_v52 = vpop.f32.mrf.mxu2  ;;  %v2165_v21 = vld [vmem:[#allocation25 + $0x148] sm:$0xff] }
 0x4b2   :  { %v2448_v22 = vld [vmem:[#allocation25 + $0xa20] sm:$0xff]  ;;  %2736 = vmatpush.msrb.mxu2 %v2400_v23  ;;  %v1878_v58 = vadd.f32 %v1877_v52, %v1449_v57  ;;  %v2289_v57 = vld [vmem:[#allocation25 + $0x528] sm:$0xff] }
 0x4b3   :  { %v2544_v25 = vld [vmem:[#allocation25 + $0xd20] sm:$0xff]  ;;  %2760 = vmatpush.msra.mxu3 %v2448_v22  ;;  %v2137_v52 = vld [vmem:[#allocation25 + $0x68] sm:$0xff] }
 0x4b4   :  { %v2632_v27 = vld [vmem:[#allocation25 + $0xfe0] sm:$0xff]  ;;  %2772 = vmatpush.msra.mxu0 %v2544_v25  ;;  %v1898_v1 = vadd.f32 %v1897_v60, %v1878_v58  ;;  %v1917_v2 = vpop.f32.mrf.mxu0  ;;  %v2161_v25 = vld [vmem:[#allocation25 + $0x128] sm:$0xff] }
 0x4b5   :  { %v2396_v46 = vld [vmem:[#allocation25 + $0x880] sm:$0xff]  ;;  %2786 = vmatpush.msrb.mxu1 %v2632_v27  ;;  %v2209_v27 = vld [vmem:[#allocation25 + $0x2a8] sm:$0xff] }
 0x4b6   :  { %v2444_v29 = vld [vmem:[#allocation25 + $0xa00] sm:$0xff]  ;;  %2737 = vmatpush.msrb.mxu2 %v2396_v46  ;;  %v1918_v8 = vadd.f32 %v1917_v2, %v1898_v1  ;;  %v2305_v46 = vld [vmem:[#allocation25 + $0x5a8] sm:$0xff] }
 0x4b7   :  { %v2540_v30 = vld [vmem:[#allocation25 + $0xd00] sm:$0xff]  ;;  %2761 = vmatpush.msra.mxu3 %v2444_v29  ;;  %v2497_v60 = vld [vmem:[#allocation25 + $0xba8] sm:$0xff] }
 0x4b8   :  { %v2628_v31 = vld [vmem:[#allocation25 + $0xfc0] sm:$0xff]  ;;  %2773 = vmatpush.msra.mxu0 %v2540_v30  ;;  %v1938_v15 = vadd.f32 %v1937_v59, %v1918_v8  ;;  %v2157_v30 = vld [vmem:[#allocation25 + $0x108] sm:$0xff] }
 0x4b9   :  { %v2392_v11 = vld [vmem:[#allocation25 + $0x860] sm:$0xff]  ;;  %2787 = vmatpush.msrb.mxu1 %v2628_v31  ;;  %2826 = vmatpush.msrb.mxu3 %v2249_v33  ;;  %v2205_v31 = vld [vmem:[#allocation25 + $0x288] sm:$0xff] }
 0x4ba   :  { %v2536_v35 = vld [vmem:[#allocation25 + $0xce0] sm:$0xff]  ;;  %2738 = vmatpush.msrb.mxu2 %v2392_v11  ;;  %v2113_v39 = vmul.f32 0.01, %v1938_v15  ;;  %vm2105_vm3 = vcmp.ge.f32.partialorder %v1938_v15, 0.0  ;;  %v2153_v33 = vld [vmem:[#allocation25 + $0xe8] sm:$0xff] }
 0x4bb   :  { %v2624_v36 = vld [vmem:[#allocation25 + $0xfa0] sm:$0xff]  ;;  %2774 = vmatpush.msra.mxu0 %v2536_v35  ;;  %2827 = vmatpush.msrb.mxu3 %v2245_v38  ;;  %v2297_v35 = vld [vmem:[#allocation25 + $0x568] sm:$0xff] }
 0x4bc   :  { %v2388_v37 = vld [vmem:[#allocation25 + $0x840] sm:$0xff]  ;;  %2788 = vmatpush.msrb.mxu1 %v2624_v36  ;;  %v4702_v23 = vsel %vm2105_vm3, %v1938_v15, %v2113_v39  ;;  %v2197_v38 = vld [vmem:[#allocation25 + $0x248] sm:$0xff] }
 0x4bd   :  { %v2532_v40 = vld [vmem:[#allocation25 + $0xcc0] sm:$0xff]  ;;  %2739 = vmatpush.msrb.mxu2 %v2388_v37  ;;  %2828 = vmatpush.msrb.mxu3 %v2241_v43  ;;  %v2149_v37 = vld [vmem:[#allocation25 + $0xc8] sm:$0xff] }
 0x4be   :  { %v2620_v41 = vld [vmem:[#allocation25 + $0xf80] sm:$0xff]  ;;  %2775 = vmatpush.msra.mxu0 %v2532_v40  ;;  %2762 = vmatmul.f32.vlgmr.msra.gmra.mxu3 %v4702_v23  ;;  %v2293_v40 = vld [vmem:[#allocation25 + $0x548] sm:$0xff] }
 0x4bf   :  { %v2384_v42 = vld [vmem:[#allocation25 + $0x820] sm:$0xff]  ;;  %2789 = vmatpush.msrb.mxu1 %v2620_v41  ;;  %2829 = vmatpush.msrb.mxu3 %v2237_v51  ;;  %v2193_v43 = vld [vmem:[#allocation25 + $0x228] sm:$0xff] }
 0x4c0   :  { %v2528_v48 = vld [vmem:[#allocation25 + $0xca0] sm:$0xff]  ;;  %2740 = vmatpush.msrb.mxu2 %v2384_v42  ;;  %v2145_v42 = vld [vmem:[#allocation25 + $0xa8] sm:$0xff] }
 0x4c1   :  { %v2616_v49 = vld [vmem:[#allocation25 + $0xf60] sm:$0xff]  ;;  %2776 = vmatpush.msra.mxu0 %v2528_v48  ;;  %2830 = vmatpush.msrb.mxu3 %v2233_v56  ;;  %v2141_v48 = vld [vmem:[#allocation25 + $0x88] sm:$0xff] }
 0x4c2   :  { %v2380_v50 = vld [vmem:[#allocation25 + $0x800] sm:$0xff]  ;;  %2790 = vmatpush.msrb.mxu1 %v2616_v49  ;;  %v2189_v49 = vld [vmem:[#allocation25 + $0x208] sm:$0xff] }
 0x4c3   :  { %v2524_v54 = vld [vmem:[#allocation25 + $0xc80] sm:$0xff]  ;;  %2741 = vmatpush.msrb.mxu2 %v2380_v50  ;;  %2831 = vmatpush.msrb.mxu3 %v2229_v0  ;;  %v2505_v50 = vld [vmem:[#allocation25 + $0xbe8] sm:$0xff] }
 0x4c4   :  { %v2520_v61 = vld [vmem:[#allocation25 + $0xc60] sm:$0xff]  ;;  %2742 = vmatmul.f32.vlgmr.msrb.gmra.mxu2 %v4699_v45  ;;  %2777 = vmatpush.msra.mxu0 %v2524_v54  ;;  %v2285_v51 = vld [vmem:[#allocation25 + $0x508] sm:$0xff] }
 0x4c5   :  { %v2612_v62 = vld [vmem:[#allocation25 + $0xf40] sm:$0xff]  ;;  %2806 = vmatpush.msra.mxu2 %v2185_v55  ;;  %2832 = vmatpush.msrb.mxu3 %v2225_v7  ;;  %v2501_v54 = vld [vmem:[#allocation25 + $0xbc8] sm:$0xff] }
 0x4c6   :  { %v2516_v5 = vld [vmem:[#allocation25 + $0xc40] sm:$0xff]  ;;  %2778 = vmatpush.msra.mxu0 %v2520_v61  ;;  %2791 = vmatpush.msrb.mxu1 %v2612_v62  ;;  %v2281_v55 = vld [vmem:[#allocation25 + $0x4e8] sm:$0xff] }
 0x4c7   :  { %v2608_v28 = vld [vmem:[#allocation25 + $0xf20] sm:$0xff]  ;;  %2807 = vmatpush.msra.mxu2 %v2181_v63  ;;  %2833 = vmatpush.msrb.mxu3 %v2221_v14  ;;  %v2133_v56 = vld [vmem:[#allocation25 + $0x48] sm:$0xff] }
 0x4c8   :  { %v2512_v9 = vld [vmem:[#allocation25 + $0xc20] sm:$0xff]  ;;  %2779 = vmatpush.msra.mxu0 %v2516_v5  ;;  %2792 = vmatpush.msrb.mxu1 %v2608_v28  ;;  %v2277_v61 = vld [vmem:[#allocation25 + $0x4c8] sm:$0xff]  ;;  %v1450_v5 = vperm.slane %v4661_v12, 6 }
 0x4c9   :  { %v2604_v10 = vld [vmem:[#allocation25 + $0xf00] sm:$0xff]  ;;  %2808 = vmatpush.msra.mxu2 %v2177_v6  ;;  %2834 = vmatpush.msrb.mxu3 %v2217_v19  ;;  %v2129_v62 = vld [vmem:[#allocation25 + $0x28] sm:$0xff] }
 0x4ca   :  { %v2508_v16 = vld [vmem:[#allocation25 + $0xc00] sm:$0xff]  ;;  %2780 = vmatpush.msra.mxu0 %v2512_v9  ;;  %2793 = vmatpush.msrb.mxu1 %v2604_v10  ;;  %v2377_v63 = vld [vmem:[#allocation25 + $0x7e8] sm:$0xff] }
 0x4cb   :  { %v2600_v17 = vld [vmem:[#allocation25 + $0xee0] sm:$0xff]  ;;  %2809 = vmatpush.msra.mxu2 %v2173_v13  ;;  %2835 = vmatpush.msrb.mxu3 %v2213_v4  ;;  %v2493_v0 = vld [vmem:[#allocation25 + $0xb88] sm:$0xff] }
 0x4cc   :  { %2781 = vmatpush.msra.mxu0 %v2508_v16  ;;  %2794 = vmatpush.msrb.mxu1 %v2600_v17  ;;  %v2596_v22 = vld [vmem:[#allocation25 + $0xec0] sm:$0xff]  ;;  %v2273_v1 = vld [vmem:[#allocation25 + $0x4a8] sm:$0xff]  ;;  %v1977_v12 = vpop.f32.mrf.mxu3 }
 0x4cd   :  { %2810 = vmatpush.msra.mxu2 %v2169_v18  ;;  %v2592_v29 = vld [vmem:[#allocation25 + $0xea0] sm:$0xff]  ;;  %2836 = vmatpush.msrb.mxu3 %v2209_v27  ;;  %v2125_v2 = vld [vmem:[#allocation25 + $0x8] sm:$0xff] }
 0x4ce   :  { %2846 = vmatpush.msrb.mxu0 %v2313_v20  ;;  %2795 = vmatpush.msrb.mxu1 %v2596_v22  ;;  %v2588_v11 = vld [vmem:[#allocation25 + $0xe80] sm:$0xff]  ;;  %v2373_v28 = vld [vmem:[#allocation25 + $0x7c8] sm:$0xff] }
 0x4cf   :  { %2811 = vmatpush.msra.mxu2 %v2165_v21  ;;  %2837 = vmatpush.msrb.mxu3 %v2205_v31  ;;  %v2584_v36 = vld [vmem:[#allocation25 + $0xe60] sm:$0xff]  ;;  %v2489_v6 = vld [vmem:[#allocation25 + $0xb68] sm:$0xff] }
 0x4d0   :  { %2847 = vmatpush.msrb.mxu0 %v2309_v24  ;;  %2796 = vmatpush.msrb.mxu1 %v2592_v29  ;;  %v2580_v41 = vld [vmem:[#allocation25 + $0xe40] sm:$0xff]  ;;  %v2441_v7 = vld [vmem:[#allocation25 + $0x9e8] sm:$0xff]  ;;  %v2017_v27 = vpop.f32.mrf.mxu1 }
 0x4d1   :  { %2812 = vmatpush.msra.mxu2 %v2161_v25  ;;  %2838 = vmatpush.msrb.mxu3 %v2201_v34  ;;  %v2576_v47 = vld [vmem:[#allocation25 + $0xe20] sm:$0xff]  ;;  %v2269_v8 = vld [vmem:[#allocation25 + $0x488] sm:$0xff] }
 0x4d2   :  { %2848 = vmatpush.msrb.mxu0 %v2305_v46  ;;  %2797 = vmatpush.msrb.mxu1 %v2588_v11  ;;  %v2572_v58 = vld [vmem:[#allocation25 + $0xe00] sm:$0xff]  ;;  %v2485_v59 = vld [vmem:[#allocation25 + $0xb48] sm:$0xff] }
 0x4d3   :  { %2813 = vmatpush.msra.mxu2 %v2157_v30  ;;  %2839 = vmatpush.msrb.mxu3 %v2197_v38  ;;  %v1957_v9 = vpop.f32.mrf.mxu2  ;;  %v2369_v10 = vld [vmem:[#allocation25 + $0x7a8] sm:$0xff] }
 0x4d4   :  { %2849 = vmatpush.msrb.mxu0 %v2301_v32  ;;  %2798 = vmatpush.msrb.mxu1 %v2584_v36  ;;  %v2437_v13 = vld [vmem:[#allocation25 + $0x9c8] sm:$0xff]  ;;  %v1958_v14 = vadd.f32 %v1957_v9, %v1450_v5  ;;  %v2242_v9 = vld [vmem:[#allocation25 + $0x3b0] sm:$0xff] }
 0x4d5   :  { %2814 = vmatpush.msra.mxu2 %v2153_v33  ;;  %2840 = vmatpush.msrb.mxu3 %v2193_v43  ;;  %v2265_v15 = vld [vmem:[#allocation25 + $0x468] sm:$0xff] }
 0x4d6   :  { %2850 = vmatpush.msrb.mxu0 %v2297_v35  ;;  %2799 = vmatpush.msrb.mxu1 %v2580_v41  ;;  %v2481_v16 = vld [vmem:[#allocation25 + $0xb28] sm:$0xff]  ;;  %v1978_v39 = vadd.f32 %v1977_v12, %v1958_v14  ;;  %v1997_v21 = vpop.f32.mrf.mxu0 }
 0x4d7   :  { %2815 = vmatpush.msra.mxu2 %v2149_v37  ;;  %2841 = vmatpush.msrb.mxu3 %v2189_v49  ;;  %v2365_v17 = vld [vmem:[#allocation25 + $0x788] sm:$0xff] }
 0x4d8   :  { %2851 = vmatpush.msrb.mxu0 %v2293_v40  ;;  %2800 = vmatpush.msrb.mxu1 %v2576_v47  ;;  %v2433_v18 = vld [vmem:[#allocation25 + $0x9a8] sm:$0xff]  ;;  %v1998_v22 = vadd.f32 %v1997_v21, %v1978_v39  ;;  %v2186_v39 = vld [vmem:[#allocation25 + $0x1f0] sm:$0xff] }
 0x4d9   :  { %2816 = vmatpush.msra.mxu2 %v2145_v42  ;;  %2906 = vmatpush.msra.mxu3 %v2505_v50  ;;  %v2261_v19 = vld [vmem:[#allocation25 + $0x448] sm:$0xff] }
 0x4da   :  { %2852 = vmatpush.msrb.mxu0 %v2289_v57  ;;  %2842 = vmatmul.f32.vlgmr.msrb.gmra.mxu3 %v4683_v26  ;;  %v2477_v20 = vld [vmem:[#allocation25 + $0xb08] sm:$0xff]  ;;  %v2018_v31 = vadd.f32 %v2017_v27, %v1998_v22  ;;  %v2182_v22 = vld [vmem:[#allocation25 + $0x1d0] sm:$0xff] }
 0x4db   :  { %2817 = vmatpush.msra.mxu2 %v2141_v48  ;;  %2907 = vmatpush.msra.mxu3 %v2501_v54  ;;  %v2361_v4 = vld [vmem:[#allocation25 + $0x768] sm:$0xff]  ;;  %v2226_v27 = vld [vmem:[#allocation25 + $0x330] sm:$0xff] }
 0x4dc   :  { %2853 = vmatpush.msrb.mxu0 %v2285_v51  ;;  %2801 = vmatpush.msrb.mxu1 %v2572_v58  ;;  %v2429_v24 = vld [vmem:[#allocation25 + $0x988] sm:$0xff]  ;;  %v2114_v34 = vmul.f32 0.01, %v2018_v31  ;;  %vm2106_vm4 = vcmp.ge.f32.partialorder %v2018_v31, 0.0 }
 0x4dd   :  { %2818 = vmatpush.msra.mxu2 %v2137_v52  ;;  %2908 = vmatpush.msra.mxu3 %v2497_v60  ;;  %v2257_v25 = vld [vmem:[#allocation25 + $0x428] sm:$0xff] }
 0x4de   :  { %2854 = vmatpush.msrb.mxu0 %v2281_v55  ;;  %2866 = vmatpush.msra.mxu1 %v2377_v63  ;;  %v2473_v46 = vld [vmem:[#allocation25 + $0xae8] sm:$0xff]  ;;  %v4708_v40 = vsel %vm2106_vm4, %v2018_v31, %v2114_v34 }
 0x4df   :  { %2819 = vmatpush.msra.mxu2 %v2133_v56  ;;  %2909 = vmatpush.msra.mxu3 %v2493_v0  ;;  %v2357_v29 = vld [vmem:[#allocation25 + $0x748] sm:$0xff] }
 0x4e0   :  { %2855 = vmatpush.msrb.mxu0 %v2277_v61  ;;  %2867 = vmatpush.msra.mxu1 %v2373_v28  ;;  %v2425_v30 = vld [vmem:[#allocation25 + $0x968] sm:$0xff] }
 0x4e1   :  { %2820 = vmatpush.msra.mxu2 %v2129_v62  ;;  %2910 = vmatpush.msra.mxu3 %v2489_v6  ;;  %v2253_v32 = vld [vmem:[#allocation25 + $0x408] sm:$0xff]  ;;  %v2246_v6 = vld [vmem:[#allocation25 + $0x3d0] sm:$0xff] }
 0x4e2   :  { %2856 = vmatpush.msrb.mxu0 %v2273_v1  ;;  %2868 = vmatpush.msra.mxu1 %v2369_v10  ;;  %v2469_v11 = vld [vmem:[#allocation25 + $0xac8] sm:$0xff]  ;;  %v2250_v1 = vld [vmem:[#allocation25 + $0x3f0] sm:$0xff] }
 0x4e3   :  { %2821 = vmatpush.msra.mxu2 %v2125_v2  ;;  %2911 = vmatpush.msra.mxu3 %v2485_v59  ;;  %v2353_v33 = vld [vmem:[#allocation25 + $0x728] sm:$0xff] }
 0x4e4   :  { %2822 = vmatmul.f32.vlgmr.msra.gmra.mxu2 %v4687_v44  ;;  %2857 = vmatpush.msrb.mxu0 %v2269_v8  ;;  %v2421_v35 = vld [vmem:[#allocation25 + $0x948] sm:$0xff] }
 0x4e5   :  { %2886 = vmatpush.msrb.mxu2 %v2441_v7  ;;  %2912 = vmatpush.msra.mxu3 %v2481_v16  ;;  %v2465_v36 = vld [vmem:[#allocation25 + $0xaa8] sm:$0xff] }
 0x4e6   :  { %2858 = vmatpush.msrb.mxu0 %v2265_v15  ;;  %2869 = vmatpush.msra.mxu1 %v2365_v17  ;;  %v2569_v37 = vld [vmem:[#allocation25 + $0xde8] sm:$0xff]  ;;  %v2238_v15 = vld [vmem:[#allocation25 + $0x390] sm:$0xff] }
 0x4e7   :  { %2887 = vmatpush.msrb.mxu2 %v2437_v13  ;;  %2913 = vmatpush.msra.mxu3 %v2477_v20  ;;  %v2417_v38 = vld [vmem:[#allocation25 + $0x928] sm:$0xff] }
 0x4e8   :  { %2859 = vmatpush.msrb.mxu0 %v2261_v19  ;;  %2870 = vmatpush.msra.mxu1 %v2361_v4  ;;  %v2349_v41 = vld [vmem:[#allocation25 + $0x708] sm:$0xff]  ;;  %v3817_v19 = vld [vmem:[#allocation24] sm:$0xff]  ;;  %v2230_v4 = vld [vmem:[#allocation25 + $0x350] sm:$0xff] }
 0x4e9   :  { %2888 = vmatpush.msrb.mxu2 %v2433_v18  ;;  %2914 = vmatpush.msra.mxu3 %v2473_v46  ;;  %v2461_v42 = vld [vmem:[#allocation25 + $0xa88] sm:$0xff]  ;;  %v2234_v18 = vld [vmem:[#allocation25 + $0x370] sm:$0xff]  ;;  %v1451_v20 = vperm.slane %v3817_v19, 7 }
 0x4ea   :  { %2860 = vmatpush.msrb.mxu0 %v2257_v25  ;;  %2871 = vmatpush.msra.mxu1 %v2357_v29  ;;  %v2565_v43 = vld [vmem:[#allocation25 + $0xdc8] sm:$0xff]  ;;  %v2178_v29 = vld [vmem:[#allocation25 + $0x1b0] sm:$0xff] }
 0x4eb   :  { %2889 = vmatpush.msrb.mxu2 %v2429_v24  ;;  %2915 = vmatpush.msra.mxu3 %v2469_v11  ;;  %v2413_v57 = vld [vmem:[#allocation25 + $0x908] sm:$0xff]  ;;  %v2222_v11 = vld [vmem:[#allocation25 + $0x310] sm:$0xff] }
 0x4ec   :  { %2861 = vmatpush.msrb.mxu0 %v2253_v32  ;;  %2872 = vmatpush.msra.mxu1 %v2353_v33  ;;  %v2345_v47 = vld [vmem:[#allocation25 + $0x6e8] sm:$0xff]  ;;  %v2174_v33 = vld [vmem:[#allocation25 + $0x190] sm:$0xff] }
 0x4ed   :  { %2890 = vmatpush.msrb.mxu2 %v2425_v30  ;;  %2782 = vmatmul.f32.vlgmr.msra.gmra.mxu0 %v4708_v40  ;;  %v2457_v48 = vld [vmem:[#allocation25 + $0xa68] sm:$0xff]  ;;  %v2498_v19 = vld [vmem:[#allocation25 + $0xbb0] sm:$0xff] }
 0x4ee   :  { %2916 = vmatpush.msra.mxu3 %v2465_v36  ;;  %2926 = vmatpush.msra.mxu0 %v2569_v37  ;;  %v2561_v49 = vld [vmem:[#allocation25 + $0xda8] sm:$0xff]  ;;  %v2057_v32 = vpop.f32.mrf.mxu3  ;;  %v2218_v37 = vld [vmem:[#allocation25 + $0x2f0] sm:$0xff] }
 0x4ef   :  { %2891 = vmatpush.msrb.mxu2 %v2421_v35  ;;  %2873 = vmatpush.msra.mxu1 %v2349_v41  ;;  %v2409_v50 = vld [vmem:[#allocation25 + $0x8e8] sm:$0xff] }
 0x4f0   :  { %2917 = vmatpush.msra.mxu3 %v2461_v42  ;;  %2927 = vmatpush.msra.mxu0 %v2565_v43  ;;  %v2341_v51 = vld [vmem:[#allocation25 + $0x6c8] sm:$0xff] }
 0x4f1   :  { %2892 = vmatpush.msrb.mxu2 %v2417_v38  ;;  %v2453_v52 = vld [vmem:[#allocation25 + $0xa48] sm:$0xff]  ;;  %2874 = vmatpush.msra.mxu1 %v2345_v47  ;;  %v2170_v38 = vld [vmem:[#allocation25 + $0x170] sm:$0xff] }
 0x4f2   :  { %v2557_v54 = vld [vmem:[#allocation25 + $0xd88] sm:$0xff]  ;;  %2918 = vmatpush.msra.mxu3 %v2457_v48  ;;  %2928 = vmatpush.msra.mxu0 %v2561_v49  ;;  %v2097_v43 = vpop.f32.mrf.mxu1  ;;  %v2166_v48 = vld [vmem:[#allocation25 + $0x150] sm:$0xff] }
 0x4f3   :  { %2893 = vmatpush.msrb.mxu2 %v2413_v57  ;;  %v2405_v55 = vld [vmem:[#allocation25 + $0x8c8] sm:$0xff]  ;;  %2875 = vmatpush.msra.mxu1 %v2341_v51  ;;  %v2214_v57 = vld [vmem:[#allocation25 + $0x2d0] sm:$0xff] }
 0x4f4   :  { %v2449_v56 = vld [vmem:[#allocation25 + $0xa28] sm:$0xff]  ;;  %2919 = vmatpush.msra.mxu3 %v2453_v52  ;;  %2929 = vmatpush.msra.mxu0 %v2557_v54  ;;  %v2162_v52 = vld [vmem:[#allocation25 + $0x130] sm:$0xff] }
 0x4f5   :  { %2894 = vmatpush.msrb.mxu2 %v2409_v50  ;;  %v2553_v58 = vld [vmem:[#allocation25 + $0xd68] sm:$0xff]  ;;  %2862 = vmatmul.f32.vlgmr.msrb.gmra.mxu0 %v4695_v3  ;;  %v2037_v46 = vpop.f32.mrf.mxu2  ;;  %v2210_v50 = vld [vmem:[#allocation25 + $0x2b0] sm:$0xff] }
 0x4f6   :  { %v2401_v60 = vld [vmem:[#allocation25 + $0x8a8] sm:$0xff]  ;;  %2920 = vmatpush.msra.mxu3 %v2449_v56  ;;  %2930 = vmatpush.msra.mxu0 %v2553_v58  ;;  %v2038_v30 = vadd.f32 %v2037_v46, %v1451_v20  ;;  %v2206_v54 = vld [vmem:[#allocation25 + $0x290] sm:$0xff] }
 0x4f7   :  { %v2337_v61 = vld [vmem:[#allocation25 + $0x6a8] sm:$0xff]  ;;  %2895 = vmatpush.msrb.mxu2 %v2405_v55  ;;  %v2158_v56 = vld [vmem:[#allocation25 + $0x110] sm:$0xff] }
 0x4f8   :  { %v2445_v62 = vld [vmem:[#allocation25 + $0xa08] sm:$0xff]  ;;  %2876 = vmatpush.msra.mxu1 %v2337_v61  ;;  %v2058_v34 = vadd.f32 %v2057_v32, %v2038_v30  ;;  %v2077_v36 = vpop.f32.mrf.mxu0  ;;  %v2202_v61 = vld [vmem:[#allocation25 + $0x270] sm:$0xff] }
 0x4f9   :  { %v2549_v63 = vld [vmem:[#allocation25 + $0xd48] sm:$0xff]  ;;  %2896 = vmatpush.msrb.mxu2 %v2401_v60  ;;  %2921 = vmatpush.msra.mxu3 %v2445_v62  ;;  %v2314_v60 = vld [vmem:[#allocation25 + $0x5f0] sm:$0xff] }
 0x4fa   :  { %v2397_v0 = vld [vmem:[#allocation25 + $0x888] sm:$0xff]  ;;  %2931 = vmatpush.msra.mxu0 %v2549_v63  ;;  %2922 = vmatmul.f32.vlgmr.msra.gmra.mxu3 %v4702_v23  ;;  %v2078_v41 = vadd.f32 %v2077_v36, %v2058_v34  ;;  %v2154_v63 = vld [vmem:[#allocation25 + $0xf0] sm:$0xff] }
 0x4fb   :  { %v2545_v2 = vld [vmem:[#allocation25 + $0xd28] sm:$0xff]  ;;  %2897 = vmatpush.msrb.mxu2 %v2397_v0  ;;  %2986 = vmatpush.msrb.mxu3 %v2250_v1  ;;  %v2310_v0 = vld [vmem:[#allocation25 + $0x5d0] sm:$0xff] }
 0x4fc   :  { %v2393_v5 = vld [vmem:[#allocation25 + $0x868] sm:$0xff]  ;;  %2932 = vmatpush.msra.mxu0 %v2545_v2  ;;  %v2098_v47 = vadd.f32 %v2097_v43, %v2078_v41  ;;  %v2198_v1 = vld [vmem:[#allocation25 + $0x250] sm:$0xff] }
 0x4fd   :  { %v2333_v28 = vld [vmem:[#allocation25 + $0x688] sm:$0xff]  ;;  %2898 = vmatpush.msrb.mxu2 %v2393_v5  ;;  %2987 = vmatpush.msrb.mxu3 %v2246_v6  ;;  %v2150_v5 = vld [vmem:[#allocation25 + $0xd0] sm:$0xff] }
 0x4fe   :  { %v2541_v7 = vld [vmem:[#allocation25 + $0xd08] sm:$0xff]  ;;  %2877 = vmatpush.msra.mxu1 %v2333_v28  ;;  %v2115_v51 = vmul.f32 0.01, %v2098_v47  ;;  %vm2107_vm5 = vcmp.ge.f32.partialorder %v2098_v47, 0.0  ;;  %v2306_v28 = vld [vmem:[#allocation25 + $0x5b0] sm:$0xff] }
 0x4ff   :  { %v2389_v8 = vld [vmem:[#allocation25 + $0x848] sm:$0xff]  ;;  %2933 = vmatpush.msra.mxu0 %v2541_v7  ;;  %2988 = vmatpush.msrb.mxu3 %v2242_v9  ;;  %v2194_v6 = vld [vmem:[#allocation25 + $0x230] sm:$0xff] }
 0x500   :  { %v2329_v59 = vld [vmem:[#allocation25 + $0x668] sm:$0xff]  ;;  %2899 = vmatpush.msrb.mxu2 %v2389_v8  ;;  %v4714_v58 = vsel %vm2107_vm5, %v2098_v47, %v2115_v51  ;;  %v2146_v8 = vld [vmem:[#allocation25 + $0xb0] sm:$0xff] }
 0x501   :  { %v2537_v10 = vld [vmem:[#allocation25 + $0xce8] sm:$0xff]  ;;  %2878 = vmatpush.msra.mxu1 %v2329_v59  ;;  %2989 = vmatpush.msrb.mxu3 %v2238_v15  ;;  %v2302_v59 = vld [vmem:[#allocation25 + $0x590] sm:$0xff] }
 0x502   :  { %v2385_v13 = vld [vmem:[#allocation25 + $0x828] sm:$0xff]  ;;  %2934 = vmatpush.msra.mxu0 %v2537_v10  ;;  %2802 = vmatmul.f32.vlgmr.msrb.gmra.mxu1 %v4714_v58  ;;  %v2190_v9 = vld [vmem:[#allocation25 + $0x210] sm:$0xff] }
 0x503   :  { %v2325_v14 = vld [vmem:[#allocation25 + $0x648] sm:$0xff]  ;;  %2900 = vmatpush.msrb.mxu2 %v2385_v13  ;;  %2990 = vmatpush.msrb.mxu3 %v2234_v18  ;;  %v2142_v10 = vld [vmem:[#allocation25 + $0x90] sm:$0xff] }
 0x504   :  { %v2533_v12 = vld [vmem:[#allocation25 + $0xcc8] sm:$0xff]  ;;  %2879 = vmatpush.msra.mxu1 %v2325_v14  ;;  %v2506_v13 = vld [vmem:[#allocation25 + $0xbf0] sm:$0xff] }
 0x505   :  { %v2381_v16 = vld [vmem:[#allocation25 + $0x808] sm:$0xff]  ;;  %2935 = vmatpush.msra.mxu0 %v2533_v12  ;;  %2991 = vmatpush.msrb.mxu3 %v2230_v4  ;;  %v2138_v15 = vld [vmem:[#allocation25 + $0x70] sm:$0xff] }
 0x506   :  { %v2321_v17 = vld [vmem:[#allocation25 + $0x628] sm:$0xff]  ;;  %2901 = vmatpush.msrb.mxu2 %v2381_v16  ;;  %v2298_v12 = vld [vmem:[#allocation25 + $0x570] sm:$0xff] }
 0x507   :  { %v2529_v21 = vld [vmem:[#allocation25 + $0xca8] sm:$0xff]  ;;  %2880 = vmatpush.msra.mxu1 %v2321_v17  ;;  %2902 = vmatmul.f32.vlgmr.msrb.gmra.mxu2 %v4699_v45  ;;  %v2502_v16 = vld [vmem:[#allocation25 + $0xbd0] sm:$0xff] }
 0x508   :  { %v2317_v24 = vld [vmem:[#allocation25 + $0x608] sm:$0xff]  ;;  %2966 = vmatpush.msra.mxu2 %v2186_v39  ;;  %2936 = vmatpush.msra.mxu0 %v2529_v21  ;;  %v2134_v18 = vld [vmem:[#allocation25 + $0x50] sm:$0xff] }
 0x509   :  { %v2525_v25 = vld [vmem:[#allocation25 + $0xc88] sm:$0xff]  ;;  %2881 = vmatpush.msra.mxu1 %v2317_v24  ;;  %2992 = vmatpush.msrb.mxu3 %v2226_v27  ;;  %v2294_v39 = vld [vmem:[#allocation25 + $0x550] sm:$0xff] }
 0x50a   :  { %v2521_v31 = vld [vmem:[#allocation25 + $0xc68] sm:$0xff]  ;;  %2967 = vmatpush.msra.mxu2 %v2182_v22  ;;  %2937 = vmatpush.msra.mxu0 %v2525_v25  ;;  %v2130_v21 = vld [vmem:[#allocation25 + $0x30] sm:$0xff] }
 0x50b   :  { %v2517_v35 = vld [vmem:[#allocation25 + $0xc48] sm:$0xff]  ;;  %2993 = vmatpush.msrb.mxu3 %v2222_v11  ;;  %2882 = vmatmul.f32.vlgmr.msra.gmra.mxu1 %v4691_v53  ;;  %v2290_v4 = vld [vmem:[#allocation25 + $0x530] sm:$0xff] }
 0x50c   :  { %2968 = vmatpush.msra.mxu2 %v2178_v29  ;;  %2938 = vmatpush.msra.mxu0 %v2521_v31  ;;  %v2513_v42 = vld [vmem:[#allocation25 + $0xc28] sm:$0xff]  ;;  %v2494_v24 = vld [vmem:[#allocation25 + $0xb90] sm:$0xff] }
 0x50d   :  { %2994 = vmatpush.msrb.mxu3 %v2218_v37  ;;  %v2509_v49 = vld [vmem:[#allocation25 + $0xc08] sm:$0xff]  ;;  %v2126_v25 = vld [vmem:[#allocation25 + $0x10] sm:$0xff] }
 0x50e   :  { %2969 = vmatpush.msra.mxu2 %v2174_v33  ;;  %2939 = vmatpush.msra.mxu0 %v2517_v35  ;;  %v2633_v55 = vld [vmem:[#allocation25 + $0xfe8] sm:$0xff]  ;;  %v2286_v27 = vld [vmem:[#allocation25 + $0x510] sm:$0xff] }
 0x50f   :  { %2995 = vmatpush.msrb.mxu3 %v2214_v57  ;;  %v2629_v62 = vld [vmem:[#allocation25 + $0xfc8] sm:$0xff]  ;;  %2946 = vmatpush.msrb.mxu1 %v2633_v55  ;;  %v2490_v46 = vld [vmem:[#allocation25 + $0xb70] sm:$0xff] }
 0x510   :  { %2970 = vmatpush.msra.mxu2 %v2170_v38  ;;  %2940 = vmatpush.msra.mxu0 %v2513_v42  ;;  %v2625_v2 = vld [vmem:[#allocation25 + $0xfa8] sm:$0xff]  ;;  %v2442_v29 = vld [vmem:[#allocation25 + $0x9f0] sm:$0xff] }
 0x511   :  { %2996 = vmatpush.msrb.mxu3 %v2210_v50  ;;  %2947 = vmatpush.msrb.mxu1 %v2629_v62  ;;  %v2621_v7 = vld [vmem:[#allocation25 + $0xf88] sm:$0xff]  ;;  %v2282_v31 = vld [vmem:[#allocation25 + $0x4f0] sm:$0xff] }
 0x512   :  { %2971 = vmatpush.msra.mxu2 %v2166_v48  ;;  %2941 = vmatpush.msra.mxu0 %v2509_v49  ;;  %v2617_v14 = vld [vmem:[#allocation25 + $0xf68] sm:$0xff]  ;;  %v2486_v32 = vld [vmem:[#allocation25 + $0xb50] sm:$0xff] }
 0x513   :  { %2942 = vmatmul.f32.vlgmr.msra.gmra.mxu0 %v4708_v40  ;;  %2997 = vmatpush.msrb.mxu3 %v2206_v54  ;;  %v2613_v17 = vld [vmem:[#allocation25 + $0xf48] sm:$0xff]  ;;  %v2438_v11 = vld [vmem:[#allocation25 + $0x9d0] sm:$0xff] }
 0x514   :  { %2972 = vmatpush.msra.mxu2 %v2162_v52  ;;  %3006 = vmatpush.msrb.mxu0 %v2314_v60  ;;  %v2609_v20 = vld [vmem:[#allocation25 + $0xf28] sm:$0xff]  ;;  %v2278_v34 = vld [vmem:[#allocation25 + $0x4d0] sm:$0xff] }
 0x515   :  { %2998 = vmatpush.msrb.mxu3 %v2202_v61  ;;  %2948 = vmatpush.msrb.mxu1 %v2625_v2  ;;  %v2605_v22 = vld [vmem:[#allocation25 + $0xf08] sm:$0xff]  ;;  %v2482_v35 = vld [vmem:[#allocation25 + $0xb30] sm:$0xff] }
 0x516   :  { %2973 = vmatpush.msra.mxu2 %v2158_v56  ;;  %3007 = vmatpush.msrb.mxu0 %v2310_v0  ;;  %v2601_v30 = vld [vmem:[#allocation25 + $0xee8] sm:$0xff]  ;;  %v2434_v36 = vld [vmem:[#allocation25 + $0x9b0] sm:$0xff] }
 0x517   :  { %2999 = vmatpush.msrb.mxu3 %v2198_v1  ;;  %2949 = vmatpush.msrb.mxu1 %v2621_v7  ;;  %v2597_v33 = vld [vmem:[#allocation25 + $0xec8] sm:$0xff]  ;;  %v2274_v38 = vld [vmem:[#allocation25 + $0x4b0] sm:$0xff] }
 0x518   :  { %2974 = vmatpush.msra.mxu2 %v2154_v63  ;;  %3008 = vmatpush.msrb.mxu0 %v2306_v28  ;;  %v2593_v37 = vld [vmem:[#allocation25 + $0xea8] sm:$0xff]  ;;  %v2478_v41 = vld [vmem:[#allocation25 + $0xb10] sm:$0xff] }
 0x519   :  { %3000 = vmatpush.msrb.mxu3 %v2194_v6  ;;  %2950 = vmatpush.msrb.mxu1 %v2617_v14  ;;  %v2430_v42 = vld [vmem:[#allocation25 + $0x990] sm:$0xff]  ;;  %v2589_v43 = vld [vmem:[#allocation25 + $0xe88] sm:$0xff] }
 0x51a   :  { %2975 = vmatpush.msra.mxu2 %v2150_v5  ;;  %3009 = vmatpush.msrb.mxu0 %v2302_v59  ;;  %v2270_v57 = vld [vmem:[#allocation25 + $0x490] sm:$0xff]  ;;  %v2585_v49 = vld [vmem:[#allocation25 + $0xe68] sm:$0xff] }
 0x51b   :  { %3001 = vmatpush.msrb.mxu3 %v2190_v9  ;;  %2951 = vmatpush.msrb.mxu1 %v2613_v17  ;;  %v2474_v47 = vld [vmem:[#allocation25 + $0xaf0] sm:$0xff]  ;;  %v2581_v54 = vld [vmem:[#allocation25 + $0xe48] sm:$0xff] }
 0x51c   :  { %2976 = vmatpush.msra.mxu2 %v2146_v8  ;;  %3002 = vmatmul.f32.vlgmr.msrb.gmra.mxu3 %v4683_v26  ;;  %v2426_v48 = vld [vmem:[#allocation25 + $0x970] sm:$0xff]  ;;  %v2577_v61 = vld [vmem:[#allocation25 + $0xe28] sm:$0xff] }
 0x51d   :  { %3066 = vmatpush.msra.mxu3 %v2506_v13  ;;  %3010 = vmatpush.msrb.mxu0 %v2298_v12  ;;  %v2266_v50 = vld [vmem:[#allocation25 + $0x470] sm:$0xff]  ;;  %v2573_v1 = vld [vmem:[#allocation25 + $0xe08] sm:$0xff] }
 0x51e   :  { %2977 = vmatpush.msra.mxu2 %v2142_v10  ;;  %2952 = vmatpush.msrb.mxu1 %v2609_v20  ;;  %v2470_v51 = vld [vmem:[#allocation25 + $0xad0] sm:$0xff]  ;;  %v2251_v20 = vld [vmem:[#allocation25 + $0x3f8] sm:$0xff] }
 0x51f   :  { %3067 = vmatpush.msra.mxu3 %v2502_v16  ;;  %3011 = vmatpush.msrb.mxu0 %v2294_v39  ;;  %v2422_v52 = vld [vmem:[#allocation25 + $0x950] sm:$0xff] }
 0x520   :  { %2978 = vmatpush.msra.mxu2 %v2138_v15  ;;  %2953 = vmatpush.msrb.mxu1 %v2605_v22  ;;  %v2262_v55 = vld [vmem:[#allocation25 + $0x450] sm:$0xff]  ;;  %v2247_v22 = vld [vmem:[#allocation25 + $0x3d8] sm:$0xff] }
 0x521   :  { %3068 = vmatpush.msra.mxu3 %v2498_v19  ;;  %3012 = vmatpush.msrb.mxu0 %v2290_v4  ;;  %v2466_v56 = vld [vmem:[#allocation25 + $0xab0] sm:$0xff] }
 0x522   :  { %2979 = vmatpush.msra.mxu2 %v2134_v18  ;;  %2954 = vmatpush.msrb.mxu1 %v2601_v30  ;;  %v2418_v60 = vld [vmem:[#allocation25 + $0x930] sm:$0xff] }
 0x523   :  { %3069 = vmatpush.msra.mxu3 %v2494_v24  ;;  %3013 = vmatpush.msrb.mxu0 %v2286_v27  ;;  %v2258_v62 = vld [vmem:[#allocation25 + $0x430] sm:$0xff] }
 0x524   :  { %2980 = vmatpush.msra.mxu2 %v2130_v21  ;;  %2955 = vmatpush.msrb.mxu1 %v2597_v33  ;;  %v2462_v63 = vld [vmem:[#allocation25 + $0xa90] sm:$0xff]  ;;  %v2239_v33 = vld [vmem:[#allocation25 + $0x398] sm:$0xff] }
 0x525   :  { %3070 = vmatpush.msra.mxu3 %v2490_v46  ;;  %3014 = vmatpush.msrb.mxu0 %v2282_v31  ;;  %v2414_v0 = vld [vmem:[#allocation25 + $0x910] sm:$0xff] }
 0x526   :  { %2981 = vmatpush.msra.mxu2 %v2126_v25  ;;  %2956 = vmatpush.msrb.mxu1 %v2593_v37  ;;  %v2254_v2 = vld [vmem:[#allocation25 + $0x410] sm:$0xff]  ;;  %v2235_v37 = vld [vmem:[#allocation25 + $0x378] sm:$0xff] }
 0x527   :  { %2982 = vmatmul.f32.vlgmr.msra.gmra.mxu2 %v4687_v44  ;;  %3071 = vmatpush.msra.mxu3 %v2486_v32  ;;  %v2458_v5 = vld [vmem:[#allocation25 + $0xa70] sm:$0xff] }
 0x528   :  { %3046 = vmatpush.msrb.mxu2 %v2442_v29  ;;  %3015 = vmatpush.msrb.mxu0 %v2278_v34  ;;  %v2410_v28 = vld [vmem:[#allocation25 + $0x8f0] sm:$0xff]  ;;  %v2243_v29 = vld [vmem:[#allocation25 + $0x3b8] sm:$0xff] }
 0x529   :  { %3072 = vmatpush.msra.mxu3 %v2482_v35  ;;  %2957 = vmatpush.msrb.mxu1 %v2589_v43  ;;  %v2378_v6 = vld [vmem:[#allocation25 + $0x7f0] sm:$0xff]  ;;  %v2231_v43 = vld [vmem:[#allocation25 + $0x358] sm:$0xff] }
 0x52a   :  { %3047 = vmatpush.msrb.mxu2 %v2438_v11  ;;  %3016 = vmatpush.msrb.mxu0 %v2274_v38  ;;  %v2406_v7 = vld [vmem:[#allocation25 + $0x8d0] sm:$0xff]  ;;  %v2187_v11 = vld [vmem:[#allocation25 + $0x1f8] sm:$0xff] }
 0x52b   :  { %3073 = vmatpush.msra.mxu3 %v2478_v41  ;;  %2958 = vmatpush.msrb.mxu1 %v2585_v49  ;;  %v2570_v8 = vld [vmem:[#allocation25 + $0xdf0] sm:$0xff]  ;;  %v2227_v49 = vld [vmem:[#allocation25 + $0x338] sm:$0xff] }
 0x52c   :  { %3048 = vmatpush.msrb.mxu2 %v2434_v36  ;;  %3017 = vmatpush.msrb.mxu0 %v2270_v57  ;;  %v2454_v59 = vld [vmem:[#allocation25 + $0xa50] sm:$0xff]  ;;  %v2183_v36 = vld [vmem:[#allocation25 + $0x1d8] sm:$0xff] }
 0x52d   :  { %3074 = vmatpush.msra.mxu3 %v2474_v47  ;;  %2959 = vmatpush.msrb.mxu1 %v2581_v54  ;;  %v2374_v9 = vld [vmem:[#allocation25 + $0x7d0] sm:$0xff]  ;;  %v2223_v54 = vld [vmem:[#allocation25 + $0x318] sm:$0xff] }
 0x52e   :  { %3049 = vmatpush.msrb.mxu2 %v2430_v42  ;;  %3018 = vmatpush.msrb.mxu0 %v2266_v50  ;;  %v2402_v10 = vld [vmem:[#allocation25 + $0x8b0] sm:$0xff]  ;;  %v2179_v42 = vld [vmem:[#allocation25 + $0x1b8] sm:$0xff] }
 0x52f   :  { %3075 = vmatpush.msra.mxu3 %v2470_v51  ;;  %2960 = vmatpush.msrb.mxu1 %v2577_v61  ;;  %v2566_v13 = vld [vmem:[#allocation25 + $0xdd0] sm:$0xff]  ;;  %v2219_v61 = vld [vmem:[#allocation25 + $0x2f8] sm:$0xff] }
 0x530   :  { %3050 = vmatpush.msrb.mxu2 %v2426_v48  ;;  %3019 = vmatpush.msrb.mxu0 %v2262_v55  ;;  %v2450_v14 = vld [vmem:[#allocation25 + $0xa30] sm:$0xff]  ;;  %v2175_v48 = vld [vmem:[#allocation25 + $0x198] sm:$0xff] }
 0x531   :  { %3076 = vmatpush.msra.mxu3 %v2466_v56  ;;  %2961 = vmatpush.msrb.mxu1 %v2573_v1  ;;  %v2370_v15 = vld [vmem:[#allocation25 + $0x7b0] sm:$0xff]  ;;  %v2215_v1 = vld [vmem:[#allocation25 + $0x2d8] sm:$0xff] }
 0x532   :  { %3051 = vmatpush.msrb.mxu2 %v2422_v52  ;;  %3020 = vmatpush.msrb.mxu0 %v2258_v62  ;;  %v2398_v12 = vld [vmem:[#allocation25 + $0x890] sm:$0xff]  ;;  %v2171_v52 = vld [vmem:[#allocation25 + $0x178] sm:$0xff] }
 0x533   :  { %3077 = vmatpush.msra.mxu3 %v2462_v63  ;;  %2962 = vmatmul.f32.vlgmr.msrb.gmra.mxu1 %v4714_v58  ;;  %v2562_v16 = vld [vmem:[#allocation25 + $0xdb0] sm:$0xff] }
 0x534   :  { %3052 = vmatpush.msrb.mxu2 %v2418_v60  ;;  %3021 = vmatpush.msrb.mxu0 %v2254_v2  ;;  %v2446_v17 = vld [vmem:[#allocation25 + $0xa10] sm:$0xff]  ;;  %v2167_v60 = vld [vmem:[#allocation25 + $0x158] sm:$0xff] }
 0x535   :  { %3078 = vmatpush.msra.mxu3 %v2458_v5  ;;  %3022 = vmatmul.f32.vlgmr.msrb.gmra.mxu0 %v4695_v3  ;;  %v2366_v18 = vld [vmem:[#allocation25 + $0x790] sm:$0xff] }
 0x536   :  { %3053 = vmatpush.msrb.mxu2 %v2414_v0  ;;  %3026 = vmatpush.msra.mxu1 %v2378_v6  ;;  %v2394_v39 = vld [vmem:[#allocation25 + $0x870] sm:$0xff]  ;;  %v2163_v0 = vld [vmem:[#allocation25 + $0x138] sm:$0xff] }
 0x537   :  { %3086 = vmatpush.msra.mxu0 %v2570_v8  ;;  %3079 = vmatpush.msra.mxu3 %v2454_v59  ;;  %v2558_v19 = vld [vmem:[#allocation25 + $0xd90] sm:$0xff]  ;;  %v2211_v6 = vld [vmem:[#allocation25 + $0x2b8] sm:$0xff] }
 0x538   :  { %3054 = vmatpush.msrb.mxu2 %v2410_v28  ;;  %3027 = vmatpush.msra.mxu1 %v2374_v9  ;;  %v2390_v21 = vld [vmem:[#allocation25 + $0x850] sm:$0xff]  ;;  %v2159_v28 = vld [vmem:[#allocation25 + $0x118] sm:$0xff] }
 0x539   :  { %3087 = vmatpush.msra.mxu0 %v2566_v13  ;;  %3080 = vmatpush.msra.mxu3 %v2450_v14  ;;  %v2362_v4 = vld [vmem:[#allocation25 + $0x770] sm:$0xff]  ;;  %v2155_v59 = vld [vmem:[#allocation25 + $0xf8] sm:$0xff] }
 0x53a   :  { %3055 = vmatpush.msrb.mxu2 %v2406_v7  ;;  %3028 = vmatpush.msra.mxu1 %v2370_v15  ;;  %v2554_v24 = vld [vmem:[#allocation25 + $0xd70] sm:$0xff]  ;;  %v2207_v9 = vld [vmem:[#allocation25 + $0x298] sm:$0xff] }
 0x53b   :  { %3088 = vmatpush.msra.mxu0 %v2562_v16  ;;  %3081 = vmatpush.msra.mxu3 %v2446_v17  ;;  %v2386_v25 = vld [vmem:[#allocation25 + $0x830] sm:$0xff]  ;;  %v2151_v14 = vld [vmem:[#allocation25 + $0xd8] sm:$0xff] }
 0x53c   :  { %3056 = vmatpush.msrb.mxu2 %v2402_v10  ;;  %3029 = vmatpush.msra.mxu1 %v2366_v18  ;;  %v2358_v27 = vld [vmem:[#allocation25 + $0x750] sm:$0xff]  ;;  %v2203_v15 = vld [vmem:[#allocation25 + $0x278] sm:$0xff] }
 0x53d   :  { %3082 = vmatmul.f32.vlgmr.msra.gmra.mxu3 %v4702_v23  ;;  %3089 = vmatpush.msra.mxu0 %v2558_v19  ;;  %v2550_v46 = vld [vmem:[#allocation25 + $0xd50] sm:$0xff]  ;;  %v2315_v16 = vld [vmem:[#allocation25 + $0x5f8] sm:$0xff] }
 0x53e   :  { %3057 = vmatpush.msrb.mxu2 %v2398_v12  ;;  %3146 = vmatpush.msrb.mxu3 %v2251_v20  ;;  %v2382_v30 = vld [vmem:[#allocation25 + $0x810] sm:$0xff]  ;;  %v2147_v17 = vld [vmem:[#allocation25 + $0xb8] sm:$0xff] }
 0x53f   :  { %3030 = vmatpush.msra.mxu1 %v2362_v4  ;;  %3090 = vmatpush.msra.mxu0 %v2554_v24  ;;  %v2354_v31 = vld [vmem:[#allocation25 + $0x730] sm:$0xff]  ;;  %v2199_v18 = vld [vmem:[#allocation25 + $0x258] sm:$0xff] }
 0x540   :  { %3058 = vmatpush.msrb.mxu2 %v2394_v39  ;;  %3147 = vmatpush.msrb.mxu3 %v2247_v22  ;;  %v2546_v32 = vld [vmem:[#allocation25 + $0xd30] sm:$0xff]  ;;  %v2311_v19 = vld [vmem:[#allocation25 + $0x5d8] sm:$0xff] }
 0x541   :  { %3031 = vmatpush.msra.mxu1 %v2358_v27  ;;  %3091 = vmatpush.msra.mxu0 %v2550_v46  ;;  %v2350_v34 = vld [vmem:[#allocation25 + $0x710] sm:$0xff]  ;;  %v2143_v20 = vld [vmem:[#allocation25 + $0x98] sm:$0xff] }
 0x542   :  { %3059 = vmatpush.msrb.mxu2 %v2390_v21  ;;  %3148 = vmatpush.msrb.mxu3 %v2243_v29  ;;  %v2542_v35 = vld [vmem:[#allocation25 + $0xd10] sm:$0xff]  ;;  %v2195_v21 = vld [vmem:[#allocation25 + $0x238] sm:$0xff] }
 0x543   :  { %3032 = vmatpush.msra.mxu1 %v2354_v31  ;;  %3092 = vmatpush.msra.mxu0 %v2546_v32  ;;  %v2346_v38 = vld [vmem:[#allocation25 + $0x6f0] sm:$0xff]  ;;  %v2307_v24 = vld [vmem:[#allocation25 + $0x5b8] sm:$0xff] }
 0x544   :  { %3060 = vmatpush.msrb.mxu2 %v2386_v25  ;;  %3149 = vmatpush.msrb.mxu3 %v2239_v33  ;;  %v2538_v41 = vld [vmem:[#allocation25 + $0xcf0] sm:$0xff]  ;;  %v2139_v22 = vld [vmem:[#allocation25 + $0x78] sm:$0xff] }
 0x545   :  { %3033 = vmatpush.msra.mxu1 %v2350_v34  ;;  %3093 = vmatpush.msra.mxu0 %v2542_v35  ;;  %v2342_v57 = vld [vmem:[#allocation25 + $0x6d0] sm:$0xff]  ;;  %v2191_v25 = vld [vmem:[#allocation25 + $0x218] sm:$0xff] }
 0x546   :  { %3061 = vmatpush.msrb.mxu2 %v2382_v30  ;;  %3150 = vmatpush.msrb.mxu3 %v2235_v37  ;;  %v2534_v47 = vld [vmem:[#allocation25 + $0xcd0] sm:$0xff]  ;;  %v2303_v46 = vld [vmem:[#allocation25 + $0x598] sm:$0xff] }
 0x547   :  { %3062 = vmatmul.f32.vlgmr.msrb.gmra.mxu2 %v4699_v45  ;;  %3034 = vmatpush.msra.mxu1 %v2346_v38  ;;  %v2338_v50 = vld [vmem:[#allocation25 + $0x6b0] sm:$0xff]  ;;  %v2507_v29 = vld [vmem:[#allocation25 + $0xbf8] sm:$0xff] }
 0x548   :  { %3126 = vmatpush.msra.mxu2 %v2187_v11  ;;  %3094 = vmatpush.msra.mxu0 %v2538_v41  ;;  %v2530_v51 = vld [vmem:[#allocation25 + $0xcb0] sm:$0xff]  ;;  %v2135_v30 = vld [vmem:[#allocation25 + $0x58] sm:$0xff] }
 0x549   :  { %3151 = vmatpush.msrb.mxu3 %v2231_v43  ;;  %3035 = vmatpush.msra.mxu1 %v2342_v57  ;;  %v2334_v55 = vld [vmem:[#allocation25 + $0x690] sm:$0xff]  ;;  %v2299_v32 = vld [vmem:[#allocation25 + $0x578] sm:$0xff] }
 0x54a   :  { %3127 = vmatpush.msra.mxu2 %v2183_v36  ;;  %3095 = vmatpush.msra.mxu0 %v2534_v47  ;;  %v2526_v56 = vld [vmem:[#allocation25 + $0xc90] sm:$0xff]  ;;  %v2503_v11 = vld [vmem:[#allocation25 + $0xbd8] sm:$0xff] }
 0x54b   :  { %3152 = vmatpush.msrb.mxu3 %v2227_v49  ;;  %3036 = vmatpush.msra.mxu1 %v2338_v50  ;;  %v2330_v62 = vld [vmem:[#allocation25 + $0x670] sm:$0xff]  ;;  %v2131_v33 = vld [vmem:[#allocation25 + $0x38] sm:$0xff] }
 0x54c   :  { %3128 = vmatpush.msra.mxu2 %v2179_v42  ;;  %3096 = vmatpush.msra.mxu0 %v2530_v51  ;;  %v2522_v63 = vld [vmem:[#allocation25 + $0xc70] sm:$0xff]  ;;  %v2295_v35 = vld [vmem:[#allocation25 + $0x558] sm:$0xff] }
 0x54d   :  { %3153 = vmatpush.msrb.mxu3 %v2223_v54  ;;  %3037 = vmatpush.msra.mxu1 %v2334_v55  ;;  %v2326_v2 = vld [vmem:[#allocation25 + $0x650] sm:$0xff]  ;;  %v2499_v36 = vld [vmem:[#allocation25 + $0xbb8] sm:$0xff] }
 0x54e   :  { %3129 = vmatpush.msra.mxu2 %v2175_v48  ;;  %3097 = vmatpush.msra.mxu0 %v2526_v56  ;;  %v2518_v5 = vld [vmem:[#allocation25 + $0xc50] sm:$0xff]  ;;  %v2127_v37 = vld [vmem:[#allocation25 + $0x18] sm:$0xff] }
 0x54f   :  { %3154 = vmatpush.msrb.mxu3 %v2219_v61  ;;  %3038 = vmatpush.msra.mxu1 %v2330_v62  ;;  %v2322_v7 = vld [vmem:[#allocation25 + $0x630] sm:$0xff]  ;;  %v2291_v41 = vld [vmem:[#allocation25 + $0x538] sm:$0xff] }
 0x550   :  { %3130 = vmatpush.msra.mxu2 %v2171_v52  ;;  %3098 = vmatpush.msra.mxu0 %v2522_v63  ;;  %v2514_v8 = vld [vmem:[#allocation25 + $0xc30] sm:$0xff]  ;;  %v2495_v42 = vld [vmem:[#allocation25 + $0xb98] sm:$0xff] }
 0x551   :  { %3155 = vmatpush.msrb.mxu3 %v2215_v1  ;;  %3039 = vmatpush.msra.mxu1 %v2326_v2  ;;  %v2318_v10 = vld [vmem:[#allocation25 + $0x610] sm:$0xff]  ;;  %v2287_v57 = vld [vmem:[#allocation25 + $0x518] sm:$0xff] }
 0x552   :  { %3131 = vmatpush.msra.mxu2 %v2167_v60  ;;  %3099 = vmatpush.msra.mxu0 %v2518_v5  ;;  %v2510_v13 = vld [vmem:[#allocation25 + $0xc10] sm:$0xff]  ;;  %v2439_v47 = vld [vmem:[#allocation25 + $0x9d8] sm:$0xff] }
 0x553   :  { %3156 = vmatpush.msrb.mxu3 %v2211_v6  ;;  %3040 = vmatpush.msra.mxu1 %v2322_v7  ;;  %v2634_v12 = vld [vmem:[#allocation25 + $0xff0] sm:$0xff]  ;;  %v2491_v48 = vld [vmem:[#allocation25 + $0xb78] sm:$0xff] }
 0x554   :  { %3132 = vmatpush.msra.mxu2 %v2163_v0  ;;  %3100 = vmatpush.msra.mxu0 %v2514_v8  ;;  %v2630_v39 = vld [vmem:[#allocation25 + $0xfd0] sm:$0xff]  ;;  %v2283_v50 = vld [vmem:[#allocation25 + $0x4f8] sm:$0xff] }
 0x555   :  { %3157 = vmatpush.msrb.mxu3 %v2207_v9  ;;  %3041 = vmatpush.msra.mxu1 %v2318_v10  ;;  %v2626_v4 = vld [vmem:[#allocation25 + $0xfb0] sm:$0xff]  ;;  %v2435_v51 = vld [vmem:[#allocation25 + $0x9b8] sm:$0xff] }
 0x556   :  { %3133 = vmatpush.msra.mxu2 %v2159_v28  ;;  %3101 = vmatpush.msra.mxu0 %v2510_v13  ;;  %v2622_v27 = vld [vmem:[#allocation25 + $0xf90] sm:$0xff]  ;;  %v2487_v52 = vld [vmem:[#allocation25 + $0xb58] sm:$0xff] }
 0x557   :  { %3158 = vmatpush.msrb.mxu3 %v2203_v15  ;;  %3042 = vmatmul.f32.vlgmr.msra.gmra.mxu1 %v4691_v53  ;;  %v2618_v31 = vld [vmem:[#allocation25 + $0xf70] sm:$0xff]  ;;  %v2279_v55 = vld [vmem:[#allocation25 + $0x4d8] sm:$0xff] }
 0x558   :  { %3134 = vmatpush.msra.mxu2 %v2155_v59  ;;  %3102 = vmatmul.f32.vlgmr.msra.gmra.mxu0 %v4708_v40  ;;  %v2614_v34 = vld [vmem:[#allocation25 + $0xf50] sm:$0xff]  ;;  %v2431_v56 = vld [vmem:[#allocation25 + $0x998] sm:$0xff] }
 0x559   :  { %3106 = vmatpush.msrb.mxu1 %v2634_v12  ;;  %3166 = vmatpush.msrb.mxu0 %v2315_v16  ;;  %v2610_v38 = vld [vmem:[#allocation25 + $0xf30] sm:$0xff]  ;;  %v2483_v60 = vld [vmem:[#allocation25 + $0xb38] sm:$0xff] }
 0x55a   :  { %3135 = vmatpush.msra.mxu2 %v2151_v14  ;;  %3159 = vmatpush.msrb.mxu3 %v2199_v18  ;;  %v2606_v43 = vld [vmem:[#allocation25 + $0xf10] sm:$0xff]  ;;  %v2275_v61 = vld [vmem:[#allocation25 + $0x4b8] sm:$0xff] }
 0x55b   :  { %3107 = vmatpush.msrb.mxu1 %v2630_v39  ;;  %3167 = vmatpush.msrb.mxu0 %v2311_v19  ;;  %v2602_v49 = vld [vmem:[#allocation25 + $0xef0] sm:$0xff]  ;;  %v2427_v62 = vld [vmem:[#allocation25 + $0x978] sm:$0xff] }
 0x55c   :  { %3136 = vmatpush.msra.mxu2 %v2147_v17  ;;  %3160 = vmatpush.msrb.mxu3 %v2195_v21  ;;  %v2598_v54 = vld [vmem:[#allocation25 + $0xed0] sm:$0xff]  ;;  %v2479_v63 = vld [vmem:[#allocation25 + $0xb18] sm:$0xff] }
 0x55d   :  { %3108 = vmatpush.msrb.mxu1 %v2626_v4  ;;  %3168 = vmatpush.msrb.mxu0 %v2307_v24  ;;  %v2590_v0 = vld [vmem:[#allocation25 + $0xe90] sm:$0xff]  ;;  %v2271_v1 = vld [vmem:[#allocation25 + $0x498] sm:$0xff] }
 0x55e   :  { %3137 = vmatpush.msra.mxu2 %v2143_v20  ;;  %3161 = vmatpush.msrb.mxu3 %v2191_v25  ;;  %v2423_v2 = vld [vmem:[#allocation25 + $0x958] sm:$0xff]  ;;  %v2586_v28 = vld [vmem:[#allocation25 + $0xe70] sm:$0xff] }
 0x55f   :  { %3109 = vmatpush.msrb.mxu1 %v2622_v27  ;;  %3162 = vmatmul.f32.vlgmr.msrb.gmra.mxu3 %v4683_v26  ;;  %v2443_v26 = vld [vmem:[#allocation25 + $0x9f8] sm:$0xff]  ;;  %v2582_v59 = vld [vmem:[#allocation25 + $0xe50] sm:$0xff] }
 0x560   :  { %3138 = vmatpush.msra.mxu2 %v2139_v22  ;;  %3169 = vmatpush.msrb.mxu0 %v2303_v46  ;;  %v2475_v5 = vld [vmem:[#allocation25 + $0xaf8] sm:$0xff]  ;;  %v2578_v14 = vld [vmem:[#allocation25 + $0xe30] sm:$0xff] }
 0x561   :  { %3226 = vmatpush.msra.mxu3 %v2507_v29  ;;  %3110 = vmatpush.msrb.mxu1 %v2618_v31  ;;  %v2267_v6 = vld [vmem:[#allocation25 + $0x478] sm:$0xff]  ;;  %v2574_v17 = vld [vmem:[#allocation25 + $0xe10] sm:$0xff] }
 0x562   :  { %3139 = vmatpush.msra.mxu2 %v2135_v30  ;;  %3170 = vmatpush.msrb.mxu0 %v2299_v32  ;;  %v2419_v7 = vld [vmem:[#allocation25 + $0x938] sm:$0xff] }
 0x563   :  { %3227 = vmatpush.msra.mxu3 %v2503_v11  ;;  %3111 = vmatpush.msrb.mxu1 %v2614_v34  ;;  %v2471_v8 = vld [vmem:[#allocation25 + $0xad8] sm:$0xff] }
 0x564   :  { %3140 = vmatpush.msra.mxu2 %v2131_v33  ;;  %3171 = vmatpush.msrb.mxu0 %v2295_v35  ;;  %v2263_v9 = vld [vmem:[#allocation25 + $0x458] sm:$0xff] }
 0x565   :  { %3228 = vmatpush.msra.mxu3 %v2499_v36  ;;  %3112 = vmatpush.msrb.mxu1 %v2610_v38  ;;  %v2415_v10 = vld [vmem:[#allocation25 + $0x918] sm:$0xff] }
 0x566   :  { %3141 = vmatpush.msra.mxu2 %v2127_v37  ;;  %3172 = vmatpush.msrb.mxu0 %v2291_v41  ;;  %v2467_v13 = vld [vmem:[#allocation25 + $0xab8] sm:$0xff]  ;;  %v3358_v41 = vld [vmem:[#allocation28 + $0x1e0] sm:$0xff] }
 0x567   :  { %3142 = vmatmul.f32.vlgmr.msra.gmra.mxu2 %v4687_v44  ;;  %3229 = vmatpush.msra.mxu3 %v2495_v42  ;;  %v2594_v44 = vld [vmem:[#allocation25 + $0xeb0] sm:$0xff]  ;;  %v2259_v15 = vld [vmem:[#allocation25 + $0x438] sm:$0xff] }
 0x568   :  { %3206 = vmatpush.msrb.mxu2 %v2443_v26  ;;  %3113 = vmatpush.msrb.mxu1 %v2606_v43  ;;  %v2411_v12 = vld [vmem:[#allocation25 + $0x8f8] sm:$0xff]  ;;  %v4732_v26 = vld [vmem:[#allocation27] sm:$0xf] }
 0x569   :  { %3173 = vmatpush.msrb.mxu0 %v2287_v57  ;;  %3230 = vmatpush.msra.mxu3 %v2491_v48  ;;  %v2463_v16 = vld [vmem:[#allocation25 + $0xa98] sm:$0xff] }
 0x56a   :  { %3207 = vmatpush.msrb.mxu2 %v2439_v47  ;;  %3114 = vmatpush.msrb.mxu1 %v2602_v49  ;;  %v2255_v18 = vld [vmem:[#allocation25 + $0x418] sm:$0xff] }
 0x56b   :  { %3174 = vmatpush.msrb.mxu0 %v2283_v50  ;;  %3231 = vmatpush.msra.mxu3 %v2487_v52  ;;  %v2407_v39 = vld [vmem:[#allocation25 + $0x8d8] sm:$0xff] }
 0x56c   :  { %3208 = vmatpush.msrb.mxu2 %v2435_v51  ;;  %3115 = vmatpush.msrb.mxu1 %v2598_v54  ;;  %v2459_v19 = vld [vmem:[#allocation25 + $0xa78] sm:$0xff]  ;;  %v2663_v51 = vpop.f32.mrf.mxu2  ;;  %v3326_v54 = vld [vmem:[#allocation28 + $0xe0] sm:$0xff] }
 0x56d   :  { %3175 = vmatpush.msrb.mxu0 %v2279_v55  ;;  %3232 = vmatpush.msra.mxu3 %v2483_v60  ;;  %v2379_v20 = vld [vmem:[#allocation25 + $0x7f8] sm:$0xff] }
 0x56e   :  { %3209 = vmatpush.msrb.mxu2 %v2431_v56  ;;  %3116 = vmatpush.msrb.mxu1 %v2594_v44  ;;  %v2571_v21 = vld [vmem:[#allocation25 + $0xdf8] sm:$0xff]  ;;  %v3354_v56 = vld [vmem:[#allocation28 + $0x1c0] sm:$0xff] }
 0x56f   :  { %3176 = vmatpush.msrb.mxu0 %v2275_v61  ;;  %3233 = vmatpush.msra.mxu3 %v2479_v63  ;;  %v2403_v4 = vld [vmem:[#allocation25 + $0x8b8] sm:$0xff] }
 0x570   :  { %3210 = vmatpush.msrb.mxu2 %v2427_v62  ;;  %3117 = vmatpush.msrb.mxu1 %v2590_v0  ;;  %v2455_v24 = vld [vmem:[#allocation25 + $0xa58] sm:$0xff] }
 0x571   :  { %3177 = vmatpush.msrb.mxu0 %v2271_v1  ;;  %3234 = vmatpush.msra.mxu3 %v2475_v5  ;;  %v2375_v22 = vld [vmem:[#allocation25 + $0x7d8] sm:$0xff]  ;;  %v3322_v1 = vld [vmem:[#allocation28 + $0xc0] sm:$0xff]  ;;  %v2683_v5 = vpop.f32.mrf.mxu3 }
 0x572   :  { %3211 = vmatpush.msrb.mxu2 %v2423_v2  ;;  %3118 = vmatpush.msrb.mxu1 %v2586_v28  ;;  %v2567_v25 = vld [vmem:[#allocation25 + $0xdd8] sm:$0xff]  ;;  %v3350_v2 = vld [vmem:[#allocation28 + $0x1a0] sm:$0xff] }
 0x573   :  { %3178 = vmatpush.msrb.mxu0 %v2267_v6  ;;  %3235 = vmatpush.msra.mxu3 %v2471_v8  ;;  %v2399_v27 = vld [vmem:[#allocation25 + $0x898] sm:$0xff]  ;;  %v2703_v8 = vpop.f32.mrf.mxu0 }
 0x574   :  { %3212 = vmatpush.msrb.mxu2 %v2419_v7  ;;  %3119 = vmatpush.msrb.mxu1 %v2582_v59  ;;  %v2451_v46 = vld [vmem:[#allocation25 + $0xa38] sm:$0xff] }
 0x575   :  { %3179 = vmatpush.msrb.mxu0 %v2263_v9  ;;  %3236 = vmatpush.msra.mxu3 %v2467_v13  ;;  %v2371_v29 = vld [vmem:[#allocation25 + $0x7b8] sm:$0xff]  ;;  %v3318_v13 = vld [vmem:[#allocation28 + $0xa0] sm:$0xff] }
 0x576   :  { %3213 = vmatpush.msrb.mxu2 %v2415_v10  ;;  %3120 = vmatpush.msrb.mxu1 %v2578_v14  ;;  %v2563_v30 = vld [vmem:[#allocation25 + $0xdb8] sm:$0xff]  ;;  %v2723_v14 = vpop.f32.mrf.mxu1 }
 0x577   :  { %3180 = vmatpush.msrb.mxu0 %v2259_v15  ;;  %3237 = vmatpush.msra.mxu3 %v2463_v16  ;;  %v2395_v31 = vld [vmem:[#allocation25 + $0x878] sm:$0xff] }
 0x578   :  { %3214 = vmatpush.msrb.mxu2 %v2411_v12  ;;  %3121 = vmatpush.msrb.mxu1 %v2574_v17  ;;  %v2447_v32 = vld [vmem:[#allocation25 + $0xa18] sm:$0xff]  ;;  %v3346_v12 = vld [vmem:[#allocation28 + $0x180] sm:$0xff] }
 0x579   :  { %3181 = vmatpush.msrb.mxu0 %v2255_v18  ;;  %3238 = vmatpush.msra.mxu3 %v2459_v19  ;;  %v2367_v11 = vld [vmem:[#allocation25 + $0x798] sm:$0xff] }
 0x57a   :  { %3215 = vmatpush.msrb.mxu2 %v2407_v39  ;;  %3122 = vmatmul.f32.vlgmr.msrb.gmra.mxu1 %v4714_v58  ;;  %v2391_v33 = vld [vmem:[#allocation25 + $0x858] sm:$0xff]  ;;  %v2743_v39 = vpop.f32.mrf.mxu2 }
 0x57b   :  { %3182 = vmatmul.f32.vlgmr.msrb.gmra.mxu0 %v4695_v3  ;;  %3186 = vmatpush.msra.mxu1 %v2379_v20  ;;  %v2559_v3 = vld [vmem:[#allocation25 + $0xd98] sm:$0xff] }
 0x57c   :  { %3246 = vmatpush.msra.mxu0 %v2571_v21  ;;  %3216 = vmatpush.msrb.mxu2 %v2403_v4  ;;  %v2363_v34 = vld [vmem:[#allocation25 + $0x778] sm:$0xff]  ;;  %v3314_v4 = vld [vmem:[#allocation28 + $0x80] sm:$0xff] }
 0x57d   :  { %3239 = vmatpush.msra.mxu3 %v2455_v24  ;;  %3187 = vmatpush.msra.mxu1 %v2375_v22  ;;  %v3360_v35 = vld [vmem:[#allocation28 + $0x1f0] sm:$0xff]  ;;  %v3342_v22 = vld [vmem:[#allocation28 + $0x160] sm:$0xff] }
 0x57e   :  { %3247 = vmatpush.msra.mxu0 %v2567_v25  ;;  %3217 = vmatpush.msrb.mxu2 %v2399_v27  ;;  %v2555_v36 = vld [vmem:[#allocation25 + $0xd78] sm:$0xff] }
 0x57f   :  { %3240 = vmatpush.msra.mxu3 %v2451_v46  ;;  %3188 = vmatpush.msra.mxu1 %v2371_v29  ;;  %v2387_v37 = vld [vmem:[#allocation25 + $0x838] sm:$0xff]  ;;  %v2763_v29 = vpop.f32.mrf.mxu3 }
 0x580   :  { %3248 = vmatpush.msra.mxu0 %v2563_v30  ;;  %3218 = vmatpush.msrb.mxu2 %v2395_v31  ;;  %v2359_v38 = vld [vmem:[#allocation25 + $0x758] sm:$0xff]  ;;  %v2783_v30 = vpop.f32.mrf.mxu0 }
 0x581   :  { %3241 = vmatpush.msra.mxu3 %v2447_v32  ;;  %3189 = vmatpush.msra.mxu1 %v2367_v11  ;;  %v2551_v42 = vld [vmem:[#allocation25 + $0xd58] sm:$0xff] }
 0x582   :  { %3242 = vmatmul.f32.vlgmr.msra.gmra.mxu3 %v4702_v23  ;;  %3249 = vmatpush.msra.mxu0 %v2559_v3  ;;  %v2383_v43 = vld [vmem:[#allocation25 + $0x818] sm:$0xff]  ;;  %v2638_v23 = vperm.slane %v4732_v26, 0  ;;  %v3310_v3 = vld [vmem:[#allocation28 + $0x60] sm:$0xff] }
 0x583   :  { %3219 = vmatpush.msrb.mxu2 %v2391_v33  ;;  %3190 = vmatpush.msra.mxu1 %v2363_v34  ;;  %v2355_v57 = vld [vmem:[#allocation25 + $0x738] sm:$0xff]  ;;  %v2803_v34 = vpop.f32.mrf.mxu1 }
 0x584   :  { %3452 = vmatpush.msrb.mxu3 %v3360_v35  ;;  %3250 = vmatpush.msra.mxu0 %v2555_v36  ;;  %v2547_v47 = vld [vmem:[#allocation25 + $0xd38] sm:$0xff]  ;;  %v2664_v61 = vadd.f32 %v2663_v51, %v2638_v23  ;;  %v2639_v35 = vperm.slane %v4732_v26, 1 }
 0x585   :  { %3220 = vmatpush.msrb.mxu2 %v2387_v37  ;;  %3191 = vmatpush.msra.mxu1 %v2359_v38  ;;  %v3328_v48 = vld [vmem:[#allocation28 + $0xf0] sm:$0xff] }
 0x586   :  { %3453 = vmatpush.msrb.mxu3 %v3358_v41  ;;  %3251 = vmatpush.msra.mxu0 %v2551_v42  ;;  %v2351_v49 = vld [vmem:[#allocation25 + $0x718] sm:$0xff]  ;;  %v2684_v7 = vadd.f32 %v2683_v5, %v2664_v61  ;;  %v2823_v41 = vpop.f32.mrf.mxu2  ;;  %v3338_v42 = vld [vmem:[#allocation28 + $0x140] sm:$0xff] }
 0x587   :  { %3221 = vmatpush.msrb.mxu2 %v2383_v43  ;;  %v3356_v50 = vld [vmem:[#allocation28 + $0x1d0] sm:$0xff]  ;;  %3192 = vmatpush.msra.mxu1 %v2355_v57  ;;  %v3306_v57 = vld [vmem:[#allocation28 + $0x40] sm:$0xff]  ;;  %v2824_v23 = vadd.f32 %v2823_v41, %v2639_v35  ;;  %v3361_v5 = vld [vmem:[#allocation28 + $0x1f8] sm:$0xff] }
 0x588   :  { %3222 = vmatmul.f32.vlgmr.msrb.gmra.mxu2 %v4699_v45  ;;  %v2543_v52 = vld [vmem:[#allocation25 + $0xd18] sm:$0xff]  ;;  %3252 = vmatpush.msra.mxu0 %v2547_v47  ;;  %v2704_v18 = vadd.f32 %v2703_v8, %v2684_v7 }
 0x589   :  { %3432 = vmatpush.msra.mxu2 %v3328_v48  ;;  %v2347_v55 = vld [vmem:[#allocation25 + $0x6f8] sm:$0xff]  ;;  %3193 = vmatpush.msra.mxu1 %v2351_v49 }
 0x58a   :  { %v2539_v60 = vld [vmem:[#allocation25 + $0xcf8] sm:$0xff]  ;;  %3454 = vmatpush.msrb.mxu3 %v3356_v50  ;;  %3253 = vmatpush.msra.mxu0 %v2543_v52  ;;  %v2724_v46 = vadd.f32 %v2723_v14, %v2704_v18  ;;  %v3334_v52 = vld [vmem:[#allocation28 + $0x120] sm:$0xff] }
 0x58b   :  { %v3324_v44 = vld [vmem:[#allocation28 + $0xd0] sm:$0xff]  ;;  %3433 = vmatpush.msra.mxu2 %v3326_v54  ;;  %3194 = vmatpush.msra.mxu1 %v2347_v55  ;;  %v3302_v55 = vld [vmem:[#allocation28 + $0x20] sm:$0xff]  ;;  %v3329_v7 = vld [vmem:[#allocation28 + $0xf8] sm:$0xff] }
 0x58c   :  { %v2343_v62 = vld [vmem:[#allocation25 + $0x6d8] sm:$0xff]  ;;  %3455 = vmatpush.msrb.mxu3 %v3354_v56  ;;  %3254 = vmatpush.msra.mxu0 %v2539_v60  ;;  %v2744_v33 = vadd.f32 %v2743_v39, %v2724_v46  ;;  %v2863_v56 = vpop.f32.mrf.mxu0  ;;  %v3355_v39 = vld [vmem:[#allocation28 + $0x1c8] sm:$0xff] }
 0x58d   :  { %v3352_v63 = vld [vmem:[#allocation28 + $0x1b0] sm:$0xff]  ;;  %3434 = vmatpush.msra.mxu2 %v3324_v44  ;;  %3195 = vmatpush.msra.mxu1 %v2343_v62  ;;  %v3325_v18 = vld [vmem:[#allocation28 + $0xd8] sm:$0xff] }
 0x58e   :  { %v2535_v0 = vld [vmem:[#allocation25 + $0xcd8] sm:$0xff]  ;;  %3456 = vmatpush.msrb.mxu3 %v3352_v63  ;;  %v2764_v38 = vadd.f32 %v2763_v29, %v2744_v33  ;;  %v2883_v63 = vpop.f32.mrf.mxu1  ;;  %v2903_v14 = vpop.f32.mrf.mxu2  ;;  %v3351_v29 = vld [vmem:[#allocation28 + $0x1a8] sm:$0xff]  ;;  %v3382_v33 = vld [vmem:[#allocation28 + $0x2a0] sm:$0xff] }
 0x58f   :  { %v2339_v45 = vld [vmem:[#allocation25 + $0x6b8] sm:$0xff]  ;;  %3255 = vmatpush.msra.mxu0 %v2535_v0  ;;  %3435 = vmatpush.msra.mxu2 %v3322_v1  ;;  %v3330_v0 = vld [vmem:[#allocation28 + $0x100] sm:$0xff] }
 0x590   :  { %v2531_v28 = vld [vmem:[#allocation25 + $0xcb8] sm:$0xff]  ;;  %3196 = vmatpush.msra.mxu1 %v2339_v45  ;;  %3457 = vmatpush.msrb.mxu3 %v3350_v2  ;;  %v2784_v47 = vadd.f32 %v2783_v30, %v2764_v38  ;;  %v3298_v2 = vld [vmem:[#allocation28] sm:$0xff] }
 0x591   :  { %v3320_v6 = vld [vmem:[#allocation28 + $0xb0] sm:$0xff]  ;;  %3256 = vmatpush.msra.mxu0 %v2531_v28  ;;  %v3317_v35 = vld [vmem:[#allocation28 + $0x98] sm:$0xff] }
 0x592   :  { %v2335_v59 = vld [vmem:[#allocation25 + $0x698] sm:$0xff]  ;;  %3436 = vmatpush.msra.mxu2 %v3320_v6  ;;  %v2804_v51 = vadd.f32 %v2803_v34, %v2784_v47 }
 0x593   :  { %v3348_v9 = vld [vmem:[#allocation28 + $0x190] sm:$0xff]  ;;  %3197 = vmatpush.msra.mxu1 %v2335_v59  ;;  %v3359_v59 = vld [vmem:[#allocation28 + $0x1e8] sm:$0xff]  ;;  %v3345_v47 = vld [vmem:[#allocation28 + $0x178] sm:$0xff] }
 0x594   :  { %v2527_v10 = vld [vmem:[#allocation25 + $0xc98] sm:$0xff]  ;;  %3458 = vmatpush.msrb.mxu3 %v3348_v9  ;;  %3437 = vmatpush.msra.mxu2 %v3318_v13  ;;  %v3290_v62 = vmul.f32 0.01, %v2804_v51  ;;  %vm3286_vm7 = vcmp.ge.f32.partialorder %v2804_v51, 0.0 }
 0x595   :  { %v2331_v15 = vld [vmem:[#allocation25 + $0x678] sm:$0xff]  ;;  %3257 = vmatpush.msra.mxu0 %v2527_v10  ;;  %v3327_v10 = vld [vmem:[#allocation28 + $0xe8] sm:$0xff] }
 0x596   :  { %v2523_v16 = vld [vmem:[#allocation25 + $0xc78] sm:$0xff]  ;;  %3198 = vmatpush.msra.mxu1 %v2331_v15  ;;  %3459 = vmatpush.msrb.mxu3 %v3346_v12  ;;  %v4739_v8 = vsel %vm3286_vm7, %v2804_v51, %v3290_v62  ;;  %v3390_v12 = vld [vmem:[#allocation28 + $0x2e0] sm:$0xff]  ;;  %v3343_v51 = vld [vmem:[#allocation28 + $0x168] sm:$0xff] }
 0x597   :  { %v3316_v17 = vld [vmem:[#allocation28 + $0x90] sm:$0xff]  ;;  %3258 = vmatpush.msra.mxu0 %v2523_v16  ;;  %v3357_v15 = vld [vmem:[#allocation28 + $0x1d8] sm:$0xff] }
 0x598   :  { %v2327_v19 = vld [vmem:[#allocation25 + $0x658] sm:$0xff]  ;;  %3438 = vmatpush.msra.mxu2 %v3316_v17 }
 0x599   :  { %v3344_v20 = vld [vmem:[#allocation28 + $0x170] sm:$0xff]  ;;  %3199 = vmatpush.msra.mxu1 %v2327_v19  ;;  %v3337_v62 = vld [vmem:[#allocation28 + $0x138] sm:$0xff] }
 0x59a   :  { %v2519_v21 = vld [vmem:[#allocation25 + $0xc58] sm:$0xff]  ;;  %3460 = vmatpush.msrb.mxu3 %v3344_v20  ;;  %3439 = vmatpush.msra.mxu2 %v3314_v4 }
 0x59b   :  { %v2323_v24 = vld [vmem:[#allocation25 + $0x638] sm:$0xff]  ;;  %3259 = vmatpush.msra.mxu0 %v2519_v21  ;;  %v3323_v21 = vld [vmem:[#allocation28 + $0xc8] sm:$0xff] }
 0x59c   :  { %v2515_v25 = vld [vmem:[#allocation25 + $0xc38] sm:$0xff]  ;;  %3200 = vmatpush.msra.mxu1 %v2323_v24  ;;  %3461 = vmatpush.msrb.mxu3 %v3342_v22  ;;  %v3386_v22 = vld [vmem:[#allocation28 + $0x2c0] sm:$0xff] }
 0x59d   :  { %v3312_v27 = vld [vmem:[#allocation28 + $0x70] sm:$0xff]  ;;  %3260 = vmatpush.msra.mxu0 %v2515_v25  ;;  %v3353_v24 = vld [vmem:[#allocation28 + $0x1b8] sm:$0xff] }
 0x59e   :  { %v2319_v31 = vld [vmem:[#allocation25 + $0x618] sm:$0xff]  ;;  %3440 = vmatpush.msra.mxu2 %v3312_v27 }
 0x59f   :  { %v3340_v32 = vld [vmem:[#allocation28 + $0x150] sm:$0xff]  ;;  %3201 = vmatpush.msra.mxu1 %v2319_v31  ;;  %v3321_v27 = vld [vmem:[#allocation28 + $0xb8] sm:$0xff] }
 0x5a0   :  { %v2511_v11 = vld [vmem:[#allocation25 + $0xc18] sm:$0xff]  ;;  %3462 = vmatpush.msrb.mxu3 %v3340_v32  ;;  %3441 = vmatpush.msra.mxu2 %v3310_v3  ;;  %v3319_v32 = vld [vmem:[#allocation28 + $0xa8] sm:$0xff] }
 0x5a1   :  { %v2635_v36 = vld [vmem:[#allocation25 + $0xff8] sm:$0xff]  ;;  %3261 = vmatpush.msra.mxu0 %v2511_v11  ;;  %3202 = vmatmul.f32.vlgmr.msra.gmra.mxu1 %v4691_v53  ;;  %v2843_v53 = vpop.f32.mrf.mxu3  ;;  %v2943_v11 = vpop.f32.mrf.mxu0 }
 0x5a2   :  { %v3308_v37 = vld [vmem:[#allocation28 + $0x50] sm:$0xff]  ;;  %3262 = vmatmul.f32.vlgmr.msra.gmra.mxu0 %v4708_v40  ;;  %3266 = vmatpush.msrb.mxu1 %v2635_v36  ;;  %v2844_v60 = vadd.f32 %v2843_v53, %v2824_v23  ;;  %v3349_v3 = vld [vmem:[#allocation28 + $0x198] sm:$0xff] }
 0x5a3   :  { %v2631_v43 = vld [vmem:[#allocation25 + $0xfd8] sm:$0xff]  ;;  %3442 = vmatpush.msra.mxu2 %v3308_v37  ;;  %3463 = vmatpush.msrb.mxu3 %v3338_v42  ;;  %v3347_v37 = vld [vmem:[#allocation28 + $0x188] sm:$0xff] }
 0x5a4   :  { %v3336_v48 = vld [vmem:[#allocation28 + $0x130] sm:$0xff]  ;;  %3267 = vmatpush.msrb.mxu1 %v2631_v43  ;;  %v2864_v1 = vadd.f32 %v2863_v56, %v2844_v60  ;;  %v3315_v43 = vld [vmem:[#allocation28 + $0x88] sm:$0xff]  ;;  %v3341_v53 = vld [vmem:[#allocation28 + $0x158] sm:$0xff] }
 0x5a5   :  { %v2627_v49 = vld [vmem:[#allocation25 + $0xfb8] sm:$0xff]  ;;  %3443 = vmatpush.msra.mxu2 %v3306_v57  ;;  %3464 = vmatpush.msrb.mxu3 %v3336_v48  ;;  %v3378_v48 = vld [vmem:[#allocation28 + $0x280] sm:$0xff]  ;;  %v3339_v60 = vld [vmem:[#allocation28 + $0x148] sm:$0xff] }
 0x5a6   :  { %v3304_v50 = vld [vmem:[#allocation28 + $0x30] sm:$0xff]  ;;  %3268 = vmatpush.msrb.mxu1 %v2627_v49  ;;  %v2884_v28 = vadd.f32 %v2883_v63, %v2864_v1  ;;  %v3313_v49 = vld [vmem:[#allocation28 + $0x78] sm:$0xff]  ;;  %v3335_v1 = vld [vmem:[#allocation28 + $0x128] sm:$0xff] }
 0x5a7   :  { %v2623_v54 = vld [vmem:[#allocation25 + $0xf98] sm:$0xff]  ;;  %3444 = vmatpush.msra.mxu2 %v3304_v50  ;;  %3465 = vmatpush.msrb.mxu3 %v3334_v52 }
 0x5a8   :  { %v3332_v40 = vld [vmem:[#allocation28 + $0x110] sm:$0xff]  ;;  %3269 = vmatpush.msrb.mxu1 %v2623_v54  ;;  %v2904_v16 = vadd.f32 %v2903_v14, %v2884_v28  ;;  %v3309_v56 = vld [vmem:[#allocation28 + $0x58] sm:$0xff]  ;;  %v3391_v14 = vld [vmem:[#allocation28 + $0x2e8] sm:$0xff] }
 0x5a9   :  { %v2619_v44 = vld [vmem:[#allocation25 + $0xf78] sm:$0xff]  ;;  %3445 = vmatpush.msra.mxu2 %v3302_v55  ;;  %3466 = vmatpush.msrb.mxu3 %v3332_v40  ;;  %v2923_v4 = vpop.f32.mrf.mxu3  ;;  %v3311_v55 = vld [vmem:[#allocation28 + $0x68] sm:$0xff] }
 0x5aa   :  { %v3300_v61 = vld [vmem:[#allocation28 + $0x10] sm:$0xff]  ;;  %3270 = vmatpush.msrb.mxu1 %v2619_v44  ;;  %v2924_v46 = vadd.f32 %v2923_v4, %v2904_v16  ;;  %v3307_v44 = vld [vmem:[#allocation28 + $0x48] sm:$0xff]  ;;  %v3385_v16 = vld [vmem:[#allocation28 + $0x2b8] sm:$0xff]  ;;  %v2640_v4 = vperm.slane %v4732_v26, 2 }
 0x5ab   :  { %v2615_v45 = vld [vmem:[#allocation25 + $0xf58] sm:$0xff]  ;;  %3446 = vmatpush.msra.mxu2 %v3300_v61  ;;  %3467 = vmatpush.msrb.mxu3 %v3330_v0  ;;  %v3374_v61 = vld [vmem:[#allocation28 + $0x260] sm:$0xff] }
 0x5ac   :  { %v2611_v6 = vld [vmem:[#allocation25 + $0xf38] sm:$0xff]  ;;  %3271 = vmatpush.msrb.mxu1 %v2615_v45  ;;  %v2944_v36 = vadd.f32 %v2943_v11, %v2924_v46  ;;  %v3370_v45 = vld [vmem:[#allocation28 + $0x240] sm:$0xff] }
 0x5ad   :  { %3447 = vmatpush.msra.mxu2 %v3298_v2  ;;  %v2607_v9 = vld [vmem:[#allocation25 + $0xf18] sm:$0xff]  ;;  %3532 = vmatpush.msra.mxu3 %v3361_v5  ;;  %v3303_v2 = vld [vmem:[#allocation28 + $0x28] sm:$0xff]  ;;  %v3422_v11 = vld [vmem:[#allocation28 + $0x3e0] sm:$0xff] }
 0x5ae   :  { %3448 = vmatmul.f32.vlgmr.msra.gmra.mxu2 %v4739_v8  ;;  %v3392_v13 = vld [vmem:[#allocation28 + $0x2f0] sm:$0xff]  ;;  %3272 = vmatpush.msrb.mxu1 %v2611_v6  ;;  %v3305_v0 = vld [vmem:[#allocation28 + $0x38] sm:$0xff]  ;;  %v3331_v6 = vld [vmem:[#allocation28 + $0x108] sm:$0xff] }
 0x5af   :  { %3512 = vmatpush.msrb.mxu2 %v3329_v7  ;;  %v2603_v17 = vld [vmem:[#allocation25 + $0xef8] sm:$0xff]  ;;  %3533 = vmatpush.msra.mxu3 %v3359_v59  ;;  %v3366_v7 = vld [vmem:[#allocation28 + $0x220] sm:$0xff]  ;;  %v3299_v59 = vld [vmem:[#allocation28 + $0x8] sm:$0xff] }
 0x5b0   :  { %3472 = vmatpush.msrb.mxu0 %v3392_v13  ;;  %3273 = vmatpush.msrb.mxu1 %v2607_v9  ;;  %v3388_v19 = vld [vmem:[#allocation28 + $0x2d0] sm:$0xff]  ;;  %v2963_v38 = vpop.f32.mrf.mxu1  ;;  %v3333_v5 = vld [vmem:[#allocation28 + $0x118] sm:$0xff] }
 0x5b1   :  { %3513 = vmatpush.msrb.mxu2 %v3327_v10  ;;  %v2599_v20 = vld [vmem:[#allocation25 + $0xed8] sm:$0xff]  ;;  %3534 = vmatpush.msra.mxu3 %v3357_v15  ;;  %v2964_v57 = vadd.f32 %v2963_v38, %v2944_v36  ;;  %v3362_v10 = vld [vmem:[#allocation28 + $0x200] sm:$0xff] }
 0x5b2   :  { %3473 = vmatpush.msrb.mxu0 %v3390_v12  ;;  %3274 = vmatpush.msrb.mxu1 %v2603_v17  ;;  %v2595_v25 = vld [vmem:[#allocation25 + $0xeb8] sm:$0xff]  ;;  %v3387_v12 = vld [vmem:[#allocation28 + $0x2c8] sm:$0xff] }
 0x5b3   :  { %3514 = vmatpush.msrb.mxu2 %v3325_v18  ;;  %3535 = vmatpush.msra.mxu3 %v3355_v39  ;;  %v3384_v30 = vld [vmem:[#allocation28 + $0x2b0] sm:$0xff]  ;;  %v3291_v50 = vmul.f32 0.01, %v2964_v57  ;;  %vm3287_vm8 = vcmp.ge.f32.partialorder %v2964_v57, 0.0  ;;  %v3393_v13 = vld [vmem:[#allocation28 + $0x2f8] sm:$0xff]  ;;  %v3383_v17 = vld [vmem:[#allocation28 + $0x2a8] sm:$0xff] }
 0x5b4   :  { %3474 = vmatpush.msrb.mxu0 %v3388_v19  ;;  %3275 = vmatpush.msrb.mxu1 %v2599_v20  ;;  %v2591_v31 = vld [vmem:[#allocation25 + $0xe98] sm:$0xff]  ;;  %v3379_v39 = vld [vmem:[#allocation28 + $0x288] sm:$0xff] }
 0x5b5   :  { %3515 = vmatpush.msrb.mxu2 %v3323_v21  ;;  %3536 = vmatpush.msra.mxu3 %v3353_v24  ;;  %v2587_v34 = vld [vmem:[#allocation25 + $0xe78] sm:$0xff]  ;;  %v3295_v40 = vsel %vm3287_vm8, %v2964_v57, %v3291_v50  ;;  %v3371_v21 = vld [vmem:[#allocation28 + $0x248] sm:$0xff]  ;;  %v2983_v24 = vpop.f32.mrf.mxu2 }
 0x5b6   :  { %3475 = vmatpush.msrb.mxu0 %v3386_v22  ;;  %3276 = vmatpush.msrb.mxu1 %v2595_v25  ;;  %v3380_v41 = vld [vmem:[#allocation28 + $0x290] sm:$0xff]  ;;  %v3389_v15 = vld [vmem:[#allocation28 + $0x2d8] sm:$0xff]  ;;  %v3367_v25 = vld [vmem:[#allocation28 + $0x228] sm:$0xff] }
 0x5b7   :  { %3516 = vmatpush.msrb.mxu2 %v3321_v27  ;;  %3537 = vmatpush.msra.mxu3 %v3351_v29  ;;  %v2583_v42 = vld [vmem:[#allocation25 + $0xe58] sm:$0xff]  ;;  %v2984_v27 = vadd.f32 %v2983_v24, %v2640_v4 }
 0x5b8   :  { %3476 = vmatpush.msrb.mxu0 %v3384_v30  ;;  %3277 = vmatpush.msrb.mxu1 %v2591_v31  ;;  %v2579_v23 = vld [vmem:[#allocation25 + $0xe38] sm:$0xff]  ;;  %v3003_v30 = vpop.f32.mrf.mxu3  ;;  %v3023_v31 = vpop.f32.mrf.mxu0 }
 0x5b9   :  { %3517 = vmatpush.msrb.mxu2 %v3319_v32  ;;  %3538 = vmatpush.msra.mxu3 %v3349_v3  ;;  %v3376_v52 = vld [vmem:[#allocation28 + $0x270] sm:$0xff]  ;;  %v3381_v18 = vld [vmem:[#allocation28 + $0x298] sm:$0xff]  ;;  %v3363_v32 = vld [vmem:[#allocation28 + $0x208] sm:$0xff]  ;;  %v3004_v3 = vadd.f32 %v3003_v30, %v2984_v27 }
 0x5ba   :  { %3477 = vmatpush.msrb.mxu0 %v3382_v33  ;;  %3278 = vmatpush.msrb.mxu1 %v2587_v34  ;;  %v2575_v54 = vld [vmem:[#allocation25 + $0xe18] sm:$0xff] }
 0x5bb   :  { %3518 = vmatpush.msrb.mxu2 %v3317_v35  ;;  %3539 = vmatpush.msra.mxu3 %v3347_v37  ;;  %v3372_v63 = vld [vmem:[#allocation28 + $0x250] sm:$0xff]  ;;  %v3377_v19 = vld [vmem:[#allocation28 + $0x278] sm:$0xff]  ;;  %v3024_v34 = vadd.f32 %v3023_v31, %v3004_v3  ;;  %v3418_v37 = vld [vmem:[#allocation28 + $0x3c0] sm:$0xff] }
 0x5bc   :  { %3478 = vmatpush.msrb.mxu0 %v3380_v41  ;;  %3279 = vmatpush.msrb.mxu1 %v2583_v42  ;;  %v3368_v28 = vld [vmem:[#allocation28 + $0x230] sm:$0xff]  ;;  %v3373_v20 = vld [vmem:[#allocation28 + $0x258] sm:$0xff] }
 0x5bd   :  { %3519 = vmatpush.msrb.mxu2 %v3315_v43  ;;  %3540 = vmatpush.msra.mxu3 %v3345_v47  ;;  %v3364_v9 = vld [vmem:[#allocation28 + $0x210] sm:$0xff]  ;;  %v3369_v22 = vld [vmem:[#allocation28 + $0x238] sm:$0xff]  ;;  %v3414_v43 = vld [vmem:[#allocation28 + $0x3a0] sm:$0xff] }
 0x5be   :  { %3479 = vmatpush.msrb.mxu0 %v3378_v48  ;;  %3280 = vmatpush.msrb.mxu1 %v2579_v23  ;;  %v3365_v46 = vld [vmem:[#allocation28 + $0x218] sm:$0xff]  ;;  %v3424_v29 = vld [vmem:[#allocation28 + $0x3f0] sm:$0xff]  ;;  %v3410_v23 = vld [vmem:[#allocation28 + $0x380] sm:$0xff] }
 0x5bf   :  { %3520 = vmatpush.msrb.mxu2 %v3313_v49  ;;  %3541 = vmatpush.msra.mxu3 %v3343_v51  ;;  %v3420_v36 = vld [vmem:[#allocation28 + $0x3d0] sm:$0xff] }
 0x5c0   :  { %3480 = vmatpush.msrb.mxu0 %v3376_v52  ;;  %3281 = vmatpush.msrb.mxu1 %v2575_v54  ;;  %v3416_v38 = vld [vmem:[#allocation28 + $0x3b0] sm:$0xff]  ;;  %v3083_v47 = vpop.f32.mrf.mxu3 }
 0x5c1   :  { %3521 = vmatpush.msrb.mxu2 %v3311_v55  ;;  %3282 = vmatmul.f32.vlgmr.msrb.gmra.mxu1 %v4714_v58  ;;  %v3301_v58 = vld [vmem:[#allocation28 + $0x18] sm:$0xff]  ;;  %v3412_v57 = vld [vmem:[#allocation28 + $0x390] sm:$0xff]  ;;  %v3406_v55 = vld [vmem:[#allocation28 + $0x360] sm:$0xff] }
 0x5c2   :  { %3542 = vmatpush.msra.mxu3 %v3341_v53  ;;  %3481 = vmatpush.msrb.mxu0 %v3374_v61  ;;  %v3408_v49 = vld [vmem:[#allocation28 + $0x370] sm:$0xff]  ;;  %v3398_v61 = vld [vmem:[#allocation28 + $0x320] sm:$0xff] }
 0x5c3   :  { %3522 = vmatpush.msrb.mxu2 %v3309_v56  ;;  %3468 = vmatmul.f32.vlgmr.msrb.gmra.mxu3 %v3295_v40  ;;  %v3404_v56 = vld [vmem:[#allocation28 + $0x350] sm:$0xff] }
 0x5c4   :  { %3543 = vmatpush.msra.mxu3 %v3339_v60  ;;  %3482 = vmatpush.msrb.mxu0 %v3372_v63  ;;  %v3402_v60 = vld [vmem:[#allocation28 + $0x340] sm:$0xff]  ;;  %v3612_v3 = vld [vmem:[#allocation31 + $0x70] sm:$0xff] }
 0x5c5   :  { %3523 = vmatpush.msrb.mxu2 %v3307_v44  ;;  %3492 = vmatpush.msra.mxu1 %v3424_v29  ;;  %v3400_v44 = vld [vmem:[#allocation28 + $0x330] sm:$0xff]  ;;  %v3394_v63 = vld [vmem:[#allocation28 + $0x300] sm:$0xff] }
 0x5c6   :  { %3544 = vmatpush.msra.mxu3 %v3337_v62  ;;  %3483 = vmatpush.msrb.mxu0 %v3370_v45  ;;  %v3396_v62 = vld [vmem:[#allocation28 + $0x310] sm:$0xff]  ;;  %v3421_v45 = vld [vmem:[#allocation28 + $0x3d8] sm:$0xff] }
 0x5c7   :  { %3524 = vmatpush.msrb.mxu2 %v3305_v0  ;;  %3493 = vmatpush.msra.mxu1 %v3422_v11  ;;  %v3425_v0 = vld [vmem:[#allocation28 + $0x3f8] sm:$0xff] }
 0x5c8   :  { %3545 = vmatpush.msra.mxu3 %v3335_v1  ;;  %3484 = vmatpush.msrb.mxu0 %v3368_v28  ;;  %v3423_v1 = vld [vmem:[#allocation28 + $0x3e8] sm:$0xff]  ;;  %v3613_v11 = vld [vmem:[#allocation31 + $0x78] sm:$0xff] }
 0x5c9   :  { %3525 = vmatpush.msrb.mxu2 %v3303_v2  ;;  %3494 = vmatpush.msra.mxu1 %v3420_v36  ;;  %v3419_v2 = vld [vmem:[#allocation28 + $0x3c8] sm:$0xff] }
 0x5ca   :  { %3546 = vmatpush.msra.mxu3 %v3333_v5  ;;  %3485 = vmatpush.msrb.mxu0 %v3366_v7  ;;  %v3063_v41 = vpop.f32.mrf.mxu2  ;;  %v3417_v5 = vld [vmem:[#allocation28 + $0x3b8] sm:$0xff]  ;;  %v3415_v28 = vld [vmem:[#allocation28 + $0x3a8] sm:$0xff] }
 0x5cb   :  { %3526 = vmatpush.msrb.mxu2 %v3301_v58  ;;  %3495 = vmatpush.msra.mxu1 %v3418_v37  ;;  %v3413_v58 = vld [vmem:[#allocation28 + $0x398] sm:$0xff]  ;;  %v3627_v36 = vld [vmem:[#allocation31 + $0xe8] sm:$0xff]  ;;  %v3610_v37 = vld [vmem:[#allocation31 + $0x60] sm:$0xff] }
 0x5cc   :  { %3547 = vmatpush.msra.mxu3 %v3331_v6  ;;  %3486 = vmatpush.msrb.mxu0 %v3364_v9  ;;  %v3411_v6 = vld [vmem:[#allocation28 + $0x388] sm:$0xff]  ;;  %v3409_v7 = vld [vmem:[#allocation28 + $0x378] sm:$0xff] }
 0x5cd   :  { %3527 = vmatpush.msrb.mxu2 %v3299_v59  ;;  %3548 = vmatmul.f32.vlgmr.msra.gmra.mxu3 %v3295_v40  ;;  %v3407_v59 = vld [vmem:[#allocation28 + $0x368] sm:$0xff]  ;;  %v3405_v9 = vld [vmem:[#allocation28 + $0x358] sm:$0xff] }
 0x5ce   :  { %3528 = vmatmul.f32.vlgmr.msrb.gmra.mxu2 %v4739_v8  ;;  %3487 = vmatpush.msrb.mxu0 %v3362_v10  ;;  %v3375_v8 = vld [vmem:[#allocation28 + $0x268] sm:$0xff] }
 0x5cf   :  { %3496 = vmatpush.msra.mxu1 %v3416_v38  ;;  %v3403_v10 = vld [vmem:[#allocation28 + $0x348] sm:$0xff]  ;;  %3634 = vmatpush.msra.mxu2 %v3613_v11  ;;  %v3683_v11 = vld [vmem:[%s4846_s21 + $0x30] sm:$0xff] }
 0x5d0   :  { %3552 = vmatpush.msra.mxu0 %v3393_v13  ;;  %v3401_v13 = vld [vmem:[#allocation28 + $0x338] sm:$0xff]  ;;  %v3626_v38 = vld [vmem:[#allocation31 + $0xe0] sm:$0xff] }
 0x5d1   :  { %3497 = vmatpush.msra.mxu1 %v3414_v43  ;;  %3635 = vmatpush.msra.mxu2 %v3612_v3  ;;  %v3608_v43 = vld [vmem:[#allocation31 + $0x50] sm:$0xff] }
 0x5d2   :  { %3553 = vmatpush.msra.mxu0 %v3391_v14  ;;  %v3399_v14 = vld [vmem:[#allocation28 + $0x328] sm:$0xff]  ;;  %v3682_v3 = vld [vmem:[%s4846_s21 + $0x28] sm:$0xff] }
 0x5d3   :  { %3498 = vmatpush.msra.mxu1 %v3412_v57  ;;  %v3624_v57 = vld [vmem:[#allocation31 + $0xd0] sm:$0xff] }
 0x5d4   :  { %3554 = vmatpush.msra.mxu0 %v3389_v15  ;;  %v3043_v33 = vpop.f32.mrf.mxu1  ;;  %v2641_v15 = vperm.slane %v4732_v26, 3 }
 0x5d5   :  { %v3044_v35 = vadd.f32 %v3043_v33, %v3024_v34  ;;  %v3103_v50 = vpop.f32.mrf.mxu0  ;;  %3499 = vmatpush.msra.mxu1 %v3410_v23  ;;  %v3629_v33 = vld [vmem:[#allocation31 + $0xf8] sm:$0xff]  ;;  %v3611_v34 = vld [vmem:[#allocation31 + $0x68] sm:$0xff]  ;;  %v3606_v23 = vld [vmem:[#allocation31 + $0x40] sm:$0xff] }
 0x5d6   :  { %3555 = vmatpush.msra.mxu0 %v3387_v12  ;;  %3654 = vmatpush.msrb.mxu3 %v3629_v33  ;;  %v3681_v33 = vld [vmem:[%s4846_s21 + $0x20] sm:$0xff] }
 0x5d7   :  { %v3064_v42 = vadd.f32 %v3063_v41, %v3044_v35  ;;  %3500 = vmatpush.msra.mxu1 %v3408_v49  ;;  %v3628_v35 = vld [vmem:[#allocation31 + $0xf0] sm:$0xff]  ;;  %3636 = vmatpush.msra.mxu2 %v3611_v34  ;;  %v3609_v41 = vld [vmem:[#allocation31 + $0x58] sm:$0xff]  ;;  %v3622_v49 = vld [vmem:[#allocation31 + $0xc0] sm:$0xff] }
 0x5d8   :  { %3556 = vmatpush.msra.mxu0 %v3385_v16  ;;  %v3397_v16 = vld [vmem:[#allocation28 + $0x318] sm:$0xff]  ;;  %3655 = vmatpush.msrb.mxu3 %v3628_v35  ;;  %v3680_v34 = vld [vmem:[%s4846_s21 + $0x18] sm:$0xff] }
 0x5d9   :  { %v3084_v48 = vadd.f32 %v3083_v47, %v3064_v42  ;;  %3501 = vmatpush.msra.mxu1 %v3406_v55  ;;  %3637 = vmatpush.msra.mxu2 %v3610_v37  ;;  %v3625_v42 = vld [vmem:[#allocation31 + $0xd8] sm:$0xff]  ;;  %v3607_v47 = vld [vmem:[#allocation31 + $0x48] sm:$0xff]  ;;  %v3602_v55 = vld [vmem:[#allocation31 + $0x20] sm:$0xff] }
 0x5da   :  { %3557 = vmatpush.msra.mxu0 %v3383_v17  ;;  %v3395_v17 = vld [vmem:[#allocation28 + $0x308] sm:$0xff]  ;;  %3656 = vmatpush.msrb.mxu3 %v3627_v36  ;;  %v3679_v35 = vld [vmem:[%s4846_s21 + $0x10] sm:$0xff]  ;;  %v3678_v36 = vld [vmem:[%s4846_s21 + $0x8] sm:$0xff] }
 0x5db   :  { %v3104_v51 = vadd.f32 %v3103_v50, %v3084_v48  ;;  %3502 = vmatpush.msra.mxu1 %v3404_v56  ;;  %3638 = vmatpush.msra.mxu2 %v3609_v41  ;;  %v3623_v48 = vld [vmem:[#allocation31 + $0xc8] sm:$0xff]  ;;  %v3605_v50 = vld [vmem:[#allocation31 + $0x38] sm:$0xff]  ;;  %v3600_v56 = vld [vmem:[#allocation31 + $0x10] sm:$0xff] }
 0x5dc   :  { %3558 = vmatpush.msra.mxu0 %v3381_v18  ;;  %3657 = vmatpush.msrb.mxu3 %v3626_v38  ;;  %v3677_v37 = vld [vmem:[%s4846_s21] sm:$0xff]  ;;  %v3727_v38 = vld [vmem:[%s4848_s23 + $0x38] sm:$0xff]  ;;  %v3726_v41 = vld [vmem:[%s4848_s23 + $0x30] sm:$0xff] }
 0x5dd   :  { %3503 = vmatpush.msra.mxu1 %v3402_v60  ;;  %3639 = vmatpush.msra.mxu2 %v3608_v43  ;;  %v3599_v60 = vld [vmem:[#allocation31 + $0x8] sm:$0xff] }
 0x5de   :  { %3559 = vmatpush.msra.mxu0 %v3379_v39  ;;  %3658 = vmatpush.msrb.mxu3 %v3625_v42  ;;  %v3725_v42 = vld [vmem:[%s4848_s23 + $0x28] sm:$0xff]  ;;  %v3724_v43 = vld [vmem:[%s4848_s23 + $0x20] sm:$0xff] }
 0x5df   :  { %3504 = vmatpush.msra.mxu1 %v3400_v44  ;;  %3640 = vmatpush.msra.mxu2 %v3607_v47  ;;  %v3619_v44 = vld [vmem:[#allocation31 + $0xa8] sm:$0xff]  ;;  %v3814_v47 = vld [vmem:[#allocation33] ss:$0 sm:$0xff] }
 0x5e0   :  { %3560 = vmatpush.msra.mxu0 %v3377_v19  ;;  %3659 = vmatpush.msrb.mxu3 %v3624_v57  ;;  %v3723_v57 = vld [vmem:[%s4848_s23 + $0x18] sm:$0xff] }
 0x5e1   :  { %3505 = vmatpush.msra.mxu1 %v3398_v61  ;;  %3641 = vmatpush.msra.mxu2 %v3606_v23  ;;  %v3598_v61 = vld [vmem:[#allocation31] sm:$0xff] }
 0x5e2   :  { %3561 = vmatpush.msra.mxu0 %v3375_v8  ;;  %v3163_v39 = vpop.f32.mrf.mxu3  ;;  %3660 = vmatpush.msrb.mxu3 %v3623_v48 }
 0x5e3   :  { %3506 = vmatpush.msra.mxu1 %v3396_v62  ;;  %3642 = vmatpush.msra.mxu2 %v3605_v50  ;;  %v3618_v62 = vld [vmem:[#allocation31 + $0xa0] sm:$0xff] }
 0x5e4   :  { %3562 = vmatpush.msra.mxu0 %v3373_v20  ;;  %3661 = vmatpush.msrb.mxu3 %v3622_v49 }
 0x5e5   :  { %3507 = vmatpush.msra.mxu1 %v3394_v63  ;;  %v3617_v63 = vld [vmem:[#allocation31 + $0x98] sm:$0xff] }
 0x5e6   :  { %3563 = vmatpush.msra.mxu0 %v3371_v21 }
 0x5e7   :  { %3572 = vmatpush.msrb.mxu1 %v3425_v0  ;;  %v3616_v0 = vld [vmem:[#allocation31 + $0x90] sm:$0xff] }
 0x5e8   :  { %3564 = vmatpush.msra.mxu0 %v3369_v22 }
 0x5e9   :  { %3573 = vmatpush.msrb.mxu1 %v3423_v1  ;;  %v3615_v1 = vld [vmem:[#allocation31 + $0x88] sm:$0xff] }
 0x5ea   :  { %3565 = vmatpush.msra.mxu0 %v3367_v25  ;;  %v3143_v12 = vpop.f32.mrf.mxu2 }
 0x5eb   :  { %3574 = vmatpush.msrb.mxu1 %v3421_v45  ;;  %v3144_v18 = vadd.f32 %v3143_v12, %v2641_v15  ;;  %v3614_v45 = vld [vmem:[#allocation31 + $0x80] sm:$0xff]  ;;  %v3685_v12 = vld [vmem:[%s4846_s21 + $0x40] sm:$0xff] }
 0x5ec   :  { %3566 = vmatpush.msra.mxu0 %v3365_v46 }
 0x5ed   :  { %3575 = vmatpush.msrb.mxu1 %v3419_v2  ;;  %v3164_v8 = vadd.f32 %v3163_v39, %v3144_v18  ;;  %v3692_v2 = vld [vmem:[%s4846_s21 + $0x78] sm:$0xff] }
 0x5ee   :  { %3567 = vmatpush.msra.mxu0 %v3363_v32 }
 0x5ef   :  { %3576 = vmatpush.msrb.mxu1 %v3417_v5  ;;  %v3691_v5 = vld [vmem:[%s4846_s21 + $0x70] sm:$0xff] }
 0x5f1   :  { %3577 = vmatpush.msrb.mxu1 %v3415_v28  ;;  %v3690_v28 = vld [vmem:[%s4846_s21 + $0x68] sm:$0xff] }
 0x5f3   :  { %3578 = vmatpush.msrb.mxu1 %v3413_v58  ;;  %v3689_v58 = vld [vmem:[%s4846_s21 + $0x60] sm:$0xff] }
 0x5f5   :  { %3579 = vmatpush.msrb.mxu1 %v3411_v6  ;;  %v3426_v6 = vld [vmem:[#allocation30] sm:$0x3] }
 0x5f6   :  { %v3429_v39 = vperm.slane %v3426_v6, 1 }
 0x5f7   :  { %v3123_v52 = vpop.f32.mrf.mxu1  ;;  %3580 = vmatpush.msrb.mxu1 %v3409_v7  ;;  %v3688_v7 = vld [vmem:[%s4846_s21 + $0x58] sm:$0xff] }
 0x5f8   :  { %v3124_v54 = vadd.f32 %v3123_v52, %v3104_v51  ;;  %v3183_v19 = vpop.f32.mrf.mxu0  ;;  %v3621_v51 = vld [vmem:[#allocation31 + $0xb8] sm:$0xff]  ;;  %v3604_v52 = vld [vmem:[#allocation31 + $0x30] sm:$0xff] }
 0x5f9   :  { %3581 = vmatpush.msrb.mxu1 %v3407_v59  ;;  %v3184_v21 = vadd.f32 %v3183_v19, %v3164_v8  ;;  %3662 = vmatpush.msrb.mxu3 %v3621_v51 }
 0x5fa   :  { %vm3288_vm9 = vcmp.ge.f32.partialorder %v3124_v54, 0.0  ;;  %v3292_v53 = vmul.f32 0.01, %v3124_v54  ;;  %3643 = vmatpush.msra.mxu2 %v3604_v52 }
 0x5fb   :  { %3582 = vmatpush.msrb.mxu1 %v3405_v9  ;;  %v3687_v9 = vld [vmem:[%s4846_s21 + $0x50] sm:$0xff] }
 0x5fc   :  { %v3296_v40 = vsel %vm3288_vm9, %v3124_v54, %v3292_v53  ;;  %v3603_v54 = vld [vmem:[#allocation31 + $0x28] sm:$0xff]  ;;  %v3601_v53 = vld [vmem:[#allocation31 + $0x18] sm:$0xff] }
 0x5fd   :  { %3488 = vmatmul.f32.vlgmr.msrb.gmra.mxu0 %v3296_v40  ;;  %3583 = vmatpush.msrb.mxu1 %v3403_v10  ;;  %v3428_v10 = vperm.slane %v3426_v6, 0 }
 0x5fe   :  { %3644 = vmatpush.msra.mxu2 %v3603_v54  ;;  %3697 = vmatpush.msrb.mxu0 %v3692_v2  ;;  %v3722_v54 = vld [vmem:[%s4848_s23 + $0x10] sm:$0xff] }
 0x5ff   :  { %3584 = vmatpush.msrb.mxu1 %v3401_v13 }
 0x600   :  { %3645 = vmatpush.msra.mxu2 %v3602_v55  ;;  %3698 = vmatpush.msrb.mxu0 %v3691_v5  ;;  %v3721_v55 = vld [vmem:[%s4848_s23 + $0x8] sm:$0xff] }
 0x601   :  { %3585 = vmatpush.msrb.mxu1 %v3399_v14  ;;  %v3686_v14 = vld [vmem:[%s4846_s21 + $0x48] sm:$0xff] }
 0x602   :  { %3646 = vmatpush.msra.mxu2 %v3601_v53  ;;  %3699 = vmatpush.msrb.mxu0 %v3690_v28  ;;  %v3720_v53 = vld [vmem:[%s4848_s23] sm:$0xff] }
 0x603   :  { %3586 = vmatpush.msrb.mxu1 %v3397_v16 }
 0x604   :  { %3647 = vmatpush.msra.mxu2 %v3600_v56  ;;  %3700 = vmatpush.msrb.mxu0 %v3689_v58  ;;  %v3815_v56 = vld [vmem:[#allocation34] ss:$0 sm:$0xff] }
 0x605   :  { %3568 = vmatmul.f32.vlgmr.msra.gmra.mxu0 %v3296_v40  ;;  %3587 = vmatpush.msrb.mxu1 %v3395_v17  ;;  %v3243_v25 = vpop.f32.mrf.mxu3  ;;  %v3620_v40 = vld [vmem:[#allocation31 + $0xb0] sm:$0xff]  ;;  %v3684_v17 = vld [vmem:[%s4846_s21 + $0x38] sm:$0xff] }
 0x606   :  { %3663 = vmatpush.msrb.mxu3 %v3620_v40  ;;  %3648 = vmatpush.msra.mxu2 %v3599_v60 }
 0x607   :  { %3701 = vmatpush.msrb.mxu0 %v3688_v7 }
 0x608   :  { %3664 = vmatpush.msrb.mxu3 %v3619_v44  ;;  %3649 = vmatpush.msra.mxu2 %v3598_v61 }
 0x609   :  { %3702 = vmatpush.msrb.mxu0 %v3687_v9 }
 0x60a   :  { %3665 = vmatpush.msrb.mxu3 %v3618_v62  ;;  %v3816_v62 = vld [vmem:[%s4879_s25] ss:$0 sm:$0xff] }
 0x60b   :  { %v3223_v24 = vpop.f32.mrf.mxu2  ;;  %3703 = vmatpush.msrb.mxu0 %v3686_v14 }
 0x60c   :  { %3666 = vmatpush.msrb.mxu3 %v3617_v63 }
 0x60d   :  { %3704 = vmatpush.msrb.mxu0 %v3685_v12 }
 0x60e   :  { %3667 = vmatpush.msrb.mxu3 %v3616_v0 }
 0x60f   :  { %3705 = vmatpush.msrb.mxu0 %v3684_v17 }
 0x610   :  { %3668 = vmatpush.msrb.mxu3 %v3615_v1 }
 0x611   :  { %3706 = vmatpush.msrb.mxu0 %v3683_v11 }
 0x612   :  { %3669 = vmatpush.msrb.mxu3 %v3614_v45 }
 0x613   :  { %3707 = vmatpush.msrb.mxu0 %v3682_v3 }
 0x615   :  { %3708 = vmatpush.msrb.mxu0 %v3681_v33 }
 0x617   :  { %3709 = vmatpush.msrb.mxu0 %v3680_v34 }
 0x619   :  { %3710 = vmatpush.msrb.mxu0 %v3679_v35 }
 0x61b   :  { %3711 = vmatpush.msrb.mxu0 %v3678_v36 }
 0x61d   :  { %3712 = vmatpush.msrb.mxu0 %v3677_v37 }
 0x61e   :  { %v3203_v20 = vpop.f32.mrf.mxu1 }
 0x61f   :  { %v3204_v4 = vadd.f32 %v3203_v20, %v3184_v21  ;;  %v3263_v46 = vpop.f32.mrf.mxu0 }
 0x621   :  { %v3224_v22 = vadd.f32 %v3223_v24, %v3204_v4 }
 0x623   :  { %v3244_v27 = vadd.f32 %v3243_v25, %v3224_v22 }
 0x625   :  { %v3264_v26 = vadd.f32 %v3263_v46, %v3244_v27 }
 0x631   :  { %v3449_v59 = vpop.f32.mrf.mxu2 }
 0x632   :  { %v3450_v16 = vadd.f32 %v3449_v59, %v3428_v10 }
 0x63e   :  { %v3283_v29 = vpop.f32.mrf.mxu1 }
 0x63f   :  { %v3284_v30 = vadd.f32 %v3283_v29, %v3264_v26 }
 0x641   :  { %vm3289_vm10 = vcmp.ge.f32.partialorder %v3284_v30, 0.0  ;;  %v3293_v31 = vmul.f32 0.01, %v3284_v30 }
 0x643   :  { %v3297_v32 = vsel %vm3289_vm10, %v3284_v30, %v3293_v31 }
 0x644   :  { %3508 = vmatmul.f32.vlgmr.msra.gmra.mxu1 %v3297_v32 }
 0x645   :  { %3743 = vmatpush.msra.mxu1 %v3727_v38 }
 0x646   :  { %v3469_v13 = vpop.f32.mrf.mxu3 }
 0x647   :  { %v3470_v18 = vadd.f32 %v3469_v13, %v3450_v16  ;;  %3744 = vmatpush.msra.mxu1 %v3726_v41 }
 0x649   :  { %3745 = vmatpush.msra.mxu1 %v3725_v42 }
 0x64b   :  { %3746 = vmatpush.msra.mxu1 %v3724_v43 }
 0x64c   :  { %3588 = vmatmul.f32.vlgmr.msrb.gmra.mxu1 %v3297_v32 }
 0x64d   :  { %3747 = vmatpush.msra.mxu1 %v3723_v57 }
 0x64f   :  { %3748 = vmatpush.msra.mxu1 %v3722_v54 }
 0x650   :  { %v3549_v24 = vpop.f32.mrf.mxu3 }
 0x651   :  { %v3529_v19 = vpop.f32.mrf.mxu2  ;;  %3749 = vmatpush.msra.mxu1 %v3721_v55 }
 0x652   :  { %v3530_v21 = vadd.f32 %v3529_v19, %v3429_v39 }
 0x653   :  { %3750 = vmatpush.msra.mxu1 %v3720_v53 }
 0x654   :  { %v3550_v27 = vadd.f32 %v3549_v24, %v3530_v21 }
 0x67a   :  { %v3489_v15 = vpop.f32.mrf.mxu0 }
 0x67b   :  { %v3490_v8 = vadd.f32 %v3489_v15, %v3470_v18 }
 0x682   :  { %v3569_v25 = vpop.f32.mrf.mxu0 }
 0x683   :  { %v3570_v26 = vadd.f32 %v3569_v25, %v3550_v27 }
 0x6c1   :  { %v3509_v20 = vpop.f32.mrf.mxu1 }
 0x6c2   :  { %v3510_v4 = vadd.f32 %v3509_v20, %v3490_v8 }
 0x6c4   :  { %vm3592_vm11 = vcmp.ge.f32.partialorder %v3510_v4, 0.0  ;;  %v3594_v22 = vmul.f32 0.01, %v3510_v4 }
 0x6c6   :  { %v3596_v46 = vsel %vm3592_vm11, %v3510_v4, %v3594_v22 }
 0x6c7   :  { %3650 = vmatmul.f32.vlgmr.msra.gmra.mxu2 %v3596_v46 }
 0x6c9   :  { %v3589_v29 = vpop.f32.mrf.mxu1 }
 0x6ca   :  { %v3590_v30 = vadd.f32 %v3589_v29, %v3570_v26 }
 0x6cc   :  { %vm3593_vm12 = vcmp.ge.f32.partialorder %v3590_v30, 0.0  ;;  %v3595_v31 = vmul.f32 0.01, %v3590_v30 }
 0x6ce   :  { %v3597_v32 = vsel %vm3593_vm12, %v3590_v30, %v3595_v31 }
 0x6cf   :  { %3670 = vmatmul.f32.vlgmr.msrb.gmra.mxu3 %v3597_v32 }
 0x74a   :  { %v3651_v48 = vpop.f32.mrf.mxu2 }
 0x74b   :  { %v3652_v23 = vadd.f32 %v3814_v47, %v3651_v48 }
 0x752   :  { %v3671_v49 = vpop.f32.mrf.mxu3 }
 0x753   :  { %v3672_v50 = vadd.f32 %v3671_v49, %v3652_v23 }
 0x755   :  { %vm3674_vm13 = vcmp.ge.f32.partialorder %v3672_v50, 0.0  ;;  %v3675_v51 = vmul.f32 0.01, %v3672_v50 }
 0x757   :  { %v3676_v52 = vsel %vm3674_vm13, %v3672_v50, %v3675_v51 }
 0x758   :  { %3713 = vmatmul.f32.vlgmr.msrb.gmra.mxu0 %v3676_v52 }
 0x7d5   :  { %v3714_v40 = vpop.f32.mrf.mxu0 }
 0x7d6   :  { %v3715_v60 = vadd.f32 %v3815_v56, %v3714_v40 }
 0x7d8   :  { %vm3717_vm14 = vcmp.ge.f32.partialorder %v3715_v60, 0.0  ;;  %v3718_v44 = vmul.f32 0.01, %v3715_v60 }
 0x7da   :  { %v3719_v61 = vsel %vm3717_vm14, %v3715_v60, %v3718_v44 }
 0x7db   :  { %3779 = vmatmul.msk.f32.vlgmr.msra.gmra.mxu1 %vm509_vm6, %v3719_v61 }
 0x858   :  { %v3752_v63 = vpop.f32.mrf.mxu1 }
 0x859   :  { %v3753_v0 = vadd.f32 %v3816_v62, %v3752_v63 }
 0x85b   :  { %vm3755_vm15 = vcmp.ge.f32.partialorder %v3753_v0, 0.0  ;;  %v3756_v1 = vmul.f32 0.01, %v3753_v0 }
 0x85d   :  { %v3757_v45 = vsel %vm3755_vm15, %v3753_v0, %v3756_v1 }
 0x85e   :  { %3758 = vst [vmem:[%s4880_s16] sm:$0x3] %v3757_v45 }
 0x85f   :  { %3763 = vsyncpa [#allocation3], 1 }
 0x860   :  { %3764 = vsyncpa [#allocation5], 1 }
 0x861   :  { %3765 = vsyncpa [#allocation8], 1 }
 0x862   :  { %3766 = vsyncpa [#allocation11], 1 }
 0x863   :  { %3767 = vsyncpa [#allocation14], 1 }
 0x864   :  { %3768 = vsyncpa [#allocation17], 1 }
 0x865   :  { %3769 = vsyncpa [#allocation20], 1 }
 0x866   :  { %3770 = vsyncpa [#allocation23], 1 }
 0x867   :  { %3771 = vsyncpa [#allocation26], 1 }
 0x868   :  { %3772 = vsyncpa [#allocation29], 1 }
 0x869   :  { %3773 = vsyncpa [#allocation32], 1 }
 0x86a   :  { %3774 = vsyncpa [#allocation35], 1 }

</bundles_post_ra>
